<compile_context>
chip_gen: v7x
topology: tpu7x:2x2x1
jax: 0.10.0
libtpu: 0.0.40
codegen_flags: <defaults>
</compile_context>

<pallas_src>
import math
import functools

import jax
import jax.numpy as jnp
from jax import lax
from jax.experimental import pallas as pl
from jax.experimental.pallas import tpu as pltpu

LN_EPS = 1e-5


def _gelu_new(x):
    # GPT-2 "gelu_new" (tanh approximation), computed in f32.
    return 0.5 * x * (1.0 + jnp.tanh(
        math.sqrt(2.0 / math.pi) * (x + 0.044715 * x * x * x)))


def _layer_norm(x, g, b):
    mu = jnp.mean(x, axis=-1, keepdims=True)
    var = jnp.mean((x - mu) ** 2, axis=-1, keepdims=True)
    return (x - mu) * lax.rsqrt(var + LN_EPS) * g + b


def _transformer_layer_kernel(
    zs_ref,                       # (Bblk, T, D)   f32
    w_in_ref, b_in_ref,           # (D, E) mm, (1, E) f32
    wpe_ref,                      # (T, E) f32     (sliced from (max_pos, E))
    ln1_g_ref, ln1_b_ref,         # (1, 1, E) f32
    w_qkv_ref, b_qkv_ref,         # (1, E, 3E) mm, (1, 1, 3E) f32
    w_ap_ref, b_ap_ref,           # (1, E, E)  mm, (1, 1, E)  f32
    ln2_g_ref, ln2_b_ref,         # (1, 1, E) f32
    w_fc_ref, b_fc_ref,           # (1, E, 4E) mm, (1, 1, 4E) f32
    w_mp_ref, b_mp_ref,           # (1, 4E, E) mm, (1, 1, E)  f32
    lnf_g_ref, lnf_b_ref,         # (1, E) f32
    w_out_ref, b_out_ref,         # (1, E) f32, (1, 1) f32
    out_ref,                      # (1, Bblk, T) f32
    h_ref,                        # VMEM scratch (Bblk, T, E) f32 (residual)
    *, n_head,
):
    l = pl.program_id(1)
    n_layer = pl.num_programs(1)
    Bblk, T, D = zs_ref.shape
    E = w_in_ref.shape[1]
    hd = E // n_head
    scale = 1.0 / math.sqrt(hd)
    mm = w_qkv_ref.dtype          # matmul input dtype (bf16 by default)

    # ---- first layer step: read_in + position embedding -> residual ----
    @pl.when(l == 0)
    def _():
        zs = zs_ref[...].reshape(Bblk * T, D).astype(mm)
        emb = jnp.dot(zs, w_in_ref[...],
                      preferred_element_type=jnp.float32) + b_in_ref[...]
        h_ref[...] = emb.reshape(Bblk, T, E) + wpe_ref[...][None]

    h = h_ref[...]                                         # (Bblk, T, E) f32

    # causal mask: key index <= query index
    qi = lax.broadcasted_iota(jnp.int32, (T, T), 0)
    ki = lax.broadcasted_iota(jnp.int32, (T, T), 1)
    causal = (ki <= qi)[None]                              # (1, T, T)

    # ---- attention block ----
    x = _layer_norm(h, ln1_g_ref[0], ln1_b_ref[0])         # f32
    qkv = jnp.dot(x.reshape(Bblk * T, E).astype(mm), w_qkv_ref[0],
                  preferred_element_type=jnp.float32) + b_qkv_ref[0]
    qkv = qkv.reshape(Bblk, T, 3 * E)                      # f32

    # TODO(synk): heads kept as a (small) static loop for robust Mosaic
    #             lowering; each head's matmuls are batched over Bblk.
    heads = []
    for hi in range(n_head):
        q = (qkv[:, :, hi * hd:(hi + 1) * hd] * scale).astype(mm)
        k = qkv[:, :, E + hi * hd:E + (hi + 1) * hd].astype(mm)
        v = qkv[:, :, 2 * E + hi * hd:2 * E + (hi + 1) * hd].astype(mm)
        s = jnp.einsum("bqd,bkd->bqk", q, k,
                       preferred_element_type=jnp.float32)     # f32 scores
        s = jnp.where(causal, s, -1e30)
        p = jnp.exp(s - jnp.max(s, axis=-1, keepdims=True))
        p = p * pl.reciprocal(jnp.sum(p, axis=-1, keepdims=True), approx=True)
        heads.append(jnp.einsum("bqk,bkd->bqd", p.astype(mm), v,
                                preferred_element_type=jnp.float32))
    attn = jnp.concatenate(heads, axis=-1)                 # (Bblk, T, E) f32
    proj = jnp.dot(attn.reshape(Bblk * T, E).astype(mm), w_ap_ref[0],
                   preferred_element_type=jnp.float32) + b_ap_ref[0]
    h = h + proj.reshape(Bblk, T, E)

    # ---- MLP block ----
    x2 = _layer_norm(h, ln2_g_ref[0], ln2_b_ref[0])
    ff = jnp.dot(x2.reshape(Bblk * T, E).astype(mm), w_fc_ref[0],
                 preferred_element_type=jnp.float32) + b_fc_ref[0]
    ff = _gelu_new(ff)                                     # f32
    mp = jnp.dot(ff.astype(mm), w_mp_ref[0],
                 preferred_element_type=jnp.float32) + b_mp_ref[0]
    h = h + mp.reshape(Bblk, T, E)

    h_ref[...] = h

    # ---- last layer step: LN_f + read_out (VPU multiply + lane reduce) ----
    @pl.when(l == n_layer - 1)
    def _():
        hf = _layer_norm(h, lnf_g_ref[...], lnf_b_ref[...])
        pred = jnp.sum(hf * w_out_ref[...], axis=-1) + b_out_ref[...]
        out_ref[0] = pred                                  # (Bblk, T)


def _pick_block_b(B, T, target_rows=256):
    """Largest divisor of B with Bblk*T not (much) beyond ~target_rows."""
    want = max(1, -(-target_rows // T))
    best = 1
    for cand in range(1, B + 1):
        if B % cand == 0 and cand <= want:
            best = cand
    return best


def from_language_transformer_forward(xs, ys, params, *, n_layer, n_head,
                                      matmul_dtype=jnp.bfloat16,
                                      block_b=None, inds=None):
    """xs: (B, N, D) f32, ys: (B, N) f32  ->  (B, N) f32."""
    B, N, D = xs.shape
    T = 2 * N
    E = params["w_in"].shape[1]
    hd = E // n_head
    assert params["wpe"].shape[0] >= T, "position table shorter than 2N"

    # _combine (plain-JAX glue): interleave x_i and [y_i, 0, ..., 0]
    ys_full = jnp.concatenate(
        [ys[..., None], jnp.zeros((B, N, D - 1), xs.dtype)], axis=-1)
    zs = jnp.stack([xs, ys_full], axis=2).reshape(B, T, D)

    bblk = block_b if block_b is not None else _pick_block_b(B, T)
    assert B % bblk == 0
    nb = B // bblk

    # bf16 storage for the matmul weights (f32 accumulation in-kernel).
    mm = matmul_dtype
    w_in = params["w_in"].astype(mm)
    w_qkv = params["w_qkv"].astype(mm)
    w_ap = params["w_ap"].astype(mm)
    w_fc = params["w_fc"].astype(mm)
    w_mp = params["w_mp"].astype(mm)

    args = [
        zs,
        w_in, params["b_in"], params["wpe"],
        params["ln1_g"], params["ln1_b"],
        w_qkv, params["b_qkv"],
        w_ap, params["b_ap"],
        params["ln2_g"], params["ln2_b"],
        w_fc, params["b_fc"],
        w_mp, params["b_mp"],
        params["lnf_g"], params["lnf_b"],
        params["w_out"], params["b_out"],
    ]

    def full_spec(arr):
        return pl.BlockSpec(arr.shape, lambda b, l, _n=arr.ndim: (0,) * _n)

    def layer_spec(arr):  # (L, ...) -> stream one layer per grid step
        return pl.BlockSpec((1,) + tuple(arr.shape[1:]),
                            lambda b, l, _n=arr.ndim - 1: (l,) + (0,) * _n)

    in_specs = [
        pl.BlockSpec((bblk, T, D), lambda b, l: (b, 0, 0)),    # zs
        full_spec(w_in), full_spec(params["b_in"]),
        pl.BlockSpec((T, E), lambda b, l: (0, 0)),             # wpe[:2N]
        layer_spec(params["ln1_g"]), layer_spec(params["ln1_b"]),
        layer_spec(w_qkv), layer_spec(params["b_qkv"]),
        layer_spec(w_ap), layer_spec(params["b_ap"]),
        layer_spec(params["ln2_g"]), layer_spec(params["ln2_b"]),
        layer_spec(w_fc), layer_spec(params["b_fc"]),
        layer_spec(w_mp), layer_spec(params["b_mp"]),
        full_spec(params["lnf_g"]), full_spec(params["lnf_b"]),
        full_spec(params["w_out"]), full_spec(params["b_out"]),
    ]

    # Advisory cost estimate so XLA schedules the surrounding glue sensibly.
    flops = (2 * B * T * D * E
             + 2 * B * T * n_layer * (3 * E * E + E * E + 8 * E * E)
             + 4 * B * n_layer * n_head * T * T * hd
             + 2 * B * T * E)
    transcendentals = B * n_layer * (n_head * T * T + 4 * T * E)
    weight_bytes = sum(int(a.size) * a.dtype.itemsize for a in args[1:])
    bytes_accessed = int(weight_bytes * nb + zs.size * 4 + B * T * 4)

    kernel = functools.partial(_transformer_layer_kernel, n_head=n_head)

    pred = pl.pallas_call(
        kernel,
        out_shape=jax.ShapeDtypeStruct((nb, bblk, T), jnp.float32),
        grid=(nb, n_layer),
        in_specs=in_specs,
        out_specs=pl.BlockSpec((1, bblk, T), lambda b, l: (b, 0, 0)),
        scratch_shapes=[pltpu.VMEM((bblk, T, E), jnp.float32)],
        compiler_params=pltpu.CompilerParams(
            dimension_semantics=("parallel", "arbitrary"),
            vmem_limit_bytes=64 * 1024 * 1024),
        cost_estimate=pl.CostEstimate(
            flops=int(flops),
            transcendentals=int(transcendentals),
            bytes_accessed=bytes_accessed),
    )(*args)

    pred = pred.reshape(B, T)[:, ::2]          # prediction[:, ::2, 0]
    if inds is not None:
        pred = pred[:, jnp.asarray(inds)]
    return pred


def init_params(key, *, n_dims, n_embd, n_layer, max_pos):
    E, D, L = n_embd, n_dims, n_layer
    ks = jax.random.split(key, 8)
    std = 0.02
    f32 = jnp.float32
    return {
        "w_in":  jax.random.normal(ks[0], (D, E), f32) * std,
        "b_in":  jnp.zeros((1, E), f32),
        "wpe":   jax.random.normal(ks[1], (max_pos, E), f32) * std,
        "ln1_g": jnp.ones((L, 1, E), f32),
        "ln1_b": jnp.zeros((L, 1, E), f32),
        "w_qkv": jax.random.normal(ks[2], (L, E, 3 * E), f32) * std,
        "b_qkv": jnp.zeros((L, 1, 3 * E), f32),
        "w_ap":  jax.random.normal(ks[3], (L, E, E), f32) * std,
        "b_ap":  jnp.zeros((L, 1, E), f32),
        "ln2_g": jnp.ones((L, 1, E), f32),
        "ln2_b": jnp.zeros((L, 1, E), f32),
        "w_fc":  jax.random.normal(ks[4], (L, E, 4 * E), f32) * std,
        "b_fc":  jnp.zeros((L, 1, 4 * E), f32),
        "w_mp":  jax.random.normal(ks[5], (L, 4 * E, E), f32) * std,
        "b_mp":  jnp.zeros((L, 1, E), f32),
        "lnf_g": jnp.ones((1, E), f32),
        "lnf_b": jnp.zeros((1, E), f32),
        "w_out": jax.random.normal(ks[6], (1, E), f32) * std,  # PyTorch (1, E)
        "b_out": jnp.zeros((1, 1), f32),
    }


def _reference_forward(xs, ys, params, *, n_layer, n_head, mm=jnp.bfloat16):
    """Pure-JAX reference with the same math / precision as the kernel."""
    B, N, D = xs.shape
    T = 2 * N
    E = params["w_in"].shape[1]
    hd = E // n_head
    ys_full = jnp.concatenate(
        [ys[..., None], jnp.zeros((B, N, D - 1), xs.dtype)], axis=-1)
    zs = jnp.stack([xs, ys_full], axis=2).reshape(B, T, D)
    h = (jnp.dot(zs.reshape(B * T, D).astype(mm), params["w_in"].astype(mm),
                 preferred_element_type=jnp.float32)
         + params["b_in"]).reshape(B, T, E)
    h = h + params["wpe"][:T][None]
    causal = (jnp.arange(T)[None, :] <= jnp.arange(T)[:, None])[None]
    for l in range(n_layer):
        x = _layer_norm(h, params["ln1_g"][l], params["ln1_b"][l])
        qkv = (jnp.dot(x.reshape(B * T, E).astype(mm),
                       params["w_qkv"][l].astype(mm),
                       preferred_element_type=jnp.float32)
               + params["b_qkv"][l]).reshape(B, T, 3 * E)
        heads = []
        for hi in range(n_head):
            q = qkv[:, :, hi * hd:(hi + 1) * hd] / math.sqrt(hd)
            k = qkv[:, :, E + hi * hd:E + (hi + 1) * hd]
            v = qkv[:, :, 2 * E + hi * hd:2 * E + (hi + 1) * hd]
            s = jnp.einsum("bqd,bkd->bqk", q.astype(mm), k.astype(mm),
                           preferred_element_type=jnp.float32)
            s = jnp.where(causal, s, -1e30)
            p = jax.nn.softmax(s, axis=-1)
            heads.append(jnp.einsum("bqk,bkd->bqd", p.astype(mm),
                                    v.astype(mm),
                                    preferred_element_type=jnp.float32))
        attn = jnp.concatenate(heads, axis=-1)
        proj = (jnp.dot(attn.reshape(B * T, E).astype(mm),
                        params["w_ap"][l].astype(mm),
                        preferred_element_type=jnp.float32)
                + params["b_ap"][l]).reshape(B, T, E)
        h = h + proj
        x2 = _layer_norm(h, params["ln2_g"][l], params["ln2_b"][l])
        ff = _gelu_new(jnp.dot(x2.reshape(B * T, E).astype(mm),
                               params["w_fc"][l].astype(mm),
                               preferred_element_type=jnp.float32)
                       + params["b_fc"][l])
        mp = (jnp.dot(ff.astype(mm), params["w_mp"][l].astype(mm),
                      preferred_element_type=jnp.float32)
              + params["b_mp"][l]).reshape(B, T, E)
        h = h + mp
    hf = _layer_norm(h, params["lnf_g"], params["lnf_b"])
    pred = jnp.sum(hf * params["w_out"], axis=-1) + params["b_out"][0, 0]
    return pred[:, ::2]


if __name__ == "__main__":
    # Small synthetic config: n_dims=8, n_points=8 (seq len 16), n_embd=32,
    # 2 layers, 4 heads. Position table (64) > sequence length to exercise
    # the wpe[:2N] BlockSpec slice.
    B, N, D = 4, 8, 8
    E, L, H = 32, 2, 4
    T = 2 * N

    key = jax.random.PRNGKey(0)
    k_x, k_y, k_p = jax.random.split(key, 3)
    xs = jax.random.normal(k_x, (B, N, D), jnp.float32)
    ys = jax.random.normal(k_y, (B, N), jnp.float32)
    params = init_params(k_p, n_dims=D, n_embd=E, n_layer=L, max_pos=64)

    out = from_language_transformer_forward(xs, ys, params,
                                            n_layer=L, n_head=H)
    out = jax.block_until_ready(out)
    assert out.shape == (B, N), out.shape
    assert bool(jnp.all(jnp.isfinite(out)))

    # Correctness check against a pure-JAX reference (same bf16 matmul
    # inputs / f32 accumulation); loose tolerance covers the approx
    # reciprocal in the kernel softmax.
    ref = jax.block_until_ready(
        _reference_forward(xs, ys, params, n_layer=L, n_head=H))
    assert bool(jnp.allclose(out, ref, atol=3e-2, rtol=3e-2)), (
        float(jnp.max(jnp.abs(out - ref))))

    print("KERNEL_OK")
</pallas_src>

<mosaic_0001>
module attributes {stable_mosaic.version = 11 : i64} {
  func.func @_transformer_layer_kernel(%arg0: i32, %arg1: i32, %arg2: memref<4x16x8xf32, #tpu.memory_space<vmem>>, %arg3: memref<8x32xbf16, #tpu.memory_space<vmem>>, %arg4: memref<1x32xf32, #tpu.memory_space<vmem>>, %arg5: memref<16x32xf32, #tpu.memory_space<vmem>>, %arg6: memref<1x1x32xf32, #tpu.memory_space<vmem>>, %arg7: memref<1x1x32xf32, #tpu.memory_space<vmem>>, %arg8: memref<1x32x96xbf16, #tpu.memory_space<vmem>>, %arg9: memref<1x1x96xf32, #tpu.memory_space<vmem>>, %arg10: memref<1x32x32xbf16, #tpu.memory_space<vmem>>, %arg11: memref<1x1x32xf32, #tpu.memory_space<vmem>>, %arg12: memref<1x1x32xf32, #tpu.memory_space<vmem>>, %arg13: memref<1x1x32xf32, #tpu.memory_space<vmem>>, %arg14: memref<1x32x128xbf16, #tpu.memory_space<vmem>>, %arg15: memref<1x1x128xf32, #tpu.memory_space<vmem>>, %arg16: memref<1x128x32xbf16, #tpu.memory_space<vmem>>, %arg17: memref<1x1x32xf32, #tpu.memory_space<vmem>>, %arg18: memref<1x32xf32, #tpu.memory_space<vmem>>, %arg19: memref<1x32xf32, #tpu.memory_space<vmem>>, %arg20: memref<1x32xf32, #tpu.memory_space<vmem>>, %arg21: memref<1x1xf32, #tpu.memory_space<vmem>>, %arg22: memref<1x4x16xf32, #tpu.memory_space<vmem>>, %arg23: memref<4x16x32xf32, #tpu.memory_space<vmem>>) attributes {dimension_semantics = [#tpu.dimension_semantics<parallel>, #tpu.dimension_semantics<arbitrary>], iteration_bounds = array<i64: 1, 2>, scalar_prefetch = 0 : i64, scratch_operands = 1 : i64, tpu.core_type = #tpu.core_type<tc>, window_params = [{transform_indices = @transform_0, window_bounds = array<i64: 4, 16, 8>}, {pipeline_mode = #tpu.pipeline_mode<synchronous>, transform_indices = @transform_1, window_bounds = array<i64: 8, 32>}, {pipeline_mode = #tpu.pipeline_mode<synchronous>, transform_indices = @transform_2, window_bounds = array<i64: 1, 32>}, {transform_indices = @transform_3, window_bounds = array<i64: 16, 32>}, {transform_indices = @transform_4, window_bounds = array<i64: 1, 1, 32>}, {transform_indices = @transform_5, window_bounds = array<i64: 1, 1, 32>}, {transform_indices = @transform_6, window_bounds = array<i64: 1, 32, 96>}, {transform_indices = @transform_7, window_bounds = array<i64: 1, 1, 96>}, {transform_indices = @transform_8, window_bounds = array<i64: 1, 32, 32>}, {transform_indices = @transform_9, window_bounds = array<i64: 1, 1, 32>}, {transform_indices = @transform_10, window_bounds = array<i64: 1, 1, 32>}, {transform_indices = @transform_11, window_bounds = array<i64: 1, 1, 32>}, {transform_indices = @transform_12, window_bounds = array<i64: 1, 32, 128>}, {transform_indices = @transform_13, window_bounds = array<i64: 1, 1, 128>}, {transform_indices = @transform_14, window_bounds = array<i64: 1, 128, 32>}, {transform_indices = @transform_15, window_bounds = array<i64: 1, 1, 32>}, {pipeline_mode = #tpu.pipeline_mode<synchronous>, transform_indices = @transform_16, window_bounds = array<i64: 1, 32>}, {pipeline_mode = #tpu.pipeline_mode<synchronous>, transform_indices = @transform_17, window_bounds = array<i64: 1, 32>}, {pipeline_mode = #tpu.pipeline_mode<synchronous>, transform_indices = @transform_18, window_bounds = array<i64: 1, 32>}, {pipeline_mode = #tpu.pipeline_mode<synchronous>, transform_indices = @transform_19, window_bounds = array<i64: 1, 1>}, {transform_indices = @transform_20, window_bounds = array<i64: 1, 4, 16>}]} {
    %c0_i32 = arith.constant 0 : i32
    %0 = arith.cmpi eq, %arg1, %c0_i32 : i32
    %1 = arith.extui %0 : i1 to i32
    %c0_i32_0 = arith.constant 0 : i32
    %2 = arith.cmpi ne, %1, %c0_i32_0 : i32
    scf.if %2 {
      %c0_84 = arith.constant 0 : index
      %c0_85 = arith.constant 0 : index
      %c0_86 = arith.constant 0 : index
      %222 = vector.load %arg2[%c0_84, %c0_85, %c0_86] : memref<4x16x8xf32, #tpu.memory_space<vmem>>, vector<4x16x8xf32>
      %223 = vector.shape_cast %222 : vector<4x16x8xf32> to vector<64x8xf32>
      %224 = arith.truncf %223 : vector<64x8xf32> to vector<64x8xbf16>
      %c0_87 = arith.constant 0 : index
      %c0_88 = arith.constant 0 : index
      %225 = vector.load %arg3[%c0_87, %c0_88] : memref<8x32xbf16, #tpu.memory_space<vmem>>, vector<8x32xbf16>
      %cst_89 = arith.constant dense<0.000000e+00> : vector<64x32xf32>
      %226 = tpu.matmul %224, %225, %cst_89 {dimension_numbers = #tpu.dot_dimension_numbers<[1], [0], [0], [1], [0, 0, 1, 1], [], []>} : vector<64x8xbf16>, vector<8x32xbf16>, vector<64x32xf32> -> vector<64x32xf32>
      %c0_90 = arith.constant 0 : index
      %c0_91 = arith.constant 0 : index
      %227 = vector.load %arg4[%c0_90, %c0_91] : memref<1x32xf32, #tpu.memory_space<vmem>>, vector<1x32xf32>
      %228 = vector.broadcast %227 : vector<1x32xf32> to vector<64x32xf32>
      %229 = arith.addf %226, %228 : vector<64x32xf32>
      %230 = vector.shape_cast %229 : vector<64x32xf32> to vector<4x16x32xf32>
      %c0_92 = arith.constant 0 : index
      %c0_93 = arith.constant 0 : index
      %231 = vector.load %arg5[%c0_92, %c0_93] : memref<16x32xf32, #tpu.memory_space<vmem>>, vector<16x32xf32>
      %232 = vector.shape_cast %231 : vector<16x32xf32> to vector<1x16x32xf32>
      %233 = vector.broadcast %232 : vector<1x16x32xf32> to vector<4x16x32xf32>
      %234 = arith.addf %230, %233 : vector<4x16x32xf32>
      %c0_94 = arith.constant 0 : index
      %c0_95 = arith.constant 0 : index
      %c0_96 = arith.constant 0 : index
      %235 = vector.load %arg23[%c0_94, %c0_95, %c0_96] : memref<4x16x32xf32, #tpu.memory_space<vmem>>, vector<4x16x32xf32>
      tpu.vector_store %arg23[%c0_94, %c0_95, %c0_96], %234 {strides = array<i32>} : memref<4x16x32xf32, #tpu.memory_space<vmem>>, vector<4x16x32xf32>,
    } else {
    }
    %c0 = arith.constant 0 : index
    %c0_1 = arith.constant 0 : index
    %c0_2 = arith.constant 0 : index
    %3 = vector.load %arg23[%c0, %c0_1, %c0_2] : memref<4x16x32xf32, #tpu.memory_space<vmem>>, vector<4x16x32xf32>
    %4 = tpu.iota {dimensions = array<i32: 0>} : vector<16x16xi32>
    %5 = tpu.iota {dimensions = array<i32: 1>} : vector<16x16xi32>
    %6 = arith.cmpi sle, %5, %4 : vector<16x16xi32>
    %7 = vector.shape_cast %6 : vector<16x16xi1> to vector<1x16x16xi1>
    %c0_3 = arith.constant 0 : index
    %c0_4 = arith.constant 0 : index
    %c0_5 = arith.constant 0 : index
    %8 = vector.load %arg6[%c0_3, %c0_4, %c0_5] : memref<1x1x32xf32, #tpu.memory_space<vmem>>, vector<1x1x32xf32>
    %9 = vector.shape_cast %8 : vector<1x1x32xf32> to vector<1x32xf32>
    %c0_6 = arith.constant 0 : index
    %c0_7 = arith.constant 0 : index
    %c0_8 = arith.constant 0 : index
    %10 = vector.load %arg7[%c0_6, %c0_7, %c0_8] : memref<1x1x32xf32, #tpu.memory_space<vmem>>, vector<1x1x32xf32>
    %11 = vector.shape_cast %10 : vector<1x1x32xf32> to vector<1x32xf32>
    %cst = arith.constant dense<0.000000e+00> : vector<4x16xf32>
    %12 = vector.multi_reduction <add>, %3, %cst [2] : vector<4x16x32xf32> to vector<4x16xf32>
    %13 = vector.shape_cast %12 : vector<4x16xf32> to vector<4x16x1xf32>
    %cst_9 = arith.constant 3.200000e+01 : f32
    %14 = vector.broadcast %cst_9 : f32 to vector<4x16x1xf32>
    %15 = arith.divf %13, %14 : vector<4x16x1xf32>
    %16 = vector.broadcast %15 : vector<4x16x1xf32> to vector<4x16x32xf32>
    %17 = arith.subf %3, %16 : vector<4x16x32xf32>
    %18 = arith.mulf %17, %17 : vector<4x16x32xf32>
    %cst_10 = arith.constant dense<0.000000e+00> : vector<4x16xf32>
    %19 = vector.multi_reduction <add>, %18, %cst_10 [2] : vector<4x16x32xf32> to vector<4x16xf32>
    %20 = vector.shape_cast %19 : vector<4x16xf32> to vector<4x16x1xf32>
    %cst_11 = arith.constant 3.200000e+01 : f32
    %21 = vector.broadcast %cst_11 : f32 to vector<4x16x1xf32>
    %22 = arith.divf %20, %21 : vector<4x16x1xf32>
    %23 = vector.broadcast %15 : vector<4x16x1xf32> to vector<4x16x32xf32>
    %24 = arith.subf %3, %23 : vector<4x16x32xf32>
    %cst_12 = arith.constant 9.99999974E-6 : f32
    %25 = vector.broadcast %cst_12 : f32 to vector<4x16x1xf32>
    %26 = arith.addf %22, %25 : vector<4x16x1xf32>
    %27 = math.rsqrt %26 : vector<4x16x1xf32>
    %28 = vector.broadcast %27 : vector<4x16x1xf32> to vector<4x16x32xf32>
    %29 = arith.mulf %24, %28 : vector<4x16x32xf32>
    %30 = vector.shape_cast %9 : vector<1x32xf32> to vector<1x1x32xf32>
    %31 = vector.broadcast %30 : vector<1x1x32xf32> to vector<4x16x32xf32>
    %32 = arith.mulf %29, %31 : vector<4x16x32xf32>
    %33 = vector.shape_cast %11 : vector<1x32xf32> to vector<1x1x32xf32>
    %34 = vector.broadcast %33 : vector<1x1x32xf32> to vector<4x16x32xf32>
    %35 = arith.addf %32, %34 : vector<4x16x32xf32>
    %36 = vector.shape_cast %35 : vector<4x16x32xf32> to vector<64x32xf32>
    %37 = arith.truncf %36 : vector<64x32xf32> to vector<64x32xbf16>
    %c0_13 = arith.constant 0 : index
    %c0_14 = arith.constant 0 : index
    %c0_15 = arith.constant 0 : index
    %38 = vector.load %arg8[%c0_13, %c0_14, %c0_15] : memref<1x32x96xbf16, #tpu.memory_space<vmem>>, vector<1x32x96xbf16>
    %39 = vector.shape_cast %38 : vector<1x32x96xbf16> to vector<32x96xbf16>
    %cst_16 = arith.constant dense<0.000000e+00> : vector<64x96xf32>
    %40 = tpu.matmul %37, %39, %cst_16 {dimension_numbers = #tpu.dot_dimension_numbers<[1], [0], [0], [1], [0, 0, 1, 1], [], []>} : vector<64x32xbf16>, vector<32x96xbf16>, vector<64x96xf32> -> vector<64x96xf32>
    %c0_17 = arith.constant 0 : index
    %c0_18 = arith.constant 0 : index
    %c0_19 = arith.constant 0 : index
    %41 = vector.load %arg9[%c0_17, %c0_18, %c0_19] : memref<1x1x96xf32, #tpu.memory_space<vmem>>, vector<1x1x96xf32>
    %42 = vector.shape_cast %41 : vector<1x1x96xf32> to vector<1x96xf32>
    %43 = vector.broadcast %42 : vector<1x96xf32> to vector<64x96xf32>
    %44 = arith.addf %40, %43 : vector<64x96xf32>
    %45 = vector.shape_cast %44 : vector<64x96xf32> to vector<4x16x96xf32>
    %46 = vector.extract_strided_slice %45 {offsets = [0, 0, 0], sizes = [4, 16, 8], strides = [1, 1, 1]} : vector<4x16x96xf32> to vector<4x16x8xf32>
    %cst_20 = arith.constant 0.353553385 : f32
    %47 = vector.broadcast %cst_20 : f32 to vector<4x16x8xf32>
    %48 = arith.mulf %46, %47 : vector<4x16x8xf32>
    %49 = arith.truncf %48 : vector<4x16x8xf32> to vector<4x16x8xbf16>
    %50 = vector.extract_strided_slice %45 {offsets = [0, 0, 32], sizes = [4, 16, 8], strides = [1, 1, 1]} : vector<4x16x96xf32> to vector<4x16x8xf32>
    %51 = arith.truncf %50 : vector<4x16x8xf32> to vector<4x16x8xbf16>
    %52 = vector.extract_strided_slice %45 {offsets = [0, 0, 64], sizes = [4, 16, 8], strides = [1, 1, 1]} : vector<4x16x96xf32> to vector<4x16x8xf32>
    %53 = arith.truncf %52 : vector<4x16x8xf32> to vector<4x16x8xbf16>
    "tpu.trace_start"() <{level = 10 : i32, message = "bqd,bkd->bqk"}> : () -> ()
    %cst_21 = arith.constant dense<0.000000e+00> : vector<4x16x16xf32>
    %54 = tpu.matmul %49, %51, %cst_21 {dimension_numbers = #tpu.dot_dimension_numbers<[2], [2], [1], [1], [0, 0, 0, 1, 1, 1], [0], [0]>} : vector<4x16x8xbf16>, vector<4x16x8xbf16>, vector<4x16x16xf32> -> vector<4x16x16xf32>
    %cst_22 = arith.constant -1.000000e+30 : f32
    "tpu.trace_stop"() : () -> ()
    %55 = vector.shape_cast %7 : vector<1x16x16xi1> to vector<1x16x16xi1>
    %56 = vector.broadcast %55 : vector<1x16x16xi1> to vector<4x16x16xi1>
    %57 = vector.broadcast %cst_22 : f32 to vector<4x16x16xf32>
    %58 = arith.select %56, %54, %57 : vector<4x16x16xi1>, vector<4x16x16xf32>
    %cst_23 = arith.constant dense<0xFF800000> : vector<4x16xf32>
    %59 = vector.multi_reduction <maximumf>, %58, %cst_23 [2] : vector<4x16x16xf32> to vector<4x16xf32>
    %60 = vector.shape_cast %59 : vector<4x16xf32> to vector<4x16x1xf32>
    %61 = vector.broadcast %60 : vector<4x16x1xf32> to vector<4x16x16xf32>
    %62 = arith.subf %58, %61 : vector<4x16x16xf32>
    %63 = math.exp %62 : vector<4x16x16xf32>
    %cst_24 = arith.constant dense<0.000000e+00> : vector<4x16xf32>
    %64 = vector.multi_reduction <add>, %63, %cst_24 [2] : vector<4x16x16xf32> to vector<4x16xf32>
    %65 = vector.shape_cast %64 : vector<4x16xf32> to vector<4x16x1xf32>
    %66 = tpu.reciprocal %65 {approx = true} : vector<4x16x1xf32> -> vector<4x16x1xf32>
    %67 = vector.broadcast %66 : vector<4x16x1xf32> to vector<4x16x16xf32>
    %68 = arith.mulf %63, %67 : vector<4x16x16xf32>
    %69 = arith.truncf %68 : vector<4x16x16xf32> to vector<4x16x16xbf16>
    "tpu.trace_start"() <{level = 10 : i32, message = "bqk,bkd->bqd"}> : () -> ()
    %cst_25 = arith.constant dense<0.000000e+00> : vector<4x16x8xf32>
    %70 = tpu.matmul %69, %53, %cst_25 {dimension_numbers = #tpu.dot_dimension_numbers<[2], [1], [1], [2], [0, 0, 0, 1, 1, 2], [0], [0]>} : vector<4x16x16xbf16>, vector<4x16x8xbf16>, vector<4x16x8xf32> -> vector<4x16x8xf32>
    "tpu.trace_stop"() : () -> ()
    %71 = vector.extract_strided_slice %45 {offsets = [0, 0, 8], sizes = [4, 16, 8], strides = [1, 1, 1]} : vector<4x16x96xf32> to vector<4x16x8xf32>
    %cst_26 = arith.constant 0.353553385 : f32
    %72 = vector.broadcast %cst_26 : f32 to vector<4x16x8xf32>
    %73 = arith.mulf %71, %72 : vector<4x16x8xf32>
    %74 = arith.truncf %73 : vector<4x16x8xf32> to vector<4x16x8xbf16>
    %75 = vector.extract_strided_slice %45 {offsets = [0, 0, 40], sizes = [4, 16, 8], strides = [1, 1, 1]} : vector<4x16x96xf32> to vector<4x16x8xf32>
    %76 = arith.truncf %75 : vector<4x16x8xf32> to vector<4x16x8xbf16>
    %77 = vector.extract_strided_slice %45 {offsets = [0, 0, 72], sizes = [4, 16, 8], strides = [1, 1, 1]} : vector<4x16x96xf32> to vector<4x16x8xf32>
    %78 = arith.truncf %77 : vector<4x16x8xf32> to vector<4x16x8xbf16>
    "tpu.trace_start"() <{level = 10 : i32, message = "bqd,bkd->bqk"}> : () -> ()
    %cst_27 = arith.constant dense<0.000000e+00> : vector<4x16x16xf32>
    %79 = tpu.matmul %74, %76, %cst_27 {dimension_numbers = #tpu.dot_dimension_numbers<[2], [2], [1], [1], [0, 0, 0, 1, 1, 1], [0], [0]>} : vector<4x16x8xbf16>, vector<4x16x8xbf16>, vector<4x16x16xf32> -> vector<4x16x16xf32>
    %cst_28 = arith.constant -1.000000e+30 : f32
    "tpu.trace_stop"() : () -> ()
    %80 = vector.shape_cast %7 : vector<1x16x16xi1> to vector<1x16x16xi1>
    %81 = vector.broadcast %80 : vector<1x16x16xi1> to vector<4x16x16xi1>
    %82 = vector.broadcast %cst_28 : f32 to vector<4x16x16xf32>
    %83 = arith.select %81, %79, %82 : vector<4x16x16xi1>, vector<4x16x16xf32>
    %cst_29 = arith.constant dense<0xFF800000> : vector<4x16xf32>
    %84 = vector.multi_reduction <maximumf>, %83, %cst_29 [2] : vector<4x16x16xf32> to vector<4x16xf32>
    %85 = vector.shape_cast %84 : vector<4x16xf32> to vector<4x16x1xf32>
    %86 = vector.broadcast %85 : vector<4x16x1xf32> to vector<4x16x16xf32>
    %87 = arith.subf %83, %86 : vector<4x16x16xf32>
    %88 = math.exp %87 : vector<4x16x16xf32>
    %cst_30 = arith.constant dense<0.000000e+00> : vector<4x16xf32>
    %89 = vector.multi_reduction <add>, %88, %cst_30 [2] : vector<4x16x16xf32> to vector<4x16xf32>
    %90 = vector.shape_cast %89 : vector<4x16xf32> to vector<4x16x1xf32>
    %91 = tpu.reciprocal %90 {approx = true} : vector<4x16x1xf32> -> vector<4x16x1xf32>
    %92 = vector.broadcast %91 : vector<4x16x1xf32> to vector<4x16x16xf32>
    %93 = arith.mulf %88, %92 : vector<4x16x16xf32>
    %94 = arith.truncf %93 : vector<4x16x16xf32> to vector<4x16x16xbf16>
    "tpu.trace_start"() <{level = 10 : i32, message = "bqk,bkd->bqd"}> : () -> ()
    %cst_31 = arith.constant dense<0.000000e+00> : vector<4x16x8xf32>
    %95 = tpu.matmul %94, %78, %cst_31 {dimension_numbers = #tpu.dot_dimension_numbers<[2], [1], [1], [2], [0, 0, 0, 1, 1, 2], [0], [0]>} : vector<4x16x16xbf16>, vector<4x16x8xbf16>, vector<4x16x8xf32> -> vector<4x16x8xf32>
    "tpu.trace_stop"() : () -> ()
    %96 = vector.extract_strided_slice %45 {offsets = [0, 0, 16], sizes = [4, 16, 8], strides = [1, 1, 1]} : vector<4x16x96xf32> to vector<4x16x8xf32>
    %cst_32 = arith.constant 0.353553385 : f32
    %97 = vector.broadcast %cst_32 : f32 to vector<4x16x8xf32>
    %98 = arith.mulf %96, %97 : vector<4x16x8xf32>
    %99 = arith.truncf %98 : vector<4x16x8xf32> to vector<4x16x8xbf16>
    %100 = vector.extract_strided_slice %45 {offsets = [0, 0, 48], sizes = [4, 16, 8], strides = [1, 1, 1]} : vector<4x16x96xf32> to vector<4x16x8xf32>
    %101 = arith.truncf %100 : vector<4x16x8xf32> to vector<4x16x8xbf16>
    %102 = vector.extract_strided_slice %45 {offsets = [0, 0, 80], sizes = [4, 16, 8], strides = [1, 1, 1]} : vector<4x16x96xf32> to vector<4x16x8xf32>
    %103 = arith.truncf %102 : vector<4x16x8xf32> to vector<4x16x8xbf16>
    "tpu.trace_start"() <{level = 10 : i32, message = "bqd,bkd->bqk"}> : () -> ()
    %cst_33 = arith.constant dense<0.000000e+00> : vector<4x16x16xf32>
    %104 = tpu.matmul %99, %101, %cst_33 {dimension_numbers = #tpu.dot_dimension_numbers<[2], [2], [1], [1], [0, 0, 0, 1, 1, 1], [0], [0]>} : vector<4x16x8xbf16>, vector<4x16x8xbf16>, vector<4x16x16xf32> -> vector<4x16x16xf32>
    %cst_34 = arith.constant -1.000000e+30 : f32
    "tpu.trace_stop"() : () -> ()
    %105 = vector.shape_cast %7 : vector<1x16x16xi1> to vector<1x16x16xi1>
    %106 = vector.broadcast %105 : vector<1x16x16xi1> to vector<4x16x16xi1>
    %107 = vector.broadcast %cst_34 : f32 to vector<4x16x16xf32>
    %108 = arith.select %106, %104, %107 : vector<4x16x16xi1>, vector<4x16x16xf32>
    %cst_35 = arith.constant dense<0xFF800000> : vector<4x16xf32>
    %109 = vector.multi_reduction <maximumf>, %108, %cst_35 [2] : vector<4x16x16xf32> to vector<4x16xf32>
    %110 = vector.shape_cast %109 : vector<4x16xf32> to vector<4x16x1xf32>
    %111 = vector.broadcast %110 : vector<4x16x1xf32> to vector<4x16x16xf32>
    %112 = arith.subf %108, %111 : vector<4x16x16xf32>
    %113 = math.exp %112 : vector<4x16x16xf32>
    %cst_36 = arith.constant dense<0.000000e+00> : vector<4x16xf32>
    %114 = vector.multi_reduction <add>, %113, %cst_36 [2] : vector<4x16x16xf32> to vector<4x16xf32>
    %115 = vector.shape_cast %114 : vector<4x16xf32> to vector<4x16x1xf32>
    %116 = tpu.reciprocal %115 {approx = true} : vector<4x16x1xf32> -> vector<4x16x1xf32>
    %117 = vector.broadcast %116 : vector<4x16x1xf32> to vector<4x16x16xf32>
    %118 = arith.mulf %113, %117 : vector<4x16x16xf32>
    %119 = arith.truncf %118 : vector<4x16x16xf32> to vector<4x16x16xbf16>
    "tpu.trace_start"() <{level = 10 : i32, message = "bqk,bkd->bqd"}> : () -> ()
    %cst_37 = arith.constant dense<0.000000e+00> : vector<4x16x8xf32>
    %120 = tpu.matmul %119, %103, %cst_37 {dimension_numbers = #tpu.dot_dimension_numbers<[2], [1], [1], [2], [0, 0, 0, 1, 1, 2], [0], [0]>} : vector<4x16x16xbf16>, vector<4x16x8xbf16>, vector<4x16x8xf32> -> vector<4x16x8xf32>
    "tpu.trace_stop"() : () -> ()
    %121 = vector.extract_strided_slice %45 {offsets = [0, 0, 24], sizes = [4, 16, 8], strides = [1, 1, 1]} : vector<4x16x96xf32> to vector<4x16x8xf32>
    %cst_38 = arith.constant 0.353553385 : f32
    %122 = vector.broadcast %cst_38 : f32 to vector<4x16x8xf32>
    %123 = arith.mulf %121, %122 : vector<4x16x8xf32>
    %124 = arith.truncf %123 : vector<4x16x8xf32> to vector<4x16x8xbf16>
    %125 = vector.extract_strided_slice %45 {offsets = [0, 0, 56], sizes = [4, 16, 8], strides = [1, 1, 1]} : vector<4x16x96xf32> to vector<4x16x8xf32>
    %126 = arith.truncf %125 : vector<4x16x8xf32> to vector<4x16x8xbf16>
    %127 = vector.extract_strided_slice %45 {offsets = [0, 0, 88], sizes = [4, 16, 8], strides = [1, 1, 1]} : vector<4x16x96xf32> to vector<4x16x8xf32>
    %128 = arith.truncf %127 : vector<4x16x8xf32> to vector<4x16x8xbf16>
    "tpu.trace_start"() <{level = 10 : i32, message = "bqd,bkd->bqk"}> : () -> ()
    %cst_39 = arith.constant dense<0.000000e+00> : vector<4x16x16xf32>
    %129 = tpu.matmul %124, %126, %cst_39 {dimension_numbers = #tpu.dot_dimension_numbers<[2], [2], [1], [1], [0, 0, 0, 1, 1, 1], [0], [0]>} : vector<4x16x8xbf16>, vector<4x16x8xbf16>, vector<4x16x16xf32> -> vector<4x16x16xf32>
    %cst_40 = arith.constant -1.000000e+30 : f32
    "tpu.trace_stop"() : () -> ()
    %130 = vector.shape_cast %7 : vector<1x16x16xi1> to vector<1x16x16xi1>
    %131 = vector.broadcast %130 : vector<1x16x16xi1> to vector<4x16x16xi1>
    %132 = vector.broadcast %cst_40 : f32 to vector<4x16x16xf32>
    %133 = arith.select %131, %129, %132 : vector<4x16x16xi1>, vector<4x16x16xf32>
    %cst_41 = arith.constant dense<0xFF800000> : vector<4x16xf32>
    %134 = vector.multi_reduction <maximumf>, %133, %cst_41 [2] : vector<4x16x16xf32> to vector<4x16xf32>
    %135 = vector.shape_cast %134 : vector<4x16xf32> to vector<4x16x1xf32>
    %136 = vector.broadcast %135 : vector<4x16x1xf32> to vector<4x16x16xf32>
    %137 = arith.subf %133, %136 : vector<4x16x16xf32>
    %138 = math.exp %137 : vector<4x16x16xf32>
    %cst_42 = arith.constant dense<0.000000e+00> : vector<4x16xf32>
    %139 = vector.multi_reduction <add>, %138, %cst_42 [2] : vector<4x16x16xf32> to vector<4x16xf32>
    %140 = vector.shape_cast %139 : vector<4x16xf32> to vector<4x16x1xf32>
    %141 = tpu.reciprocal %140 {approx = true} : vector<4x16x1xf32> -> vector<4x16x1xf32>
    %142 = vector.broadcast %141 : vector<4x16x1xf32> to vector<4x16x16xf32>
    %143 = arith.mulf %138, %142 : vector<4x16x16xf32>
    %144 = arith.truncf %143 : vector<4x16x16xf32> to vector<4x16x16xbf16>
    "tpu.trace_start"() <{level = 10 : i32, message = "bqk,bkd->bqd"}> : () -> ()
    %cst_43 = arith.constant dense<0.000000e+00> : vector<4x16x8xf32>
    %145 = tpu.matmul %144, %128, %cst_43 {dimension_numbers = #tpu.dot_dimension_numbers<[2], [1], [1], [2], [0, 0, 0, 1, 1, 2], [0], [0]>} : vector<4x16x16xbf16>, vector<4x16x8xbf16>, vector<4x16x8xf32> -> vector<4x16x8xf32>
    "tpu.trace_stop"() : () -> ()
    %146 = tpu.concatenate %70, %95, %120, %145 in 2 : vector<4x16x8xf32>, vector<4x16x8xf32>, vector<4x16x8xf32>, vector<4x16x8xf32> -> vector<4x16x32xf32>
    %147 = vector.shape_cast %146 : vector<4x16x32xf32> to vector<64x32xf32>
    %148 = arith.truncf %147 : vector<64x32xf32> to vector<64x32xbf16>
    %c0_44 = arith.constant 0 : index
    %c0_45 = arith.constant 0 : index
    %c0_46 = arith.constant 0 : index
    %149 = vector.load %arg10[%c0_44, %c0_45, %c0_46] : memref<1x32x32xbf16, #tpu.memory_space<vmem>>, vector<1x32x32xbf16>
    %150 = vector.shape_cast %149 : vector<1x32x32xbf16> to vector<32x32xbf16>
    %cst_47 = arith.constant dense<0.000000e+00> : vector<64x32xf32>
    %151 = tpu.matmul %148, %150, %cst_47 {dimension_numbers = #tpu.dot_dimension_numbers<[1], [0], [0], [1], [0, 0, 1, 1], [], []>} : vector<64x32xbf16>, vector<32x32xbf16>, vector<64x32xf32> -> vector<64x32xf32>
    %c0_48 = arith.constant 0 : index
    %c0_49 = arith.constant 0 : index
    %c0_50 = arith.constant 0 : index
    %152 = vector.load %arg11[%c0_48, %c0_49, %c0_50] : memref<1x1x32xf32, #tpu.memory_space<vmem>>, vector<1x1x32xf32>
    %153 = vector.shape_cast %152 : vector<1x1x32xf32> to vector<1x32xf32>
    %154 = vector.broadcast %153 : vector<1x32xf32> to vector<64x32xf32>
    %155 = arith.addf %151, %154 : vector<64x32xf32>
    %156 = vector.shape_cast %155 : vector<64x32xf32> to vector<4x16x32xf32>
    %157 = arith.addf %3, %156 : vector<4x16x32xf32>
    %c0_51 = arith.constant 0 : index
    %c0_52 = arith.constant 0 : index
    %c0_53 = arith.constant 0 : index
    %158 = vector.load %arg12[%c0_51, %c0_52, %c0_53] : memref<1x1x32xf32, #tpu.memory_space<vmem>>, vector<1x1x32xf32>
    %159 = vector.shape_cast %158 : vector<1x1x32xf32> to vector<1x32xf32>
    %c0_54 = arith.constant 0 : index
    %c0_55 = arith.constant 0 : index
    %c0_56 = arith.constant 0 : index
    %160 = vector.load %arg13[%c0_54, %c0_55, %c0_56] : memref<1x1x32xf32, #tpu.memory_space<vmem>>, vector<1x1x32xf32>
    %161 = vector.shape_cast %160 : vector<1x1x32xf32> to vector<1x32xf32>
    %cst_57 = arith.constant dense<0.000000e+00> : vector<4x16xf32>
    %162 = vector.multi_reduction <add>, %157, %cst_57 [2] : vector<4x16x32xf32> to vector<4x16xf32>
    %163 = vector.shape_cast %162 : vector<4x16xf32> to vector<4x16x1xf32>
    %cst_58 = arith.constant 3.200000e+01 : f32
    %164 = vector.broadcast %cst_58 : f32 to vector<4x16x1xf32>
    %165 = arith.divf %163, %164 : vector<4x16x1xf32>
    %166 = vector.broadcast %165 : vector<4x16x1xf32> to vector<4x16x32xf32>
    %167 = arith.subf %157, %166 : vector<4x16x32xf32>
    %168 = arith.mulf %167, %167 : vector<4x16x32xf32>
    %cst_59 = arith.constant dense<0.000000e+00> : vector<4x16xf32>
    %169 = vector.multi_reduction <add>, %168, %cst_59 [2] : vector<4x16x32xf32> to vector<4x16xf32>
    %170 = vector.shape_cast %169 : vector<4x16xf32> to vector<4x16x1xf32>
    %cst_60 = arith.constant 3.200000e+01 : f32
    %171 = vector.broadcast %cst_60 : f32 to vector<4x16x1xf32>
    %172 = arith.divf %170, %171 : vector<4x16x1xf32>
    %173 = vector.broadcast %165 : vector<4x16x1xf32> to vector<4x16x32xf32>
    %174 = arith.subf %157, %173 : vector<4x16x32xf32>
    %cst_61 = arith.constant 9.99999974E-6 : f32
    %175 = vector.broadcast %cst_61 : f32 to vector<4x16x1xf32>
    %176 = arith.addf %172, %175 : vector<4x16x1xf32>
    %177 = math.rsqrt %176 : vector<4x16x1xf32>
    %178 = vector.broadcast %177 : vector<4x16x1xf32> to vector<4x16x32xf32>
    %179 = arith.mulf %174, %178 : vector<4x16x32xf32>
    %180 = vector.shape_cast %159 : vector<1x32xf32> to vector<1x1x32xf32>
    %181 = vector.broadcast %180 : vector<1x1x32xf32> to vector<4x16x32xf32>
    %182 = arith.mulf %179, %181 : vector<4x16x32xf32>
    %183 = vector.shape_cast %161 : vector<1x32xf32> to vector<1x1x32xf32>
    %184 = vector.broadcast %183 : vector<1x1x32xf32> to vector<4x16x32xf32>
    %185 = arith.addf %182, %184 : vector<4x16x32xf32>
    %186 = vector.shape_cast %185 : vector<4x16x32xf32> to vector<64x32xf32>
    %187 = arith.truncf %186 : vector<64x32xf32> to vector<64x32xbf16>
    %c0_62 = arith.constant 0 : index
    %c0_63 = arith.constant 0 : index
    %c0_64 = arith.constant 0 : index
    %188 = vector.load %arg14[%c0_62, %c0_63, %c0_64] : memref<1x32x128xbf16, #tpu.memory_space<vmem>>, vector<1x32x128xbf16>
    %189 = vector.shape_cast %188 : vector<1x32x128xbf16> to vector<32x128xbf16>
    %cst_65 = arith.constant dense<0.000000e+00> : vector<64x128xf32>
    %190 = tpu.matmul %187, %189, %cst_65 {dimension_numbers = #tpu.dot_dimension_numbers<[1], [0], [0], [1], [0, 0, 1, 1], [], []>} : vector<64x32xbf16>, vector<32x128xbf16>, vector<64x128xf32> -> vector<64x128xf32>
    %c0_66 = arith.constant 0 : index
    %c0_67 = arith.constant 0 : index
    %c0_68 = arith.constant 0 : index
    %191 = vector.load %arg15[%c0_66, %c0_67, %c0_68] : memref<1x1x128xf32, #tpu.memory_space<vmem>>, vector<1x1x128xf32>
    %192 = vector.shape_cast %191 : vector<1x1x128xf32> to vector<1x128xf32>
    %193 = vector.broadcast %192 : vector<1x128xf32> to vector<64x128xf32>
    %194 = arith.addf %190, %193 : vector<64x128xf32>
    %cst_69 = arith.constant 5.000000e-01 : f32
    %195 = vector.broadcast %cst_69 : f32 to vector<64x128xf32>
    %196 = arith.mulf %195, %194 : vector<64x128xf32>
    %cst_70 = arith.constant 4.471500e-02 : f32
    %197 = vector.broadcast %cst_70 : f32 to vector<64x128xf32>
    %198 = arith.mulf %197, %194 : vector<64x128xf32>
    %199 = arith.mulf %198, %194 : vector<64x128xf32>
    %200 = arith.mulf %199, %194 : vector<64x128xf32>
    %201 = arith.addf %194, %200 : vector<64x128xf32>
    %cst_71 = arith.constant 0.797884583 : f32
    %202 = vector.broadcast %cst_71 : f32 to vector<64x128xf32>
    %203 = arith.mulf %202, %201 : vector<64x128xf32>
    %204 = math.tanh %203 : vector<64x128xf32>
    %cst_72 = arith.constant 1.000000e+00 : f32
    %205 = vector.broadcast %cst_72 : f32 to vector<64x128xf32>
    %206 = arith.addf %205, %204 : vector<64x128xf32>
    %207 = arith.mulf %196, %206 : vector<64x128xf32>
    %208 = arith.truncf %207 : vector<64x128xf32> to vector<64x128xbf16>
    %c0_73 = arith.constant 0 : index
    %c0_74 = arith.constant 0 : index
    %c0_75 = arith.constant 0 : index
    %209 = vector.load %arg16[%c0_73, %c0_74, %c0_75] : memref<1x128x32xbf16, #tpu.memory_space<vmem>>, vector<1x128x32xbf16>
    %210 = vector.shape_cast %209 : vector<1x128x32xbf16> to vector<128x32xbf16>
    %cst_76 = arith.constant dense<0.000000e+00> : vector<64x32xf32>
    %211 = tpu.matmul %208, %210, %cst_76 {dimension_numbers = #tpu.dot_dimension_numbers<[1], [0], [0], [1], [0, 0, 1, 1], [], []>} : vector<64x128xbf16>, vector<128x32xbf16>, vector<64x32xf32> -> vector<64x32xf32>
    %c0_77 = arith.constant 0 : index
    %c0_78 = arith.constant 0 : index
    %c0_79 = arith.constant 0 : index
    %212 = vector.load %arg17[%c0_77, %c0_78, %c0_79] : memref<1x1x32xf32, #tpu.memory_space<vmem>>, vector<1x1x32xf32>
    %213 = vector.shape_cast %212 : vector<1x1x32xf32> to vector<1x32xf32>
    %214 = vector.broadcast %213 : vector<1x32xf32> to vector<64x32xf32>
    %215 = arith.addf %211, %214 : vector<64x32xf32>
    %216 = vector.shape_cast %215 : vector<64x32xf32> to vector<4x16x32xf32>
    %217 = arith.addf %157, %216 : vector<4x16x32xf32>
    %c0_80 = arith.constant 0 : index
    %c0_81 = arith.constant 0 : index
    %c0_82 = arith.constant 0 : index
    %218 = vector.load %arg23[%c0_80, %c0_81, %c0_82] : memref<4x16x32xf32, #tpu.memory_space<vmem>>, vector<4x16x32xf32>
    tpu.vector_store %arg23[%c0_80, %c0_81, %c0_82], %217 {strides = array<i32>} : memref<4x16x32xf32, #tpu.memory_space<vmem>>, vector<4x16x32xf32>,
    %c1_i32 = arith.constant 1 : i32
    %219 = arith.cmpi eq, %arg1, %c1_i32 : i32
    %220 = arith.extui %219 : i1 to i32
    %c0_i32_83 = arith.constant 0 : i32
    %221 = arith.cmpi ne, %220, %c0_i32_83 : i32
    scf.if %221 {
      %c0_84 = arith.constant 0 : index
      %c0_85 = arith.constant 0 : index
      %222 = vector.load %arg18[%c0_84, %c0_85] : memref<1x32xf32, #tpu.memory_space<vmem>>, vector<1x32xf32>
      %c0_86 = arith.constant 0 : index
      %c0_87 = arith.constant 0 : index
      %223 = vector.load %arg19[%c0_86, %c0_87] : memref<1x32xf32, #tpu.memory_space<vmem>>, vector<1x32xf32>
      %cst_88 = arith.constant dense<0.000000e+00> : vector<4x16xf32>
      %224 = vector.multi_reduction <add>, %217, %cst_88 [2] : vector<4x16x32xf32> to vector<4x16xf32>
      %225 = vector.shape_cast %224 : vector<4x16xf32> to vector<4x16x1xf32>
      %cst_89 = arith.constant 3.200000e+01 : f32
      %226 = vector.broadcast %cst_89 : f32 to vector<4x16x1xf32>
      %227 = arith.divf %225, %226 : vector<4x16x1xf32>
      %228 = vector.broadcast %227 : vector<4x16x1xf32> to vector<4x16x32xf32>
      %229 = arith.subf %217, %228 : vector<4x16x32xf32>
      %230 = arith.mulf %229, %229 : vector<4x16x32xf32>
      %cst_90 = arith.constant dense<0.000000e+00> : vector<4x16xf32>
      %231 = vector.multi_reduction <add>, %230, %cst_90 [2] : vector<4x16x32xf32> to vector<4x16xf32>
      %232 = vector.shape_cast %231 : vector<4x16xf32> to vector<4x16x1xf32>
      %cst_91 = arith.constant 3.200000e+01 : f32
      %233 = vector.broadcast %cst_91 : f32 to vector<4x16x1xf32>
      %234 = arith.divf %232, %233 : vector<4x16x1xf32>
      %235 = vector.broadcast %227 : vector<4x16x1xf32> to vector<4x16x32xf32>
      %236 = arith.subf %217, %235 : vector<4x16x32xf32>
      %cst_92 = arith.constant 9.99999974E-6 : f32
      %237 = vector.broadcast %cst_92 : f32 to vector<4x16x1xf32>
      %238 = arith.addf %234, %237 : vector<4x16x1xf32>
      %239 = math.rsqrt %238 : vector<4x16x1xf32>
      %240 = vector.broadcast %239 : vector<4x16x1xf32> to vector<4x16x32xf32>
      %241 = arith.mulf %236, %240 : vector<4x16x32xf32>
      %242 = vector.shape_cast %222 : vector<1x32xf32> to vector<1x1x32xf32>
      %243 = vector.broadcast %242 : vector<1x1x32xf32> to vector<4x16x32xf32>
      %244 = arith.mulf %241, %243 : vector<4x16x32xf32>
      %245 = vector.shape_cast %223 : vector<1x32xf32> to vector<1x1x32xf32>
      %246 = vector.broadcast %245 : vector<1x1x32xf32> to vector<4x16x32xf32>
      %247 = arith.addf %244, %246 : vector<4x16x32xf32>
      %c0_93 = arith.constant 0 : index
      %c0_94 = arith.constant 0 : index
      %248 = vector.load %arg20[%c0_93, %c0_94] : memref<1x32xf32, #tpu.memory_space<vmem>>, vector<1x32xf32>
      %249 = vector.shape_cast %248 : vector<1x32xf32> to vector<1x1x32xf32>
      %250 = vector.broadcast %249 : vector<1x1x32xf32> to vector<4x16x32xf32>
      %251 = arith.mulf %247, %250 : vector<4x16x32xf32>
      %cst_95 = arith.constant dense<0.000000e+00> : vector<4x16xf32>
      %252 = vector.multi_reduction <add>, %251, %cst_95 [2] : vector<4x16x32xf32> to vector<4x16xf32>
      %c0_96 = arith.constant 0 : index
      %c0_97 = arith.constant 0 : index
      %253 = vector.load %arg21[%c0_96, %c0_97] : memref<1x1xf32, #tpu.memory_space<vmem>>, vector<1x1xf32>
      %254 = vector.broadcast %253 : vector<1x1xf32> to vector<4x16xf32>
      %255 = arith.addf %252, %254 : vector<4x16xf32>
      %c0_98 = arith.constant 0 : index
      %c0_99 = arith.constant 0 : index
      %c0_100 = arith.constant 0 : index
      %256 = vector.load %arg22[%c0_98, %c0_99, %c0_100] : memref<1x4x16xf32, #tpu.memory_space<vmem>>, vector<1x4x16xf32>
      %257 = vector.shape_cast %256 : vector<1x4x16xf32> to vector<4x16xf32>
      %258 = vector.shape_cast %255 : vector<4x16xf32> to vector<1x4x16xf32>
      tpu.vector_store %arg22[%c0_98, %c0_99, %c0_100], %258 {strides = array<i32>} : memref<1x4x16xf32, #tpu.memory_space<vmem>>, vector<1x4x16xf32>,
    } else {
    }
    return
  }
  func.func @transform_0(%arg0: i32, %arg1: i32) -> (i32, i32, i32) {
    %c0_i32 = arith.constant 0 : i32
    %c0_i32_0 = arith.constant 0 : i32
    %c0_i32_1 = arith.constant 0 : i32
    return %arg0, %c0_i32, %c0_i32_0 : i32, i32, i32
  }
  func.func @transform_1(%arg0: i32, %arg1: i32) -> (i32, i32) {
    %c0_i32 = arith.constant 0 : i32
    %c0_i32_0 = arith.constant 0 : i32
    %c0_i32_1 = arith.constant 0 : i32
    return %c0_i32, %c0_i32_0 : i32, i32
  }
  func.func @transform_2(%arg0: i32, %arg1: i32) -> (i32, i32) {
    %c0_i32 = arith.constant 0 : i32
    %c0_i32_0 = arith.constant 0 : i32
    %c0_i32_1 = arith.constant 0 : i32
    return %c0_i32, %c0_i32_0 : i32, i32
  }
  func.func @transform_3(%arg0: i32, %arg1: i32) -> (i32, i32) {
    %c0_i32 = arith.constant 0 : i32
    %c0_i32_0 = arith.constant 0 : i32
    %c0_i32_1 = arith.constant 0 : i32
    return %c0_i32, %c0_i32_0 : i32, i32
  }
  func.func @transform_4(%arg0: i32, %arg1: i32) -> (i32, i32, i32) {
    %c0_i32 = arith.constant 0 : i32
    %c0_i32_0 = arith.constant 0 : i32
    %c0_i32_1 = arith.constant 0 : i32
    return %arg1, %c0_i32, %c0_i32_0 : i32, i32, i32
  }
  func.func @transform_5(%arg0: i32, %arg1: i32) -> (i32, i32, i32) {
    %c0_i32 = arith.constant 0 : i32
    %c0_i32_0 = arith.constant 0 : i32
    %c0_i32_1 = arith.constant 0 : i32
    return %arg1, %c0_i32, %c0_i32_0 : i32, i32, i32
  }
  func.func @transform_6(%arg0: i32, %arg1: i32) -> (i32, i32, i32) {
    %c0_i32 = arith.constant 0 : i32
    %c0_i32_0 = arith.constant 0 : i32
    %c0_i32_1 = arith.constant 0 : i32
    return %arg1, %c0_i32, %c0_i32_0 : i32, i32, i32
  }
  func.func @transform_7(%arg0: i32, %arg1: i32) -> (i32, i32, i32) {
    %c0_i32 = arith.constant 0 : i32
    %c0_i32_0 = arith.constant 0 : i32
    %c0_i32_1 = arith.constant 0 : i32
    return %arg1, %c0_i32, %c0_i32_0 : i32, i32, i32
  }
  func.func @transform_8(%arg0: i32, %arg1: i32) -> (i32, i32, i32) {
    %c0_i32 = arith.constant 0 : i32
    %c0_i32_0 = arith.constant 0 : i32
    %c0_i32_1 = arith.constant 0 : i32
    return %arg1, %c0_i32, %c0_i32_0 : i32, i32, i32
  }
  func.func @transform_9(%arg0: i32, %arg1: i32) -> (i32, i32, i32) {
    %c0_i32 = arith.constant 0 : i32
    %c0_i32_0 = arith.constant 0 : i32
    %c0_i32_1 = arith.constant 0 : i32
    return %arg1, %c0_i32, %c0_i32_0 : i32, i32, i32
  }
  func.func @transform_10(%arg0: i32, %arg1: i32) -> (i32, i32, i32) {
    %c0_i32 = arith.constant 0 : i32
    %c0_i32_0 = arith.constant 0 : i32
    %c0_i32_1 = arith.constant 0 : i32
    return %arg1, %c0_i32, %c0_i32_0 : i32, i32, i32
  }
  func.func @transform_11(%arg0: i32, %arg1: i32) -> (i32, i32, i32) {
    %c0_i32 = arith.constant 0 : i32
    %c0_i32_0 = arith.constant 0 : i32
    %c0_i32_1 = arith.constant 0 : i32
    return %arg1, %c0_i32, %c0_i32_0 : i32, i32, i32
  }
  func.func @transform_12(%arg0: i32, %arg1: i32) -> (i32, i32, i32) {
    %c0_i32 = arith.constant 0 : i32
    %c0_i32_0 = arith.constant 0 : i32
    %c0_i32_1 = arith.constant 0 : i32
    return %arg1, %c0_i32, %c0_i32_0 : i32, i32, i32
  }
  func.func @transform_13(%arg0: i32, %arg1: i32) -> (i32, i32, i32) {
    %c0_i32 = arith.constant 0 : i32
    %c0_i32_0 = arith.constant 0 : i32
    %c0_i32_1 = arith.constant 0 : i32
    return %arg1, %c0_i32, %c0_i32_0 : i32, i32, i32
  }
  func.func @transform_14(%arg0: i32, %arg1: i32) -> (i32, i32, i32) {
    %c0_i32 = arith.constant 0 : i32
    %c0_i32_0 = arith.constant 0 : i32
    %c0_i32_1 = arith.constant 0 : i32
    return %arg1, %c0_i32, %c0_i32_0 : i32, i32, i32
  }
  func.func @transform_15(%arg0: i32, %arg1: i32) -> (i32, i32, i32) {
    %c0_i32 = arith.constant 0 : i32
    %c0_i32_0 = arith.constant 0 : i32
    %c0_i32_1 = arith.constant 0 : i32
    return %arg1, %c0_i32, %c0_i32_0 : i32, i32, i32
  }
  func.func @transform_16(%arg0: i32, %arg1: i32) -> (i32, i32) {
    %c0_i32 = arith.constant 0 : i32
    %c0_i32_0 = arith.constant 0 : i32
    %c0_i32_1 = arith.constant 0 : i32
    return %c0_i32, %c0_i32_0 : i32, i32
  }
  func.func @transform_17(%arg0: i32, %arg1: i32) -> (i32, i32) {
    %c0_i32 = arith.constant 0 : i32
    %c0_i32_0 = arith.constant 0 : i32
    %c0_i32_1 = arith.constant 0 : i32
    return %c0_i32, %c0_i32_0 : i32, i32
  }
  func.func @transform_18(%arg0: i32, %arg1: i32) -> (i32, i32) {
    %c0_i32 = arith.constant 0 : i32
    %c0_i32_0 = arith.constant 0 : i32
    %c0_i32_1 = arith.constant 0 : i32
    return %c0_i32, %c0_i32_0 : i32, i32
  }
  func.func @transform_19(%arg0: i32, %arg1: i32) -> (i32, i32) {
    %c0_i32 = arith.constant 0 : i32
    %c0_i32_0 = arith.constant 0 : i32
    %c0_i32_1 = arith.constant 0 : i32
    return %c0_i32, %c0_i32_0 : i32, i32
  }
  func.func @transform_20(%arg0: i32, %arg1: i32) -> (i32, i32, i32) {
    %c0_i32 = arith.constant 0 : i32
    %c0_i32_0 = arith.constant 0 : i32
    %c0_i32_1 = arith.constant 0 : i32
    return %arg0, %c0_i32, %c0_i32_0 : i32, i32, i32
  }
}

</mosaic_0001>

<bundles_post_ra>
// kernel: tpu_custom_call.1
= control target key start
LH: loop header
LB: loop body
LE: loop exit
PB: predicated region body
PF: predicated region fallthrough
CT: control target
= control target key end

     0   :  { %s8080_s0 = inlined_call_operand.hbm [shape: f32[4,16,8], index: 0, kind: input, shape index: {}]   ;;  %s8081_s1 = inlined_call_operand.hbm [shape: bf16[8,32], index: 1, kind: input, shape index: {}]   ;;  %s8082_s2 = inlined_call_operand.hbm [shape: f32[1,32], index: 2, kind: input, shape index: {}]   ;;  %s8083_s3 = inlined_call_operand.hbm [shape: f32[64,32], index: 3, kind: input, shape index: {}]   ;;  %s8084_s4 = inlined_call_operand.hbm [shape: f32[2,1,32], index: 4, kind: input, shape index: {}]   ;;  %s8085_s5 = inlined_call_operand.hbm [shape: f32[2,1,32], index: 5, kind: input, shape index: {}]   ;;  %s8086_s6 = inlined_call_operand.hbm [shape: bf16[2,32,96], index: 6, kind: input, shape index: {}]   ;;  %s8087_s7 = inlined_call_operand.hbm [shape: f32[2,1,96], index: 7, kind: input, shape index: {}]   ;;  %s8088_s8 = inlined_call_operand.hbm [shape: bf16[2,32,32], index: 8, kind: input, shape index: {}]   ;;  %s8089_s9 = inlined_call_operand.hbm [shape: f32[2,1,32], index: 9, kind: input, shape index: {}]   ;;  %s8090_s10 = inlined_call_operand.hbm [shape: f32[2,1,32], index: 10, kind: input, shape index: {}]   ;;  %s8091_s11 = inlined_call_operand.hbm [shape: f32[2,1,32], index: 11, kind: input, shape index: {}]   ;;  %s8092_s12 = inlined_call_operand.hbm [shape: bf16[2,32,128], index: 12, kind: input, shape index: {}]   ;;  %s8093_s13 = inlined_call_operand.hbm [shape: f32[2,1,128], index: 13, kind: input, shape index: {}]   ;;  %s8094_s14 = inlined_call_operand.hbm [shape: bf16[2,128,32], index: 14, kind: input, shape index: {}]   ;;  %s8095_s15 = inlined_call_operand.hbm [shape: f32[2,1,32], index: 15, kind: input, shape index: {}]   ;;  %s8096_s16 = inlined_call_operand.hbm [shape: f32[1,32], index: 16, kind: input, shape index: {}]   ;;  %s8097_s17 = inlined_call_operand.hbm [shape: f32[1,32], index: 17, kind: input, shape index: {}]   ;;  %s8098_s18 = inlined_call_operand.hbm [shape: f32[1,32], index: 18, kind: input, shape index: {}]   ;;  %s8099_s19 = inlined_call_operand.<no memory space> [shape: f32[1,1], index: 19, kind: input, shape index: {}]   ;;  %s8100_s20 = inlined_call_operand.hbm [shape: f32[1,4,16], index: 20, kind: output, shape index: {}]  }
   0x1   :  { %8148 = sst [smem:[#allocation46_spill]] %s8080_s0  ;;  %v25_v0 = vstv %s8099_s19 }
   0x2   :  { %8149 = sst [smem:[#allocation47_spill]] %s8081_s1  ;;  %26 = vst [vmem:[#allocation3] sm:$0x1] %v25_v0 }
   0x3   :  { %8150 = sst [smem:[#allocation48_spill]] %s8082_s2 }
   0x4   :  { %8151 = sst [smem:[#allocation49_spill]] %s8083_s3 }
   0x5   :  { %8152 = sst [smem:[#allocation50_spill]] %s8084_s4 }
   0x6   :  { %8153 = sst [smem:[#allocation51_spill]] %s8085_s5 }
   0x7   :  { %8154 = sst [smem:[#allocation52_spill]] %s8086_s6 }
   0x8   :  { %8155 = sst [smem:[#allocation53_spill]] %s8087_s7 }
   0x9   :  { %8156 = sst [smem:[#allocation54_spill]] %s8088_s8 }
   0xa   :  { %8157 = sst [smem:[#allocation55_spill]] %s8089_s9 }
   0xb   :  { %8158 = sst [smem:[#allocation56_spill]] %s8090_s10 }
   0xc   :  { %8159 = sst [smem:[#allocation57_spill]] %s8091_s11 }
   0xd   :  { %8160 = sst [smem:[#allocation58_spill]] %s8094_s14 }
   0xe   :  { %8161 = sst [smem:[#allocation59_spill]] %s8095_s15 }
   0xf   :  { %8162 = sst [smem:[#allocation60_spill]] %s8096_s16 }
  0x10   :  { %8163 = sst [smem:[#allocation61_spill]] %s8097_s17 }
  0x11   :  { %8164 = sst [smem:[#allocation62_spill]] %s8098_s18 }
  0x12   :  { %8165 = sst [smem:[#allocation63_spill]] %s8100_s20 }
  0x13   :  { %27 = vsyncpa [#allocation5], 0 }
  0x14   :  { %28 = vsyncpa [#allocation8], 0 }
  0x15   :  { %29 = vsyncpa [#allocation11], 0 }
  0x16   :  { %30 = vsyncpa [#allocation27], 0 }
  0x17   :  { %31 = vsyncpa [#allocation6], 0  ;;  %s6554_s23 = smov 0   ;;  %s6556_s24 = smov 0  }
  0x18   :  { %s6558_s2 = smov 0   ;;  %s6560_s25 = smov 0  }
  0x19   :  { %s6562_s3 = smov 0   ;;  %s6564_s26 = smov 0  }
  0x1a LB: > { %8166 = sst [smem:[#allocation37_spill]] %s6387_s24  ;;  %s6583_s19 = sadd.s32 4294967295, %s6403_s26   ;;  %s6403_s26 = sphi %s6564_s26, %s37_s26   ;;  %s6399_s3 = sphi %s6562_s3, %s8250_s3   ;;  %s6395_s25 = sphi %s6560_s25, %s8249_s25   ;;  %s6391_s2 = sphi %s6558_s2, %s8247_s2   ;;  %s6387_s24 = sphi %s6556_s24, %s8246_s24   ;;  %s6383_s23 = sphi %s6554_s23, %s8245_s23  }
  0x1b   : > { %8167 = sst [smem:[#allocation38_spill]] %s6391_s2  ;;  %p158_p0 = scmp.ne.s32.totalorder %s6387_s24, %s6383_s23 }
  0x1c   : > { %8168 = sst [smem:[#allocation39_spill]] %s6395_s25  ;;  %p8112_p1 = scmp.eq.s32.totalorder %s6583_s19, 0 }
  0x1d   : > { %8169 = sst [smem:[#allocation40_spill]] %s6403_s26  ;;  %p4768_p2 = scmp.ge.s32.totalorder %s6403_s26, 1 }
  0x1e   : > { %8170 = sst [smem:[#allocation41_spill]] %s6583_s19  ;;  %p565_p3 = scmp.lt.s32.totalorder %s6403_s26, 3 }
  0x1f   : > { %p6591_p4 = por %p8112_p1, %p158_p0  ;;  %s6405_s4 = smov [#allocation4]  }
  0x20   : > { %p6595_p5 = pnand %p4768_p2, %p565_p3  ;;  %s581_s29 = sshll.u32 %s6405_s4, 4  ;;  %s582_s29 = int_to_ptr.vmem [resolvable:$true] %s581_s29 }
  0x21   : > { %s8171_s27 = scalar_select %p6591_p4, 1, 0 }
  0x22   : > { %s8173_s28 = scalar_select %p6595_p5, 1, 0 }
  0x23   : > { %8172 = sst [smem:[#allocation42_spill]] %s8171_s27  ;;  %p5315_p6 = pneg %p6595_p5 }
  0x24   : > { %8174 = sst [smem:[#allocation43_spill]] %s8173_s28  ;;  %s46_s0 = sadd.s32 1, %s6399_s3 }
  0x25   : > { %p6603_p7 = pnand %p5315_p6, %p8112_p1  ;;  %s8176_s22 = sld [smem:[#allocation46_spill]] }
  0x27   : > { %s8175_s30 = scalar_select %p6603_p7, 1, 0 }
  0x28   : > { %p6616_p9 = pneg %p6603_p7 }
  0x2a   : > { %s8177_s4 = scalar_select %p6616_p9, 1, 0 }
  0x2b   : > { %s5743_s23 = scalar_lea.hbm %s8176_s22, 1024 }
  0x2c   : > { %p5744_p8 = scmp.ne.s32.totalorder %s8176_s22, %s5743_s23  ;;  %p5750_p12 = scmp.lt.u32.totalorder %s5743_s23, %s8176_s22 }
  0x2e   : > { %p5746_p10 = pnand %p6616_p9, %p5744_p8 }
  0x30   : > { %p5747_p11 = pneg %p5746_p10 }
  0x32   : > { %p5752_p13 = pnand %p5750_p12, %p5747_p11 }
  0x34   : > { %5755 = shalt.err (!%p5752_p13)
}
  0x35   : > { %s5756_s21 = scalar_lea.vmem %s582_s29, 1024  ;;  %p5764_p6 = scmp.lt.s32.totalorder %s582_s29, %s582_s29 }
  0x36   : > { %p5757_p0 = scmp.ne.s32.totalorder %s582_s29, %s5756_s21  ;;  %p5765_p1 = scmp.lt.s32.totalorder %s5756_s21, %s5756_s21 }
  0x38   : > { %p5759_p2 = pnand %p5757_p0, %p6616_p9  ;;  %p5766_p4 = por %p5765_p1, %p5764_p6 }
  0x3a   : > { %p5760_p3 = pneg %p5759_p2 }
  0x3c   : > { %p5767_p5 = pnand %p5766_p4, %p5760_p3 }
  0x3e   : > { %5770 = shalt.err (!%p5767_p5)
}
  0x3f   : > { %s8117_s20 = smov 128   ;;  %s8118_s25 = smov 8  }
  0x40   : > { %5318 = dma.hbm_to_vmem [thread:$0]  (!%p6603_p7), %s8176_s22, 1024, %s582_s29, [#allocation5], %s8117_s20, %s8117_s20, %s8118_s25  }
  0x41   : > { %p47_p1 = scmp.ge.s32.totalorder %s46_s0, 2  ;;  %s145_s1 = sadd.s32 1, %s6391_s2 }
  0x42   : > { %p152_p4 = scmp.ne.s32.totalorder %s6391_s2, %s6387_s24  ;;  %p153_p5 = scmp.eq.s32.totalorder %s6403_s26, 0 }
  0x43   : > { %s8252_s0 = smov (%p47_p1, %s46_s0), 0  ;;  %p5381_p10 = scmp.lt.s32.totalorder %s6403_s26, 2 }
  0x44   : > { %8178 = sst [smem:[#allocation44_spill]] %s8252_s0  ;;  %p154_p8 = por %p153_p5, %p152_p4 }
  0x45   : > { %s142_s23 = ssub.s32 %s6399_s3, %s8252_s0  ;;  %s666_s21 = sand.u32 1, %s6403_s26  }
  0x46   : > { %p143_p11 = scmp.eq.s32.totalorder %s142_s23, 0  ;;  %s6646_s28 = sand.u32 1, %s6391_s2  }
  0x47   : > { %s6649_s18 = sshll.u32 %s6399_s3, 4  ;;  %s8180_s20 = sld [smem:[#allocation50_spill]] }
  0x48   : > { %s6652_s29 = scalar_select %p143_p11, %s6391_s2, %s145_s1  }
  0x49   : > { %s669_s22 = scalar_lea.vmem [#allocation12], %s6646_s28  ;;  %p6661_p12 = pnand %p5381_p10, %p154_p8 }
  0x4a   : > { %8179 = sst [smem:[#allocation45_spill]] %s6652_s29  ;;  %s676_s23 = sshll.u32 %s669_s22, 4  ;;  %s6665_s23 = int_to_ptr.vmem [resolvable:$true] %s676_s23 }
  0x4b   : > { %s8181_s0 = scalar_select %p6661_p12, 1, 0 }
  0x4c   : > { %s8182_s5 = sld [smem:[#allocation51_spill]]  ;;  %s6673_s19 = scalar_lea.sflag [#allocation5], %s666_s21 }
  0x4d   : > { %s6658_s25 = scalar_lea.hbm %s8180_s20, %s6649_s18  ;;  %p6679_p0 = pneg %p6661_p12 }
  0x4e   : > { %s5771_s27 = scalar_lea.hbm %s6658_s25, 16  ;;  %s5776_s15 = scalar_lea.hbm %s8180_s20, 32 }
  0x4f   : > { %p5772_p13 = scmp.ne.s32.totalorder %s6658_s25, %s5771_s27  ;;  %p5777_p6 = scmp.lt.u32.totalorder %s6658_s25, %s8180_s20 }
  0x50   : > { %s8183_s26 = scalar_select %p6679_p0, 1, 0 }
  0x51   : > { %p5774_p2 = pnand %p6679_p0, %p5772_p13  ;;  %p5778_p1 = scmp.lt.u32.totalorder %s5776_s15, %s5771_s27 }
  0x52   : > { %s6671_s2 = scalar_lea.hbm %s8182_s5, %s6649_s18  ;;  %p5780_p5 = scmp.lt.u32.totalorder %s5771_s27, %s6658_s25 }
  0x53   : > { %p5775_p3 = pneg %p5774_p2  ;;  %p5779_p4 = por %p5778_p1, %p5777_p6 }
  0x55   : > { %p5781_p8 = por %p5780_p5, %p5779_p4 }
  0x57   : > { %p5782_p10 = pnand %p5781_p8, %p5775_p3 }
  0x59   : > { %5785 = shalt.err (!%p5782_p10)
}
  0x5a   : > { %s5786_s21 = scalar_lea.vmem %s6665_s23, 16  ;;  %s6408_s24 = smov [#allocation12]  }
  0x5b   : > { %p5787_p11 = scmp.ne.s32.totalorder %s6665_s23, %s5786_s21  ;;  %s5791_s22 = sshll.u32 %s6408_s24, 4  ;;  %s5792_s22 = int_to_ptr.vmem [resolvable:$false] %s5791_s22 }
  0x5c   : > { %s5793_s29 = scalar_lea.vmem %s5792_s22, 32  ;;  %p5794_p7 = scmp.lt.s32.totalorder %s6665_s23, %s5792_s22 }
  0x5d   : > { %p5789_p13 = pnand %p5787_p11, %p6679_p0  ;;  %p5795_p9 = scmp.lt.s32.totalorder %s5793_s29, %s5786_s21 }
  0x5f   : > { %p5790_p2 = pneg %p5789_p13  ;;  %p5796_p6 = por %p5795_p9, %p5794_p7 }
  0x61   : > { %p5797_p1 = pnand %p5796_p6, %p5790_p2 }
  0x63   : > { %5800 = shalt.err (!%p5797_p1)
}
  0x64   : > { %5340 = dma.hbm_to_vmem [thread:$0]  (!%p6661_p12), %s6658_s25, 16, %s6665_s23, %s6673_s19  }
  0x65   : > { %s686_s15 = scalar_lea.vmem [#allocation13], %s6646_s28  ;;  %s6705_s1 = sshll.u32 %s6646_s28, 4 }
  0x66   : > { %s693_s27 = sshll.u32 %s686_s15, 4  ;;  %s5801_s21 = scalar_lea.hbm %s6671_s2, 16  ;;  %s694_s27 = int_to_ptr.vmem [resolvable:$true] %s693_s27 }
  0x67   : > { %p5802_p7 = scmp.ne.s32.totalorder %s6671_s2, %s5801_s21  ;;  %s5806_s29 = scalar_lea.hbm %s8182_s5, 32 }
  0x68   : > { %p5807_p4 = scmp.lt.u32.totalorder %s6671_s2, %s8182_s5  ;;  %p5808_p5 = scmp.lt.u32.totalorder %s5806_s29, %s5801_s21 }
  0x69   : > { %p5804_p9 = pnand %p5802_p7, %p6679_p0  ;;  %p5810_p10 = scmp.lt.u32.totalorder %s5801_s21, %s6671_s2 }
  0x6a   : > { %p5809_p8 = por %p5808_p5, %p5807_p4 }
  0x6b   : > { %p5805_p3 = pneg %p5804_p9 }
  0x6c   : > { %p5811_p11 = por %p5810_p10, %p5809_p8 }
  0x6e   : > { %p5812_p13 = pnand %p5811_p11, %p5805_p3 }
  0x70   : > { %5815 = shalt.err (!%p5812_p13)
}
  0x71   : > { %s5816_s25 = scalar_lea.vmem %s694_s27, 16  ;;  %s6409_s23 = smov [#allocation13]  }
  0x72   : > { %p5817_p2 = scmp.ne.s32.totalorder %s694_s27, %s5816_s25  ;;  %s5821_s15 = sshll.u32 %s6409_s23, 4  ;;  %s5822_s15 = int_to_ptr.vmem [resolvable:$false] %s5821_s15 }
  0x73   : > { %s5823_s24 = scalar_lea.vmem %s5822_s15, 32  ;;  %p5824_p7 = scmp.lt.s32.totalorder %s694_s27, %s5822_s15 }
  0x74   : > { %p5819_p6 = pnand %p5817_p2, %p6679_p0  ;;  %p5825_p9 = scmp.lt.s32.totalorder %s5823_s24, %s5816_s25 }
  0x76   : > { %p5820_p1 = pneg %p5819_p6  ;;  %p5826_p12 = por %p5825_p9, %p5824_p7 }
  0x78   : > { %p5827_p4 = pnand %p5826_p12, %p5820_p1 }
  0x7a   : > { %5830 = shalt.err (!%p5827_p4)
}
  0x7b   : > { %p8184_p5 = scmp.ne.s32.totalorder %s8181_s0, 0  ;;  %s6726_s17 = sshll.u32 %s6399_s3, 8 }
  0x7c   : > { %s704_s20 = scalar_lea.vmem [#allocation14], %s6705_s1  ;;  %s8185_s6 = sld [smem:[#allocation52_spill]] }
  0x7d   : > { %5343 = dma.hbm_to_vmem [thread:$0]  (!%p8184_p5), %s6671_s2, 16, %s694_s27, %s6673_s19  }
  0x7e   : > { %s711_s21 = sshll.u32 %s704_s20, 4  ;;  %s6735_s21 = int_to_ptr.vmem [resolvable:$true] %s711_s21 }
  0x82   : > { %s6733_s25 = scalar_lea.hbm %s8185_s6, %s6726_s17  ;;  %s5836_s15 = scalar_lea.hbm %s8185_s6, 512 }
  0x83   : > { %s5831_s23 = scalar_lea.hbm %s6733_s25, 256  ;;  %p5837_p10 = scmp.lt.u32.totalorder %s6733_s25, %s8185_s6 }
  0x84   : > { %p5832_p12 = scmp.ne.s32.totalorder %s6733_s25, %s5831_s23  ;;  %p5838_p11 = scmp.lt.u32.totalorder %s5836_s15, %s5831_s23 }
  0x85   : > { %p5840_p2 = scmp.lt.u32.totalorder %s5831_s23, %s6733_s25 }
  0x86   : > { %p5834_p3 = pnand %p5832_p12, %p6679_p0  ;;  %p5839_p13 = por %p5838_p11, %p5837_p10 }
  0x88   : > { %p5835_p8 = pneg %p5834_p3  ;;  %p5841_p6 = por %p5840_p2, %p5839_p13 }
  0x8a   : > { %p5842_p1 = pnand %p5841_p6, %p5835_p8 }
  0x8c   : > { %5845 = shalt.err (!%p5842_p1)
}
  0x8d   : > { %s5846_s22 = scalar_lea.vmem %s6735_s21, 256  ;;  %s6410_s29 = smov [#allocation14]  }
  0x8e   : > { %p5847_p7 = scmp.ne.s32.totalorder %s6735_s21, %s5846_s22  ;;  %s5851_s2 = sshll.u32 %s6410_s29, 4  ;;  %s5852_s2 = int_to_ptr.vmem [resolvable:$false] %s5851_s2 }
  0x8f   : > { %s5853_s27 = scalar_lea.vmem %s5852_s2, 512  ;;  %p5854_p12 = scmp.lt.s32.totalorder %s6735_s21, %s5852_s2 }
  0x90   : > { %p5849_p9 = pnand %p5847_p7, %p6679_p0  ;;  %p5855_p3 = scmp.lt.s32.totalorder %s5853_s27, %s5846_s22 }
  0x92   : > { %p5850_p4 = pneg %p5849_p9  ;;  %p5856_p10 = por %p5855_p3, %p5854_p12 }
  0x94   : > { %p5857_p11 = pnand %p5856_p10, %p5850_p4 }
  0x96   : > { %5860 = shalt.err (!%p5857_p11)
}
  0x97   : > { %s8134_s23 = smov 64   ;;  %s8137_s15 = smov 4  }
  0x98   : > { %5346 = dma.hbm_to_vmem [thread:$0]  (!%p8184_p5), %s6733_s25, 256, %s6735_s21, %s6673_s19, %s8134_s23, %s8134_s23, %s8137_s15  }
  0x99   : > { %s8186_s7 = sld [smem:[#allocation53_spill]]  ;;  %s724_s29 = scalar_lea.vmem [#allocation15], %s6646_s28 }
  0x9a   : > { %s731_s2 = sshll.u32 %s724_s29, 4  ;;  %s8187_s8 = sld [smem:[#allocation54_spill]]  ;;  %s732_s2 = int_to_ptr.vmem [resolvable:$true] %s731_s2 }
  0x9f   : > { %s6766_s22 = scalar_lea.hbm %s8186_s7, %s6649_s18  ;;  %s5866_s24 = scalar_lea.hbm %s8186_s7, 32 }
  0xa0   : > { %s6773_s6 = scalar_lea.hbm %s8187_s8, %s6726_s17  ;;  %s5861_s16 = scalar_lea.hbm %s6766_s22, 16 }
  0xa1   : > { %p5862_p8 = scmp.ne.s32.totalorder %s6766_s22, %s5861_s16  ;;  %p5867_p6 = scmp.lt.u32.totalorder %s6766_s22, %s8186_s7 }
  0xa2   : > { %p5868_p1 = scmp.lt.u32.totalorder %s5866_s24, %s5861_s16  ;;  %p5870_p9 = scmp.lt.u32.totalorder %s5861_s16, %s6766_s22 }
  0xa3   : > { %p5864_p13 = pnand %p5862_p8, %p6679_p0 }
  0xa4   : > { %p5869_p7 = por %p5868_p1, %p5867_p6 }
  0xa5   : > { %p5865_p2 = pneg %p5864_p13 }
  0xa6   : > { %p5871_p4 = por %p5870_p9, %p5869_p7 }
  0xa8   : > { %p5872_p12 = pnand %p5871_p4, %p5865_p2 }
  0xaa   : > { %5875 = shalt.err (!%p5872_p12)
}
  0xab   : > { %s5876_s5 = scalar_lea.vmem %s732_s2, 16  ;;  %s6413_s29 = smov [#allocation15]  }
  0xac   : > { %p5877_p3 = scmp.ne.s32.totalorder %s732_s2, %s5876_s5  ;;  %s5881_s27 = sshll.u32 %s6413_s29, 4  ;;  %s5882_s27 = int_to_ptr.vmem [resolvable:$false] %s5881_s27 }
  0xad   : > { %s5883_s21 = scalar_lea.vmem %s5882_s27, 32  ;;  %p5884_p8 = scmp.lt.s32.totalorder %s732_s2, %s5882_s27 }
  0xae   : > { %p5879_p10 = pnand %p5877_p3, %p6679_p0  ;;  %p5885_p13 = scmp.lt.s32.totalorder %s5883_s21, %s5876_s5 }
  0xb0   : > { %p5880_p11 = pneg %p5879_p10  ;;  %p5886_p5 = por %p5885_p13, %p5884_p8 }
  0xb2   : > { %p5887_p1 = pnand %p5886_p5, %p5880_p11 }
  0xb4   : > { %5890 = shalt.err (!%p5887_p1)
}
  0xb5   : > { %p8188_p6 = scmp.ne.s32.totalorder %s8181_s0, 0  ;;  %s742_s16 = scalar_lea.vmem [#allocation16], %s6705_s1 }
  0xb6   : > { %s749_s23 = sshll.u32 %s742_s16, 4  ;;  %s8189_s9 = sld [smem:[#allocation55_spill]]  ;;  %s6794_s23 = int_to_ptr.vmem [resolvable:$true] %s749_s23 }
  0xb7   : > { %5349 = dma.hbm_to_vmem [thread:$0]  (!%p8188_p6), %s6766_s22, 16, %s732_s2, %s6673_s19  }
  0xb8   : > { %s5891_s5 = scalar_lea.hbm %s6773_s6, 256  ;;  %s5896_s21 = scalar_lea.hbm %s8187_s8, 512 }
  0xb9   : > { %p5892_p5 = scmp.ne.s32.totalorder %s6773_s6, %s5891_s5  ;;  %p5897_p9 = scmp.lt.u32.totalorder %s6773_s6, %s8187_s8 }
  0xba   : > { %p5898_p4 = scmp.lt.u32.totalorder %s5896_s21, %s5891_s5  ;;  %p5900_p3 = scmp.lt.u32.totalorder %s5891_s5, %s6773_s6 }
  0xbb   : > { %p5894_p2 = pnand %p5892_p5, %p6679_p0 }
  0xbc   : > { %s6800_s20 = scalar_lea.hbm %s8189_s9, %s6649_s18  ;;  %p5899_p12 = por %p5898_p4, %p5897_p9 }
  0xbd   : > { %p5895_p7 = pneg %p5894_p2 }
  0xbe   : > { %p5901_p10 = por %p5900_p3, %p5899_p12 }
  0xc0   : > { %p5902_p11 = pnand %p5901_p10, %p5895_p7 }
  0xc2   : > { %5905 = shalt.err (!%p5902_p11)
}
  0xc3   : > { %s5906_s2 = scalar_lea.vmem %s6794_s23, 256  ;;  %s6414_s16 = smov [#allocation16]  }
  0xc4   : > { %p5907_p8 = scmp.ne.s32.totalorder %s6794_s23, %s5906_s2  ;;  %s5911_s25 = sshll.u32 %s6414_s16, 4  ;;  %s5912_s25 = int_to_ptr.vmem [resolvable:$false] %s5911_s25 }
  0xc5   : > { %s5913_s15 = scalar_lea.vmem %s5912_s25, 512  ;;  %p5914_p5 = scmp.lt.s32.totalorder %s6794_s23, %s5912_s25 }
  0xc6   : > { %p5909_p13 = pnand %p5907_p8, %p6679_p0  ;;  %p5915_p2 = scmp.lt.s32.totalorder %s5913_s15, %s5906_s2 }
  0xc8   : > { %p5910_p1 = pneg %p5909_p13  ;;  %p5916_p9 = por %p5915_p2, %p5914_p5 }
  0xca   : > { %p5917_p4 = pnand %p5916_p9, %p5910_p1 }
  0xcc   : > { %5920 = shalt.err (!%p5917_p4)
}
  0xcd   : > { %s8190_s24 = smov 4   ;;  %s8191_s5 = smov 64  }
  0xce   : > { %5352 = dma.hbm_to_vmem [thread:$0]  (!%p8188_p6), %s6773_s6, 256, %s6794_s23, %s6673_s19, %s8191_s5, %s8191_s5, %s8190_s24  }
  0xcf   : > { %s762_s29 = scalar_lea.vmem [#allocation17], %s6646_s28  ;;  %s8192_s10 = sld [smem:[#allocation56_spill]] }
  0xd0   : > { %s769_s27 = sshll.u32 %s762_s29, 4  ;;  %s5921_s16 = scalar_lea.hbm %s6800_s20, 16  ;;  %s770_s27 = int_to_ptr.vmem [resolvable:$true] %s769_s27 }
  0xd1   : > { %p5922_p7 = scmp.ne.s32.totalorder %s6800_s20, %s5921_s16  ;;  %s5926_s7 = scalar_lea.hbm %s8189_s9, 32 }
  0xd2   : > { %p5927_p10 = scmp.lt.u32.totalorder %s6800_s20, %s8189_s9  ;;  %p5928_p11 = scmp.lt.u32.totalorder %s5926_s7, %s5921_s16 }
  0xd3   : > { %p5924_p12 = pnand %p5922_p7, %p6679_p0  ;;  %p5930_p13 = scmp.lt.u32.totalorder %s5921_s16, %s6800_s20 }
  0xd4   : > { %p5929_p8 = por %p5928_p11, %p5927_p10 }
  0xd5   : > { %s6832_s2 = scalar_lea.hbm %s8192_s10, %s6649_s18  ;;  %p5925_p3 = pneg %p5924_p12 }
  0xd6   : > { %p5931_p1 = por %p5930_p13, %p5929_p8 }
  0xd8   : > { %p5932_p5 = pnand %p5931_p1, %p5925_p3 }
  0xda   : > { %5935 = shalt.err (!%p5932_p5)
}
  0xdb   : > { %s5936_s6 = scalar_lea.vmem %s770_s27, 16  ;;  %s6415_s23 = smov [#allocation17]  }
  0xdc   : > { %p5937_p2 = scmp.ne.s32.totalorder %s770_s27, %s5936_s6  ;;  %s5941_s29 = sshll.u32 %s6415_s23, 4  ;;  %s5942_s29 = int_to_ptr.vmem [resolvable:$false] %s5941_s29 }
  0xdd   : > { %s5943_s21 = scalar_lea.vmem %s5942_s29, 32  ;;  %p5944_p7 = scmp.lt.s32.totalorder %s770_s27, %s5942_s29 }
  0xde   : > { %p5939_p9 = pnand %p5937_p2, %p6679_p0  ;;  %p5945_p12 = scmp.lt.s32.totalorder %s5943_s21, %s5936_s6 }
  0xe0   : > { %p5940_p4 = pneg %p5939_p9  ;;  %p5946_p6 = por %p5945_p12, %p5944_p7 }
  0xe2   : > { %p5947_p10 = pnand %p5946_p6, %p5940_p4 }
  0xe4   : > { %5950 = shalt.err (!%p5947_p10)
}
  0xe5   : > { %p8193_p11 = scmp.ne.s32.totalorder %s8181_s0, 0  ;;  %s779_s7 = scalar_lea.vmem [#allocation18], %s6646_s28 }
  0xe6   : > { %s786_s8 = sshll.u32 %s779_s7, 4  ;;  %s8194_s11 = sld [smem:[#allocation57_spill]]  ;;  %s787_s8 = int_to_ptr.vmem [resolvable:$true] %s786_s8 }
  0xe7   : > { %5355 = dma.hbm_to_vmem [thread:$0]  (!%p8193_p11), %s6800_s20, 16, %s770_s27, %s6673_s19  }
  0xe8   : > { %s5951_s25 = scalar_lea.hbm %s6832_s2, 16  ;;  %s5956_s23 = scalar_lea.hbm %s8192_s10, 32 }
  0xe9   : > { %p5952_p6 = scmp.ne.s32.totalorder %s6832_s2, %s5951_s25  ;;  %p5957_p13 = scmp.lt.u32.totalorder %s6832_s2, %s8192_s10 }
  0xea   : > { %p5958_p1 = scmp.lt.u32.totalorder %s5956_s23, %s5951_s25  ;;  %p5960_p2 = scmp.lt.u32.totalorder %s5951_s25, %s6832_s2 }
  0xeb   : > { %p5954_p3 = pnand %p5952_p6, %p6679_p0 }
  0xec   : > { %s6857_s16 = scalar_lea.hbm %s8194_s11, %s6649_s18  ;;  %p5959_p5 = por %p5958_p1, %p5957_p13 }
  0xed   : > { %p5955_p8 = pneg %p5954_p3 }
  0xee   : > { %p5961_p9 = por %p5960_p2, %p5959_p5 }
  0xf0   : > { %p5962_p4 = pnand %p5961_p9, %p5955_p8 }
  0xf2   : > { %5965 = shalt.err (!%p5962_p4)
}
  0xf3   : > { %s5966_s20 = scalar_lea.vmem %s787_s8, 16  ;;  %s6416_s27 = smov [#allocation18]  }
  0xf4   : > { %p5967_p7 = scmp.ne.s32.totalorder %s787_s8, %s5966_s20  ;;  %s5971_s7 = sshll.u32 %s6416_s27, 4  ;;  %s5972_s7 = int_to_ptr.vmem [resolvable:$false] %s5971_s7 }
  0xf5   : > { %s5973_s14 = scalar_lea.vmem %s5972_s7, 32  ;;  %p5974_p6 = scmp.lt.s32.totalorder %s787_s8, %s5972_s7 }
  0xf6   : > { %p5969_p12 = pnand %p5967_p7, %p6679_p0  ;;  %p5975_p3 = scmp.lt.s32.totalorder %s5973_s14, %s5966_s20 }
  0xf8   : > { %p5970_p10 = pneg %p5969_p12  ;;  %p5976_p11 = por %p5975_p3, %p5974_p6 }
  0xfa   : > { %p5977_p1 = pnand %p5976_p11, %p5970_p10 }
  0xfc   : > { %5980 = shalt.err (!%p5977_p1)
}
  0xfd   : > { %p8195_p13 = scmp.ne.s32.totalorder %s8181_s0, 0  ;;  %s796_s22 = scalar_lea.vmem [#allocation19], %s6646_s28 }
  0xfe   : > { %s803_s25 = sshll.u32 %s796_s22, 4  ;;  %s6882_s23 = scalar_lea.hbm %s8092_s12, %s6726_s17  ;;  %s804_s25 = int_to_ptr.vmem [resolvable:$true] %s803_s25 }
  0xff   : > { %5358 = dma.hbm_to_vmem [thread:$0]  (!%p8195_p13), %s6832_s2, 16, %s787_s8, %s6673_s19  }
 0x100   : > { %s5981_s29 = scalar_lea.hbm %s6857_s16, 16  ;;  %s5986_s27 = scalar_lea.hbm %s8194_s11, 32 }
 0x101   : > { %p5982_p11 = scmp.ne.s32.totalorder %s6857_s16, %s5981_s29  ;;  %p5987_p2 = scmp.lt.u32.totalorder %s6857_s16, %s8194_s11 }
 0x102   : > { %p5988_p9 = scmp.lt.u32.totalorder %s5986_s27, %s5981_s29  ;;  %p5990_p7 = scmp.lt.u32.totalorder %s5981_s29, %s6857_s16 }
 0x103   : > { %p5984_p8 = pnand %p5982_p11, %p6679_p0 }
 0x104   : > { %p5989_p4 = por %p5988_p9, %p5987_p2 }
 0x105   : > { %p5985_p5 = pneg %p5984_p8 }
 0x106   : > { %p5991_p12 = por %p5990_p7, %p5989_p4 }
 0x108   : > { %p5992_p10 = pnand %p5991_p12, %p5985_p5 }
 0x10a   : > { %5995 = shalt.err (!%p5992_p10)
}
 0x10b   : > { %s5996_s17 = scalar_lea.vmem %s804_s25, 16  ;;  %s6417_s2 = smov [#allocation19]  }
 0x10c   : > { %p5997_p6 = scmp.ne.s32.totalorder %s804_s25, %s5996_s17  ;;  %s6001_s8 = sshll.u32 %s6417_s2, 4  ;;  %s6002_s8 = int_to_ptr.vmem [resolvable:$false] %s6001_s8 }
 0x10d   : > { %s6003_s22 = scalar_lea.vmem %s6002_s8, 32  ;;  %p6004_p11 = scmp.lt.s32.totalorder %s804_s25, %s6002_s8 }
 0x10e   : > { %p5999_p3 = pnand %p5997_p6, %p6679_p0  ;;  %p6005_p8 = scmp.lt.s32.totalorder %s6003_s22, %s5996_s17 }
 0x110   : > { %p6000_p1 = pneg %p5999_p3  ;;  %p6006_p13 = por %p6005_p8, %p6004_p11 }
 0x112   : > { %p6007_p2 = pnand %p6006_p13, %p6000_p1 }
 0x114   : > { %6010 = shalt.err (!%p6007_p2)
}
 0x115   : > { %p8196_p9 = scmp.ne.s32.totalorder %s8181_s0, 0  ;;  %s814_s15 = scalar_lea.vmem [#allocation20], %s6705_s1 }
 0x116   : > { %s821_s6 = sshll.u32 %s814_s15, 4  ;;  %s6418_s29 = smov [#allocation7]   ;;  %s6903_s6 = int_to_ptr.vmem [resolvable:$true] %s821_s6 }
 0x117   : > { %5361 = dma.hbm_to_vmem [thread:$0]  (!%p8196_p9), %s6857_s16, 16, %s804_s25, %s6673_s19  }
 0x118   : > { %s6905_s21 = sshll.u32 %s6418_s29, 4  ;;  %s6011_s20 = scalar_lea.hbm %s6882_s23, 256  ;;  %s596_s21 = int_to_ptr.vmem [resolvable:$true] %s6905_s21 }
 0x119   : > { %p6012_p13 = scmp.ne.s32.totalorder %s6882_s23, %s6011_s20  ;;  %s6016_s14 = scalar_lea.hbm %s8092_s12, 512 }
 0x11a   : > { %p6017_p7 = scmp.lt.u32.totalorder %s6882_s23, %s8092_s12  ;;  %p6018_p12 = scmp.lt.u32.totalorder %s6016_s14, %s6011_s20 }
 0x11b   : > { %p6014_p5 = pnand %p6012_p13, %p6679_p0  ;;  %p6020_p6 = scmp.lt.u32.totalorder %s6011_s20, %s6882_s23 }
 0x11c   : > { %p6019_p10 = por %p6018_p12, %p6017_p7 }
 0x11d   : > { %p6015_p4 = pneg %p6014_p5 }
 0x11e   : > { %p6021_p3 = por %p6020_p6, %p6019_p10 }
 0x120   : > { %p6022_p1 = pnand %p6021_p3, %p6015_p4 }
 0x122   : > { %6025 = shalt.err (!%p6022_p1)
}
 0x123   : > { %s6026_s1 = scalar_lea.vmem %s6903_s6, 256  ;;  %s6419_s16 = smov [#allocation20]  }
 0x124   : > { %p6027_p11 = scmp.ne.s32.totalorder %s6903_s6, %s6026_s1  ;;  %s6031_s25 = sshll.u32 %s6419_s16, 4  ;;  %s6032_s25 = int_to_ptr.vmem [resolvable:$false] %s6031_s25 }
 0x125   : > { %s6033_s8 = scalar_lea.vmem %s6032_s25, 512  ;;  %p6034_p13 = scmp.lt.s32.totalorder %s6903_s6, %s6032_s25 }
 0x126   : > { %p6029_p8 = pnand %p6027_p11, %p6679_p0  ;;  %p6035_p5 = scmp.lt.s32.totalorder %s6033_s8, %s6026_s1 }
 0x128   : > { %p6030_p2 = pneg %p6029_p8  ;;  %p6036_p7 = por %p6035_p5, %p6034_p13 }
 0x12a   : > { %p6037_p12 = pnand %p6036_p7, %p6030_p2 }
 0x12c   : > { %6040 = shalt.err (!%p6037_p12)
}
 0x12d   : > { %5364 = dma.hbm_to_vmem [thread:$0]  (!%p8196_p9), %s6882_s23, 256, %s6903_s6, %s6673_s19, %s8191_s5, %s8191_s5, %s8190_s24  }
 0x12e   : > { %s8197_s29 = sld [smem:[#allocation47_spill]]  ;;  %p8198_p10 = scmp.ne.s32.totalorder %s8177_s4, 0 }
 0x134   : > { %s6041_s20 = scalar_lea.hbm %s8197_s29, 64 }
 0x135   : > { %p6042_p4 = scmp.ne.s32.totalorder %s8197_s29, %s6041_s20  ;;  %p6048_p1 = scmp.lt.u32.totalorder %s6041_s20, %s8197_s29 }
 0x137   : > { %p6044_p6 = pnand %p6042_p4, %p8198_p10 }
 0x139   : > { %p6045_p3 = pneg %p6044_p6 }
 0x13b   : > { %p6050_p11 = pnand %p6048_p1, %p6045_p3 }
 0x13d   : > { %6053 = shalt.err (!%p6050_p11)
}
 0x13e   : > { %s6054_s2 = scalar_lea.vmem %s596_s21, 64  ;;  %p6062_p5 = scmp.lt.s32.totalorder %s596_s21, %s596_s21 }
 0x13f   : > { %p6055_p8 = scmp.ne.s32.totalorder %s596_s21, %s6054_s2  ;;  %p6063_p7 = scmp.lt.s32.totalorder %s6054_s2, %s6054_s2 }
 0x141   : > { %p6057_p2 = pnand %p6055_p8, %p8198_p10  ;;  %p6064_p12 = por %p6063_p7, %p6062_p5 }
 0x143   : > { %p6058_p13 = pneg %p6057_p2 }
 0x145   : > { %p6065_p9 = pnand %p6064_p12, %p6058_p13 }
 0x147   : > { %6068 = shalt.err (!%p6065_p9)
}
 0x148   : > { %p8199_p4 = scmp.ne.s32.totalorder %s8175_s30, 0  ;;  %s6955_s25 = scalar_lea.hbm %s8093_s13, %s6649_s18 }
 0x149   : > { %s834_s8 = scalar_lea.vmem [#allocation21], %s6646_s28  ;;  %s6069_s15 = scalar_lea.hbm %s6955_s25, 16 }
 0x14a   : > { %5321 = dma.hbm_to_vmem [thread:$0]  (!%p8199_p4), %s8197_s29, 64, %s596_s21, [#allocation8]  }
 0x14b   : > { %s841_s22 = sshll.u32 %s834_s8, 4  ;;  %p6070_p9 = scmp.ne.s32.totalorder %s6955_s25, %s6069_s15  ;;  %s842_s22 = int_to_ptr.vmem [resolvable:$true] %s841_s22 }
 0x14c   : > { %s6074_s21 = scalar_lea.hbm %s8093_s13, 32  ;;  %p6075_p1 = scmp.lt.u32.totalorder %s6955_s25, %s8093_s13 }
 0x14d   : > { %p6072_p6 = pnand %p6070_p9, %p6679_p0  ;;  %p6076_p11 = scmp.lt.u32.totalorder %s6074_s21, %s6069_s15 }
 0x14e   : > { %p6078_p2 = scmp.lt.u32.totalorder %s6069_s15, %s6955_s25 }
 0x14f   : > { %p6073_p3 = pneg %p6072_p6  ;;  %p6077_p8 = por %p6076_p11, %p6075_p1 }
 0x151   : > { %p6079_p13 = por %p6078_p2, %p6077_p8 }
 0x153   : > { %p6080_p5 = pnand %p6079_p13, %p6073_p3 }
 0x155   : > { %6083 = shalt.err (!%p6080_p5)
}
 0x156   : > { %s6084_s17 = scalar_lea.vmem %s842_s22, 16  ;;  %s6420_s2 = smov [#allocation21]  }
 0x157   : > { %p6085_p7 = scmp.ne.s32.totalorder %s842_s22, %s6084_s17  ;;  %s6089_s23 = sshll.u32 %s6420_s2, 4  ;;  %s6090_s23 = int_to_ptr.vmem [resolvable:$false] %s6089_s23 }
 0x158   : > { %s6091_s6 = scalar_lea.vmem %s6090_s23, 32  ;;  %p6092_p6 = scmp.lt.s32.totalorder %s842_s22, %s6090_s23 }
 0x159   : > { %p6087_p12 = pnand %p6085_p7, %p6679_p0  ;;  %p6093_p4 = scmp.lt.s32.totalorder %s6091_s6, %s6084_s17 }
 0x15b   : > { %p6088_p9 = pneg %p6087_p12  ;;  %p6094_p10 = por %p6093_p4, %p6092_p6 }
 0x15d   : > { %p6095_p1 = pnand %p6094_p10, %p6088_p9 }
 0x15f   : > { %6098 = shalt.err (!%p6095_p1)
}
 0x160   : > { %p8200_p11 = scmp.ne.s32.totalorder %s8181_s0, 0  ;;  %s6421_s1 = smov [#allocation9]  }
 0x161   : > { %s606_s16 = sshll.u32 %s6421_s1, 4  ;;  %s6422_s8 = smov [#allocation10]   ;;  %s607_s16 = int_to_ptr.vmem [resolvable:$true] %s606_s16 }
 0x162   : > { %5367 = dma.hbm_to_vmem [thread:$0]  (!%p8200_p11), %s6955_s25, 16, %s842_s22, %s6673_s19  }
 0x163   : > { %s616_s15 = sshll.u32 %s6422_s8, 4  ;;  %s8201_s21 = sld [smem:[#allocation48_spill]]  ;;  %s617_s15 = int_to_ptr.vmem [resolvable:$true] %s616_s15 }
 0x164   : > { %p8202_p4 = scmp.ne.s32.totalorder %s8177_s4, 0 }
 0x169   : > { %s6099_s7 = scalar_lea.hbm %s8201_s21, 16 }
 0x16a   : > { %p6100_p10 = scmp.ne.s32.totalorder %s8201_s21, %s6099_s7  ;;  %p6106_p2 = scmp.lt.u32.totalorder %s6099_s7, %s8201_s21 }
 0x16c   : > { %p6102_p3 = pnand %p6100_p10, %p8202_p4 }
 0x16e   : > { %p6103_p8 = pneg %p6102_p3 }
 0x170   : > { %p6108_p13 = pnand %p6106_p2, %p6103_p8 }
 0x172   : > { %6111 = shalt.err (!%p6108_p13)
}
 0x173   : > { %s6112_s25 = scalar_lea.vmem %s607_s16, 16  ;;  %s6119_s22 = scalar_lea.vmem %s607_s16, 32 }
 0x174   : > { %p6113_p5 = scmp.ne.s32.totalorder %s607_s16, %s6112_s25  ;;  %p6120_p9 = scmp.lt.s32.totalorder %s607_s16, %s607_s16 }
 0x175   : > { %p6121_p6 = scmp.lt.s32.totalorder %s6119_s22, %s6112_s25 }
 0x176   : > { %p6115_p7 = pnand %p6113_p5, %p8202_p4 }
 0x177   : > { %p6122_p1 = por %p6121_p6, %p6120_p9 }
 0x178   : > { %p6116_p12 = pneg %p6115_p7 }
 0x17a   : > { %p6123_p11 = pnand %p6122_p1, %p6116_p12 }
 0x17c   : > { %6126 = shalt.err (!%p6123_p11)
}
 0x17d   : > { %p8203_p10 = scmp.ne.s32.totalorder %s8175_s30, 0  ;;  %s4793_s8 = sshll.u32 %s6646_s28, 6 }
 0x17e   : > { %s8204_s7 = sld [smem:[#allocation49_spill]] }
 0x17f   : > { %5324 = dma.hbm_to_vmem [thread:$0]  (!%p8203_p10), %s8201_s21, 16, %s607_s16, [#allocation8]  }
 0x184   : > { %s6127_s14 = scalar_lea.hbm %s8204_s7, 256  ;;  %s6132_s22 = scalar_lea.hbm %s8204_s7, 1024 }
 0x185   : > { %p6128_p3 = scmp.ne.s32.totalorder %s8204_s7, %s6127_s14  ;;  %p6133_p2 = scmp.lt.u32.totalorder %s6132_s22, %s6127_s14 }
 0x186   : > { %p6134_p13 = scmp.lt.u32.totalorder %s6127_s14, %s8204_s7 }
 0x187   : > { %p6130_p11 = pnand %p6128_p3, %p8202_p4 }
 0x188   : > { %p6135_p5 = por %p6134_p13, %p6133_p2 }
 0x189   : > { %p6131_p8 = pneg %p6130_p11 }
 0x18b   : > { %p6136_p7 = pnand %p6135_p5, %p6131_p8 }
 0x18d   : > { %6139 = shalt.err (!%p6136_p7)
}
 0x18e   : > { %s6140_s1 = scalar_lea.vmem %s617_s15, 256  ;;  %p6148_p1 = scmp.lt.s32.totalorder %s617_s15, %s617_s15 }
 0x18f   : > { %p6141_p12 = scmp.ne.s32.totalorder %s617_s15, %s6140_s1  ;;  %p6149_p3 = scmp.lt.s32.totalorder %s6140_s1, %s6140_s1 }
 0x191   : > { %p6143_p9 = pnand %p6141_p12, %p8202_p4  ;;  %p6150_p11 = por %p6149_p3, %p6148_p1 }
 0x193   : > { %p6144_p6 = pneg %p6143_p9 }
 0x195   : > { %p6151_p0 = pnand %p6150_p11, %p6144_p6 }
 0x197   : > { %6154 = shalt.err (!%p6151_p0)
}
 0x198   : > { %s8205_s20 = smov 8   ;;  %s8206_s27 = smov 128  }
 0x199   : > { %5327 = dma.hbm_to_vmem [thread:$0]  (!%p8203_p10), %s8204_s7, 256, %s617_s15, [#allocation11], %s8206_s27, %s8206_s27, %s8205_s20  }
 0x19a   : > { %s4893_s2 = sshll.u32 %s6399_s3, 10  ;;  %s8207_s22 = sld [smem:[#allocation58_spill]] }
 0x19b   : > { %s852_s16 = scalar_lea.vmem [#allocation22], %s4793_s8  ;;  %p8208_p8 = scmp.ne.s32.totalorder %s8183_s26, 0 }
 0x19c   : > { %s859_s1 = sshll.u32 %s852_s16, 4  ;;  %s7025_s1 = int_to_ptr.vmem [resolvable:$true] %s859_s1 }
 0x1a0   : > { %s7023_s6 = scalar_lea.hbm %s8207_s22, %s4893_s2  ;;  %s6160_s27 = scalar_lea.hbm %s8207_s22, 2048 }
 0x1a1   : > { %s6155_s9 = scalar_lea.hbm %s7023_s6, 1024  ;;  %p6161_p5 = scmp.lt.u32.totalorder %s7023_s6, %s8207_s22 }
 0x1a2   : > { %p6156_p0 = scmp.ne.s32.totalorder %s7023_s6, %s6155_s9  ;;  %p6162_p7 = scmp.lt.u32.totalorder %s6160_s27, %s6155_s9 }
 0x1a3   : > { %p6164_p9 = scmp.lt.u32.totalorder %s6155_s9, %s7023_s6 }
 0x1a4   : > { %p6158_p2 = pnand %p6156_p0, %p8208_p8  ;;  %p6163_p12 = por %p6162_p7, %p6161_p5 }
 0x1a6   : > { %p6159_p13 = pneg %p6158_p2  ;;  %p6165_p6 = por %p6164_p9, %p6163_p12 }
 0x1a8   : > { %p6166_p1 = pnand %p6165_p6, %p6159_p13 }
 0x1aa   : > { %6169 = shalt.err (!%p6166_p1)
}
 0x1ab   : > { %s6170_s8 = scalar_lea.vmem %s7025_s1, 1024  ;;  %s6423_s2 = smov [#allocation22]  }
 0x1ac   : > { %p6171_p3 = scmp.ne.s32.totalorder %s7025_s1, %s6170_s8  ;;  %s6175_s23 = sshll.u32 %s6423_s2, 4  ;;  %s6176_s23 = int_to_ptr.vmem [resolvable:$false] %s6175_s23 }
 0x1ad   : > { %s6177_s25 = scalar_lea.vmem %s6176_s23, 2048  ;;  %p6178_p2 = scmp.lt.s32.totalorder %s7025_s1, %s6176_s23 }
 0x1ae   : > { %p6173_p11 = pnand %p6171_p3, %p8208_p8  ;;  %p6179_p10 = scmp.lt.s32.totalorder %s6177_s25, %s6170_s8 }
 0x1b0   : > { %p6174_p0 = pneg %p6173_p11  ;;  %p6180_p5 = por %p6179_p10, %p6178_p2 }
 0x1b2   : > { %p6181_p7 = pnand %p6180_p5, %p6174_p0 }
 0x1b4   : > { %6184 = shalt.err (!%p6181_p7)
}
 0x1b5   : > { %p8209_p13 = scmp.ne.s32.totalorder %s8181_s0, 0  ;;  %s6424_s9 = smov [#allocation24]  }
 0x1b6   : > { %s630_s16 = sshll.u32 %s6424_s9, 4  ;;  %s6425_s15 = smov [#allocation25]   ;;  %s631_s16 = int_to_ptr.vmem [resolvable:$true] %s630_s16 }
 0x1b7   : > { %5370 = dma.hbm_to_vmem [thread:$0]  (!%p8209_p13), %s7023_s6, 1024, %s7025_s1, %s6673_s19, %s8191_s5, %s8191_s5, %s8190_s24  }
 0x1b8   : > { %s641_s20 = sshll.u32 %s6425_s15, 4  ;;  %s8210_s17 = sld [smem:[#allocation60_spill]]  ;;  %s642_s20 = int_to_ptr.vmem [resolvable:$true] %s641_s20 }
 0x1be   : > { %s6185_s8 = scalar_lea.hbm %s8210_s17, 16 }
 0x1bf   : > { %p6186_p10 = scmp.ne.s32.totalorder %s8210_s17, %s6185_s8  ;;  %p6192_p6 = scmp.lt.u32.totalorder %s6185_s8, %s8210_s17 }
 0x1c1   : > { %p6188_p12 = pnand %p6186_p10, %p8202_p4 }
 0x1c3   : > { %p6189_p9 = pneg %p6188_p12 }
 0x1c5   : > { %p6194_p1 = pnand %p6192_p6, %p6189_p9 }
 0x1c7   : > { %6197 = shalt.err (!%p6194_p1)
}
 0x1c8   : > { %s6198_s24 = scalar_lea.vmem %s631_s16, 16  ;;  %s6205_s5 = scalar_lea.vmem %s631_s16, 32 }
 0x1c9   : > { %p6199_p3 = scmp.ne.s32.totalorder %s631_s16, %s6198_s24  ;;  %p6206_p2 = scmp.lt.s32.totalorder %s631_s16, %s631_s16 }
 0x1ca   : > { %p6207_p5 = scmp.lt.s32.totalorder %s6205_s5, %s6198_s24 }
 0x1cb   : > { %p6201_p11 = pnand %p6199_p3, %p8202_p4 }
 0x1cc   : > { %p6208_p7 = por %p6207_p5, %p6206_p2 }
 0x1cd   : > { %p6202_p0 = pneg %p6201_p11 }
 0x1cf   : > { %p6209_p13 = pnand %p6208_p7, %p6202_p0 }
 0x1d1   : > { %6212 = shalt.err (!%p6209_p13)
}
 0x1d2   : > { %p8211_p10 = scmp.ne.s32.totalorder %s8175_s30, 0  ;;  %s8212_s15 = sld [smem:[#allocation61_spill]] }
 0x1d4   : > { %5330 = dma.hbm_to_vmem [thread:$0]  (!%p8211_p10), %s8210_s17, 16, %s631_s16, [#allocation8]  }
 0x1d8   : > { %s6213_s27 = scalar_lea.hbm %s8212_s15, 16 }
 0x1d9   : > { %p6214_p12 = scmp.ne.s32.totalorder %s8212_s15, %s6213_s27  ;;  %p6220_p13 = scmp.lt.u32.totalorder %s6213_s27, %s8212_s15 }
 0x1db   : > { %p6216_p9 = pnand %p6214_p12, %p8202_p4 }
 0x1dd   : > { %p6217_p6 = pneg %p6216_p9 }
 0x1df   : > { %p6222_p1 = pnand %p6220_p13, %p6217_p6 }
 0x1e1   : > { %6225 = shalt.err (!%p6222_p1)
}
 0x1e2   : > { %s6226_s25 = scalar_lea.vmem %s642_s20, 16  ;;  %s6233_s16 = scalar_lea.vmem %s642_s20, 32 }
 0x1e3   : > { %p6227_p3 = scmp.ne.s32.totalorder %s642_s20, %s6226_s25  ;;  %p6234_p2 = scmp.lt.s32.totalorder %s642_s20, %s642_s20 }
 0x1e4   : > { %p6235_p5 = scmp.lt.s32.totalorder %s6233_s16, %s6226_s25 }
 0x1e5   : > { %p6229_p11 = pnand %p6227_p3, %p8202_p4 }
 0x1e6   : > { %p6236_p7 = por %p6235_p5, %p6234_p2 }
 0x1e7   : > { %p6230_p0 = pneg %p6229_p11 }
 0x1e9   : > { %p6237_p8 = pnand %p6236_p7, %p6230_p0 }
 0x1eb   : > { %6240 = shalt.err (!%p6237_p8)
}
 0x1ec   : > { %5333 = dma.hbm_to_vmem [thread:$0]  (!%p8211_p10), %s8212_s15, 16, %s642_s20, [#allocation11]  }
 0x1ed   : > { %s6426_s6 = smov [#allocation26]   ;;  %s8213_s27 = sld [smem:[#allocation59_spill]] }
 0x1ee   : > { %s652_s1 = sshll.u32 %s6426_s6, 4  ;;  %s8214_s23 = sld [smem:[#allocation62_spill]]  ;;  %s653_s1 = int_to_ptr.vmem [resolvable:$true] %s652_s1 }
 0x1f3   : > { %s7092_s14 = scalar_lea.hbm %s8213_s27, %s6649_s18 }
 0x1f4   : > { %s8215_s16 = smov %s8214_s23  ;;  %s6241_s25 = scalar_lea.hbm %s8214_s23, 16 }
 0x1f5   : > { %p6242_p8 = scmp.ne.s32.totalorder %s8215_s16, %s6241_s25  ;;  %p6248_p6 = scmp.lt.u32.totalorder %s6241_s25, %s8215_s16 }
 0x1f7   : > { %p6244_p12 = pnand %p6242_p8, %p8202_p4 }
 0x1f9   : > { %p6245_p9 = pneg %p6244_p12 }
 0x1fb   : > { %p6250_p13 = pnand %p6248_p6, %p6245_p9 }
 0x1fd   : > { %6253 = shalt.err (!%p6250_p13)
}
 0x1fe   : > { %s6254_s5 = scalar_lea.vmem %s653_s1, 16  ;;  %s6261_s18 = scalar_lea.vmem %s653_s1, 32 }
 0x1ff   : > { %p6255_p1 = scmp.ne.s32.totalorder %s653_s1, %s6254_s5  ;;  %p6262_p0 = scmp.lt.s32.totalorder %s653_s1, %s653_s1 }
 0x200   : > { %p6263_p2 = scmp.lt.s32.totalorder %s6261_s18, %s6254_s5 }
 0x201   : > { %p6257_p3 = pnand %p6255_p1, %p8202_p4 }
 0x202   : > { %p6264_p5 = por %p6263_p2, %p6262_p0 }
 0x203   : > { %p6258_p11 = pneg %p6257_p3 }
 0x205   : > { %p6265_p7 = pnand %p6264_p5, %p6258_p11 }
 0x207   : > { %6268 = shalt.err (!%p6265_p7)
}
 0x208   : > { %5336 = dma.hbm_to_vmem [thread:$0]  (!%p8211_p10), %s8215_s16, 16, %s653_s1, [#allocation27]  }
 0x209   : > { %s872_s4 = scalar_lea.vmem [#allocation23], %s6646_s28  ;;  %s6269_s7 = scalar_lea.hbm %s7092_s14, 16 }
 0x20a   : > { %s879_s6 = sshll.u32 %s872_s4, 4  ;;  %p6270_p4 = scmp.ne.s32.totalorder %s7092_s14, %s6269_s7  ;;  %s880_s6 = int_to_ptr.vmem [resolvable:$true] %s879_s6 }
 0x20b   : > { %p8216_p8 = scmp.ne.s32.totalorder %s8183_s26, 0  ;;  %s6274_s8 = scalar_lea.hbm %s8213_s27, 32 }
 0x20c   : > { %p6275_p6 = scmp.lt.u32.totalorder %s7092_s14, %s8213_s27  ;;  %p6276_p13 = scmp.lt.u32.totalorder %s6274_s8, %s6269_s7 }
 0x20d   : > { %p6272_p12 = pnand %p6270_p4, %p8216_p8  ;;  %p6278_p3 = scmp.lt.u32.totalorder %s6269_s7, %s7092_s14 }
 0x20e   : > { %p6277_p1 = por %p6276_p13, %p6275_p6 }
 0x20f   : > { %p6273_p9 = pneg %p6272_p12 }
 0x210   : > { %p6279_p10 = por %p6278_p3, %p6277_p1 }
 0x212   : > { %p6280_p11 = pnand %p6279_p10, %p6273_p9 }
 0x214   : > { %6283 = shalt.err (!%p6280_p11)
}
 0x215   : > { %s6284_s28 = scalar_lea.vmem %s880_s6, 16  ;;  %s6427_s1 = smov [#allocation23]  }
 0x216   : > { %p6285_p0 = scmp.ne.s32.totalorder %s880_s6, %s6284_s28  ;;  %s6289_s25 = sshll.u32 %s6427_s1, 4  ;;  %s6290_s25 = int_to_ptr.vmem [resolvable:$false] %s6289_s25 }
 0x217   : > { %s6291_s20 = scalar_lea.vmem %s6290_s25, 32  ;;  %p6292_p7 = scmp.lt.s32.totalorder %s880_s6, %s6290_s25 }
 0x218   : > { %p6287_p2 = pnand %p6285_p0, %p8216_p8  ;;  %p6293_p4 = scmp.lt.s32.totalorder %s6291_s20, %s6284_s28 }
 0x21a   : > { %p6288_p5 = pneg %p6287_p2  ;;  %p6294_p12 = por %p6293_p4, %p6292_p7 }
 0x21c   : > { %p6295_p6 = pnand %p6294_p12, %p6288_p5 }
 0x21e   : > { %6298 = shalt.err (!%p6295_p6)
}
 0x21f   : > { %p8217_p13 = scmp.ne.s32.totalorder %s8181_s0, 0  ;;  %s8218_s24 = sld [smem:[#allocation43_spill]] }
 0x221   : > { %5373 = dma.hbm_to_vmem [thread:$0]  (!%p8217_p13), %s7092_s14, 16, %s880_s6, %s6673_s19  }
 0x225   : > { %p8219_p9 = scmp.ne.s32.totalorder %s8218_s24, 0 }
 0x226   : > { %s8220_s26 = sld [smem:[#allocation41_spill]] (!%p8219_p9) }
 0x227   : > { %888 = sbr.rel (%p8219_p9) target bundleno = 5743 (0x166f), region = 100 }
 0x22c   : > { %p8221_p8 = scmp.eq.s32.totalorder (!%p8219_p9), %s8220_s26, 0 }
 0x22e   : > { %6350 = dma.done.wait (%p8221_p8), [#allocation5], 1024   ;;  %p8222_p1 = pmov %p8221_p8 }
 0x230   : > { %6352 = vsyncadd (%p8222_p1), [#allocation5], 4294966272  ;;  %p8223_p3 = pmov %p8222_p1 }
 0x231   : > { %p8224_p10 = pmov %p8222_p1 }
 0x232   : > { %6354 = dma.done.wait (%p8223_p3), [#allocation8], 80  }
 0x233   : > { %6356 = vsyncadd (%p8224_p10), [#allocation8], 4294967216  ;;  %p8225_p11 = pmov %p8222_p1 }
 0x234   : > { %p8226_p0 = pmov %p8222_p1 }
 0x235   : > { %6358 = dma.done.wait (%p8225_p11), [#allocation11], 256  }
 0x236   : > { %6360 = vsyncadd (%p8226_p0), [#allocation11], 4294967040  ;;  %s8227_s0 = sld [smem:[#allocation37_spill]]  ;;  %s8228_s19 = sld [smem:[#allocation42_spill]] }
 0x237   : > { %s906_s14 = sand.u32 1, %s8220_s26  }
 0x238   : > { %s907_s18 = scalar_lea.sflag [#allocation5], %s906_s14 }
 0x23c   : > { %s7147_s5 = sand.u32 1, %s8227_s0   ;;  %p8229_p2 = scmp.ne.s32.totalorder %s8228_s19, 0 }
 0x23d   : > { %s909_s10 = scalar_lea.vmem [#allocation12], %s7147_s5 }
 0x23e   : > { %6362 = dma.done.wait (%p8229_p2), %s907_s18, 1920  }
 0x23f   : > { %6364 = vsyncadd (%p8229_p2), %s907_s18, 4294965376  ;;  %s7155_s11 = sshll.u32 %s7147_s5, 4  ;;  %s4805_s4 = sshll.u32 %s7147_s5, 6 }
 0x240   : > { %s917_s6 = scalar_lea.vmem [#allocation13], %s7147_s5  ;;  %s926_s7 = scalar_lea.vmem [#allocation14], %s7155_s11 }
 0x241   : > { %s934_s9 = scalar_lea.vmem [#allocation15], %s7147_s5  ;;  %s943_s30 = scalar_lea.vmem [#allocation16], %s7155_s11 }
 0x242   : > { %s951_s8 = scalar_lea.vmem [#allocation17], %s7147_s5  ;;  %s959_s2 = scalar_lea.vmem [#allocation18], %s7147_s5 }
 0x243   : > { %s967_s23 = scalar_lea.vmem [#allocation19], %s7147_s5  ;;  %s976_s28 = scalar_lea.vmem [#allocation20], %s7155_s11 }
 0x244   : > { %s984_s1 = scalar_lea.vmem [#allocation21], %s7147_s5  ;;  %s7167_s25 = scalar_lea.vmem [#allocation22], %s4805_s4 }
 0x245   : > { %s1001_s20 = scalar_lea.vmem [#allocation23], %s7147_s5  ;;  %p8230_p5 = pmov %p8226_p0 }
 0x246   : > { %p8231_p7 = pmov %p8226_p0 }
 0x247   : > { %6366 = dma.done.wait (%p8230_p5), [#allocation8], 16  }
 0x248   : > { %6368 = vsyncadd (%p8231_p7), [#allocation8], 4294967280  ;;  %p8232_p4 = pmov %p8226_p0 }
 0x249   : > { %p8233_p12 = pmov %p8226_p0 }
 0x24a   : > { %6370 = dma.done.wait (%p8232_p4), [#allocation11], 16  }
 0x24b   : > { %6372 = vsyncadd (%p8233_p12), [#allocation11], 4294967280  ;;  %p8234_p6 = pmov %p8226_p0 }
 0x24c   : > { %p8235_p13 = pmov %p8226_p0 }
 0x24d   : > { %6374 = dma.done.wait (%p8234_p6), [#allocation27], 16  }
 0x24e   : > { %6376 = vsyncadd (%p8235_p13), [#allocation27], 4294967280  ;;  %s8236_s24 = sld [smem:[#allocation39_spill]] }
 0x254   : > { %p4809_p9 = scmp.ne.s32.totalorder %s8236_s24, 0 }
 0x255   : > { %v1130_v1 = vld [vmem:[#allocation7] sm:$0xf] (!%p4809_p9)  ;;  %vm1151_vm0 = vcmask (!%p4809_p9), 1043456   ;;  %v1119_v3 = vld [vmem:[#allocation4 + $0x8] sm:$0xff] (!%p4809_p9)  ;;  %vm1138_vm1 = vcmask (!%p4809_p9), 64512   ;;  %v1120_v8 = vld [vmem:[#allocation4 + $0x10] sm:$0xff] (!%p4809_p9) }
 0x256   : > { %1117 = sbr.rel (%p4809_p9) target bundleno = 823 (0x337), region = 180  ;;  %v1118_v2 = vld [vmem:[#allocation4] sm:$0xff] (!%p4809_p9)  ;;  %5257 = vmatprep.subr.msk.bf16.mxu0 (!%p4809_p9), %vm1151_vm0, %v1130_v1  ;;  %5258 = vmatprep.subr.msk.bf16.mxu1 (!%p4809_p9), %vm1151_vm0, %v1130_v1  ;;  %v1153_v4 = vsel (!%p4809_p9), %vm1151_vm0, %v1130_v1, 0  ;;  %v1123_v7 = vld [vmem:[#allocation4 + $0x28] sm:$0xff] (!%p4809_p9)  ;;  %v1121_v10 = vld [vmem:[#allocation4 + $0x18] sm:$0xff] (!%p4809_p9)  ;;  %vm1230_vm2 = vcmask (!%p4809_p9), 261120  }
 0x257   : > { %v1126_v5 = vpack.c.bf16 (!%p4809_p9), %v1119_v3, %v1118_v2  ;;  %v1122_v6 = vld [vmem:[#allocation4 + $0x20] sm:$0xff] (!%p4809_p9)  ;;  %4994 = vmatpush3.bf16.msra.mxu0 (!%p4809_p9), %v1153_v4  ;;  %5256 = vmatpush3.bf16.msra.mxu1 (!%p4809_p9), %v1153_v4  ;;  %v1124_v11 = vld [vmem:[#allocation4 + $0x30] sm:$0xff] (!%p4809_p9)  ;;  %v1125_v12 = vld [vmem:[#allocation4 + $0x38] sm:$0xff] (!%p4809_p9)  ;;  %v1127_v13 = vpack.c.bf16 (!%p4809_p9), %v1121_v10, %v1120_v8 }
 0x258   : > { %v1128_v9 = vpack.c.bf16 (!%p4809_p9), %v1123_v7, %v1122_v6  ;;  %v1129_v14 = vpack.c.bf16 (!%p4809_p9), %v1125_v12, %v1124_v11  ;;  %v4810_v15 = vld [vmem:[#allocation9] ss:$0 sm:$0xff] (!%p4809_p9)  ;;  %v1220_v17 = vld [vmem:[#allocation10] sm:$0xff] (!%p4809_p9)  ;;  %v1221_v26 = vld [vmem:[#allocation10 + $0x8] sm:$0xff] (!%p4809_p9) }
 0x259   : > { %4995 = vmatprep.mubr.msk.bf16.mxu0 (!%p4809_p9), %vm1138_vm1, %v1126_v5 }
 0x25a   : > { %4999 = vmatprep.mubr.msk.bf16.mxu1 (!%p4809_p9), %vm1138_vm1, %v1128_v9  ;;  %4996 = vmatmul.mubr.msk.bf16.vlgmr.msra.gmra.mrb[0].mxu0 (!%p4809_p9), %vm1138_vm1, %v1127_v13 }
 0x25b   : > { %5000 = vmatmul.mubr.msk.bf16.vlgmr.msra.gmra.mrb[0].mxu1 (!%p4809_p9), %vm1138_vm1, %v1129_v14 }
 0x32d   : > { %v4997_v16 = vpop.f32.mrb[0].mxu0 }
 0x32e   : > { %v5001_v18 = vpop.f32.mrb[0].mxu1  ;;  %v1198_v19 = vadd.f32 %v4997_v16, %v4810_v15  ;;  %v1189_v21 = vpop.f32.mrb[1].mxu0 }
 0x32f   : > { %v1214_v20 = vadd.f32 %v5001_v18, %v4810_v15  ;;  %v1205_v22 = vpop.f32.mrb[1].mxu1  ;;  %v1190_v23 = vadd.f32 %v4810_v15, %v1189_v21  ;;  %v4998_v25 = vpop.f32.mrb[2].mxu0 }
 0x330   : > { %v1206_v24 = vadd.f32 %v4810_v15, %v1205_v22  ;;  %v5002_v27 = vpop.f32.mrb[2].mxu1  ;;  %v1224_v28 = vadd.f32 %v1220_v17, %v1198_v19  ;;  %v1201_v30 = vadd.f32 %v4998_v25, %v4810_v15  ;;  %v1192_v32 = vpop.f32.mrb[3].mxu0 }
 0x331   : > { %v1228_v29 = vadd.f32 %v1220_v17, %v1214_v20  ;;  %v1217_v31 = vadd.f32 %v5002_v27, %v4810_v15  ;;  %v1208_v33 = vpop.f32.mrb[3].mxu1  ;;  %v1222_v34 = vadd.f32 %v1220_v17, %v1190_v23  ;;  %v1193_v36 = vadd.f32 %v4810_v15, %v1192_v32 }
 0x332   : > { %v1226_v35 = vadd.f32 %v1220_v17, %v1206_v24  ;;  %v1209_v37 = vadd.f32 %v4810_v15, %v1208_v33  ;;  %1233 = vst.msk [vmem:[#allocation2 + $0x10] sm:$0xff] %vm1230_vm2, %v1224_v28  ;;  %v1225_v38 = vadd.f32 %v1221_v26, %v1201_v30 }
 0x333   : > { %1237 = vst.msk [vmem:[#allocation2 + $0x30] sm:$0xff] %vm1230_vm2, %v1228_v29  ;;  %v1229_v39 = vadd.f32 %v1221_v26, %v1217_v31  ;;  %1231 = vst.msk [vmem:[#allocation2] sm:$0xff] %vm1230_vm2, %v1222_v34  ;;  %v1223_v40 = vadd.f32 %v1221_v26, %v1193_v36 }
 0x334   : > { %1235 = vst.msk [vmem:[#allocation2 + $0x20] sm:$0xff] %vm1230_vm2, %v1226_v35  ;;  %v1227_v41 = vadd.f32 %v1221_v26, %v1209_v37  ;;  %1234 = vst.msk [vmem:[#allocation2 + $0x18] sm:$0xff] %vm1230_vm2, %v1225_v38 }
 0x335   : > { %1238 = vst.msk [vmem:[#allocation2 + $0x38] sm:$0xff] %vm1230_vm2, %v1229_v39  ;;  %1232 = vst.msk [vmem:[#allocation2 + $0x8] sm:$0xff] %vm1230_vm2, %v1223_v40 }
 0x336   : > { %1236 = vst.msk [vmem:[#allocation2 + $0x28] sm:$0xff] %vm1230_vm2, %v1227_v41 }
 0x337 PF: > { %vm1256_vm3 = vcmask 261120   ;;  %v5528_v34 = vld [vmem:[%s926_s7] sm:$0xff]   ;;  %v5529_v35 = vld [vmem:[%s926_s7 + $0x8] sm:$0xff]   ;;  %vm6429_vm4 = vmmov 0   ;;  %s6430_s26 = smov 96   ;;  %vm1513_vm5 = vcmask 64512  }
 0x338   : > { %5003 = vmatprep.subr.bf16.mxu1 %v5528_v34  ;;  %vm1723_vm7 = vcmask 130048   ;;  %s6431_s0 = smov 64   ;;  %s6432_s19 = smov 88   ;;  %vm3596_vm9 = vcmask 195584  }
 0x339   : > { %v1241_v43 = vld [vmem:[#allocation2 + $0x10] sm:$0xff]  ;;  %5004 = vmatpush3.bf16.msra.mxu1 %v5528_v34  ;;  %s6433_s14 = smov 120   ;;  %s6434_s18 = smov 56  }
 0x33a   : > { %v1239_v42 = vld [vmem:[#allocation2] sm:$0xff]  ;;  %v1263_v46 = vsel %vm1256_vm3, %v1241_v43, 0.0  ;;  %v1245_v54 = vld [vmem:[#allocation2 + $0x30] sm:$0xff]  ;;  %5005 = vmatprep.subr.bf16.mxu1 %v5529_v35  ;;  %s6436_s4 = smov 112   ;;  %s6438_s7 = smov 72  }
 0x33b   : > { %v1257_v45 = vsel %vm1256_vm3, %v1239_v42, 0.0  ;;  %v1242_v47 = vld [vmem:[#allocation2 + $0x18] sm:$0xff]  ;;  %v1243_v48 = vld [vmem:[#allocation2 + $0x20] sm:$0xff]  ;;  %1264 = vadd.xlane.f32.xlu1 %v1263_v46  ;;  %v1275_v56 = vsel %vm1256_vm3, %v1245_v54, 0.0  ;;  %s6440_s24 = smov 40   ;;  %s8241_s5 = sld [smem:[#allocation39_spill]] }
 0x33c   : > { %v1240_v44 = vld [vmem:[#allocation2 + $0x8] sm:$0xff]  ;;  %1258 = vadd.xlane.f32.xlu0 %v1257_v45  ;;  %v1266_v51 = vsel %vm1256_vm3, %v1242_v47, 0.0  ;;  %v1269_v52 = vsel %vm1256_vm3, %v1243_v48, 0.0  ;;  %v1246_v55 = vld [vmem:[#allocation2 + $0x38] sm:$0xff] }
 0x33d   : > { %v1244_v49 = vld [vmem:[#allocation2 + $0x28] sm:$0xff]  ;;  %v1260_v50 = vsel %vm1256_vm3, %v1240_v44, 0.0  ;;  %v1278_v57 = vsel %vm1256_vm3, %v1246_v55, 0.0  ;;  %5006 = vmatpush3.bf16.msra.mxu1 %v5529_v35 }
 0x33e   : > { %v1272_v53 = vsel %vm1256_vm3, %v1244_v49, 0.0 }
 0x33f   : > { %1267 = vadd.xlane.f32.xlu1 %v1266_v51 }
 0x340   : > { %1261 = vadd.xlane.f32.xlu0 %v1260_v50 }
 0x341   : > { %p4881_p8 = scmp.ne.s32.totalorder %s8241_s5, 1 }
 0x342   : > { %vm4395_vm10 = vcmask (!%p4881_p8), 130112   ;;  %vm4424_vm11 = vcmask (!%p4881_p8), 1041409   ;;  %vm4426_vm12 = vcmask (!%p4881_p8), 1042434   ;;  %vm4428_vm13 = vcmask (!%p4881_p8), 1043459  }
 0x343   : > { %1273 = vadd.xlane.f32.xlu1 %v1272_v53  ;;  %vm4431_vm14 = vcmask (!%p4881_p8), 125952  }
 0x344   : > { %1270 = vadd.xlane.f32.xlu0 %v1269_v52 }
 0x347   : > { %1279 = vadd.xlane.f32.xlu1 %v1278_v57 }
 0x348   : > { %1276 = vadd.xlane.f32.xlu0 %v1275_v56 }
 0x3c8   : > { %v1265_v59 = vpop.xlane.xlu1 %1264 }
 0x3c9   : > { %v1259_v58 = vpop.xlane.xlu0 %1258  ;;  %v1284_v61 = vmul.f32 0.03125, %v1265_v59 }
 0x3ca   : > { %v1282_v60 = vmul.f32 0.03125, %v1259_v58 }
 0x3cb   : > { %v7205_v63 = vsub.f32 %v1241_v43, %v1284_v61  ;;  %v4815_v61 = vld [vmem:[%s909_s10] ss:$0 sm:$0xff]  ;;  %s6435_s10 = smov 80  }
 0x3cc   : > { %v7203_v62 = vsub.f32 %v1239_v42, %v1282_v60  ;;  %v1268_v1 = vpop.xlane.xlu1 %1267 }
 0x3cd   : > { %v1262_v0 = vpop.xlane.xlu0 %1261  ;;  %v1285_v3 = vmul.f32 0.03125, %v1268_v1  ;;  %v1300_v5 = vmul.f32 %v7205_v63, %v7205_v63 }
 0x3ce   : > { %v1283_v2 = vmul.f32 0.03125, %v1262_v0  ;;  %v1298_v4 = vmul.f32 %v7203_v62, %v7203_v62 }
 0x3cf   : > { %v7213_v7 = vsub.f32 %v1242_v47, %v1285_v3  ;;  %v1312_v11 = vsel %vm1256_vm3, %v1300_v5, 0.0  ;;  %v4816_v5 = vld [vmem:[%s917_s6] ss:$0 sm:$0xff]  ;;  %s6437_s6 = smov 48  }
 0x3d0   : > { %v7211_v6 = vsub.f32 %v1240_v44, %v1283_v2  ;;  %v1306_v8 = vsel %vm1256_vm3, %v1298_v4, 0.0  ;;  %v1274_v10 = vpop.xlane.xlu1 %1273 }
 0x3d1   : > { %1307 = vadd.xlane.f32.xlu0 %v1306_v8  ;;  %v1271_v9 = vpop.xlane.xlu0 %1270  ;;  %v1287_v13 = vmul.f32 0.03125, %v1274_v10  ;;  %v1301_v15 = vmul.f32 %v7213_v7, %v7213_v7 }
 0x3d2   : > { %v1286_v12 = vmul.f32 0.03125, %v1271_v9  ;;  %v1299_v14 = vmul.f32 %v7211_v6, %v7211_v6 }
 0x3d3   : > { %v7223_v17 = vsub.f32 %v1244_v49, %v1287_v13  ;;  %v1315_v21 = vsel %vm1256_vm3, %v1301_v15, 0.0 }
 0x3d4   : > { %v7221_v16 = vsub.f32 %v1243_v48, %v1286_v12  ;;  %v1309_v18 = vsel %vm1256_vm3, %v1299_v14, 0.0  ;;  %v1280_v20 = vpop.xlane.xlu1 %1279 }
 0x3d5   : > { %1313 = vadd.xlane.f32.xlu0 %v1312_v11  ;;  %1310 = vadd.xlane.f32.xlu1 %v1309_v18  ;;  %v1277_v19 = vpop.xlane.xlu0 %1276  ;;  %v1289_v23 = vmul.f32 0.03125, %v1280_v20  ;;  %v1303_v25 = vmul.f32 %v7223_v17, %v7223_v17 }
 0x3d6   : > { %v1288_v22 = vmul.f32 0.03125, %v1277_v19  ;;  %v1302_v24 = vmul.f32 %v7221_v16, %v7221_v16 }
 0x3d7   : > { %v7233_v27 = vsub.f32 %v1246_v55, %v1289_v23  ;;  %v1321_v29 = vsel %vm1256_vm3, %v1303_v25, 0.0 }
 0x3d8   : > { %v7231_v26 = vsub.f32 %v1245_v54, %v1288_v22  ;;  %v1318_v28 = vsel %vm1256_vm3, %v1302_v24, 0.0 }
 0x3d9   : > { %1316 = vadd.xlane.f32.xlu1 %v1315_v21  ;;  %1319 = vadd.xlane.f32.xlu0 %v1318_v28  ;;  %v1305_v31 = vmul.f32 %v7233_v27, %v7233_v27 }
 0x3da   : > { %v1304_v30 = vmul.f32 %v7231_v26, %v7231_v26 }
 0x3db   : > { %v1327_v33 = vsel %vm1256_vm3, %v1305_v31, 0.0 }
 0x3dc   : > { %v1324_v32 = vsel %vm1256_vm3, %v1304_v30, 0.0 }
 0x3dd   : > { %1322 = vadd.xlane.f32.xlu1 %v1321_v29  ;;  %1325 = vadd.xlane.f32.xlu0 %v1324_v32 }
 0x3e1   : > { %1328 = vadd.xlane.f32.xlu1 %v1327_v33 }
 0x45e   : > { %v1308_v36 = vpop.xlane.xlu0 %1307 }
 0x45f   : > { %v1330_v37 = vmul.f32 0.03125, %v1308_v36 }
 0x461   : > { %v1338_v38 = vadd.f32 1e-05, %v1330_v37 }
 0x462   : > { %v1311_v39 = vpop.xlane.xlu1 %1310  ;;  %v1314_v40 = vpop.xlane.xlu0 %1313 }
 0x463   : > { %5542 = vrsqrt.f32 %v1338_v38  ;;  %v1331_v41 = vmul.f32 0.03125, %v1311_v39  ;;  %v1332_v42 = vmul.f32 0.03125, %v1314_v40 }
 0x465   : > { %v1339_v43 = vadd.f32 1e-05, %v1331_v41  ;;  %v1340_v44 = vadd.f32 1e-05, %v1332_v42 }
 0x466   : > { %v1317_v45 = vpop.xlane.xlu1 %1316  ;;  %v1320_v46 = vpop.xlane.xlu0 %1319 }
 0x467   : > { %5544 = vrsqrt.f32 %v1339_v43  ;;  %v1333_v47 = vmul.f32 0.03125, %v1317_v45  ;;  %v1334_v48 = vmul.f32 0.03125, %v1320_v46 }
 0x468   : > { %5546 = vrsqrt.f32 %v1340_v44 }
 0x469   : > { %v1341_v49 = vadd.f32 1e-05, %v1333_v47  ;;  %v1342_v50 = vadd.f32 1e-05, %v1334_v48 }
 0x46a   : > { %v1323_v51 = vpop.xlane.xlu1 %1322  ;;  %v1326_v52 = vpop.xlane.xlu0 %1325 }
 0x46b   : > { %5548 = vrsqrt.f32 %v1341_v49  ;;  %v1335_v53 = vmul.f32 0.03125, %v1323_v51  ;;  %v1336_v54 = vmul.f32 0.03125, %v1326_v52 }
 0x46c   : > { %5550 = vrsqrt.f32 %v1342_v50 }
 0x46d   : > { %v5543_v55 = vpop.eup %5542  ;;  %v1343_v56 = vadd.f32 1e-05, %v1335_v53  ;;  %v1344_v57 = vadd.f32 1e-05, %v1336_v54 }
 0x46e   : > { %v1329_v58 = vpop.xlane.xlu1 %1328  ;;  %v1354_v59 = vmul.f32 %v5543_v55, %v7203_v62 }
 0x46f   : > { %5552 = vrsqrt.f32 %v1343_v56  ;;  %v1337_v60 = vmul.f32 0.03125, %v1329_v58 }
 0x470   : > { %5554 = vrsqrt.f32 %v1344_v57  ;;  %v1368_v4 = vmul.f32 %v4815_v61, %v1354_v59 }
 0x471   : > { %v5545_v0 = vpop.eup %5544  ;;  %v1345_v1 = vadd.f32 1e-05, %v1337_v60 }
 0x472   : > { %v5547_v2 = vpop.eup %5546  ;;  %v1355_v3 = vmul.f32 %v5545_v0, %v7211_v6  ;;  %v1382_v62 = vadd.f32 %v4816_v5, %v1368_v4 }
 0x473   : > { %5556 = vrsqrt.f32 %v1345_v1  ;;  %v1356_v8 = vmul.f32 %v5547_v2, %v7205_v63 }
 0x474   : > { %v1369_v9 = vmul.f32 %v4815_v61, %v1355_v3 }
 0x475   : > { %v5549_v10 = vpop.eup %5548  ;;  %v1370_v14 = vmul.f32 %v4815_v61, %v1356_v8 }
 0x476   : > { %v5551_v11 = vpop.eup %5550  ;;  %v1383_v12 = vadd.f32 %v4816_v5, %v1369_v9  ;;  %v1357_v13 = vmul.f32 %v5549_v10, %v7213_v7 }
 0x477   : > { %v1358_v15 = vmul.f32 %v5551_v11, %v7221_v16  ;;  %v1384_v21 = vadd.f32 %v4816_v5, %v1370_v14 }
 0x478   : > { %v1390_v18 = vpack.c.bf16 %v1383_v12, %v1382_v62  ;;  %v1371_v19 = vmul.f32 %v4815_v61, %v1357_v13 }
 0x479   : > { %v5553_v20 = vpop.eup %5552  ;;  %v1372_v23 = vmul.f32 %v4815_v61, %v1358_v15  ;;  %v1247_v15 = vlaneseq }
 0x47a   : > { %v5555_v6 = vpop.eup %5554  ;;  %5007 = vmatprep.mubr.msk.bf16.mxu1 %vm1256_vm3, %v1390_v18  ;;  %v1385_v22 = vadd.f32 %v4816_v5, %v1371_v19  ;;  %v1359_v63 = vmul.f32 %v5553_v20, %v7223_v17 }
 0x47b   : > { %v1360_v24 = vmul.f32 %v5555_v6, %v7231_v26  ;;  %v1386_v7 = vadd.f32 %v4816_v5, %v1372_v23  ;;  %v6428_v26 = vmov 0.0   ;;  %v7315_v18 = vshrl.u32 %v1247_v15, 7 }
 0x47c   : > { %v1391_v25 = vpack.c.bf16 %v1385_v22, %v1384_v21  ;;  %v1373_v28 = vmul.f32 %v4815_v61, %v1359_v63  ;;  %5015 = vmatprep.subr.bf16.mxu1 %v6428_v26  ;;  %5027 = vmatprep.subr.bf16.mxu0 %v6428_v26  ;;  %v7317_v19 = vand.u32 127, %v1247_v15 }
 0x47d   : > { %v5557_v29 = vpop.eup %5556  ;;  %v1374_v31 = vmul.f32 %v4815_v61, %v1360_v24  ;;  %5029 = vmatprep.mubr.msk.bf16.mxu0 %vm6429_vm4, %v6428_v26  ;;  %v1249_v20 = vadd.s32 8, %v7315_v18 }
 0x47e   : > { %5008 = vmatmul.mubr.msk.bf16.vlgmr.msra.gmra.mrb[0].mxu1 %vm1256_vm3, %v1391_v25  ;;  %v1387_v16 = vadd.f32 %v4816_v5, %v1373_v28  ;;  %v1361_v30 = vmul.f32 %v5557_v29, %v7233_v27  ;;  %v4817_v27 = vld [vmem:[%s934_s9] ss:$0 sm:$0xff]  ;;  %vm7322_vm6 = vcmp.le.s32.totalorder %v7317_v19, %v7315_v18  ;;  %s6439_s9 = smov 104  }
 0x47f   : > { %v1388_v34 = vadd.f32 %v4816_v5, %v1374_v31  ;;  %vm7327_vm8 = vcmp.le.s32.totalorder %v7317_v19, %v1249_v20 }
 0x480   : > { %v1392_v32 = vpack.c.bf16 %v1387_v16, %v1386_v7  ;;  %v1375_v33 = vmul.f32 %v4815_v61, %v1361_v30 }
 0x482   : > { %5011 = vmatprep.mubr.msk.bf16.mxu1 %vm1256_vm3, %v1392_v32  ;;  %v1389_v17 = vadd.f32 %v4816_v5, %v1375_v33 }
 0x484   : > { %v1393_v35 = vpack.c.bf16 %v1389_v17, %v1388_v34 }
 0x486   : > { %5012 = vmatmul.mubr.msk.bf16.gmra.mrb[4].mxu1 %vm1256_vm3, %v1393_v35 }
 0x487   : > { %5017 = vmatprep.mubr.msk.bf16.mxu1 %vm6429_vm4, %v6428_v26 }
 0x551   : > { %v5009_v36 = vpop.f32.mrb[0].mxu1 }
 0x552   : > { %v1472_v37 = vadd.f32 %v5009_v36, %v4817_v27  ;;  %v1463_v38 = vpop.f32.mrb[1].mxu1 }
 0x553   : > { %v1464_v39 = vadd.f32 %v4817_v27, %v1463_v38  ;;  %v5010_v40 = vpop.f32.mrb[2].mxu1 }
 0x554   : > { %v1475_v41 = vadd.f32 %v5010_v40, %v4817_v27  ;;  %v1466_v42 = vpop.f32.mrb[3].mxu1  ;;  %v1496_v44 = vmul.f32 0.35355338, %v1472_v37 }
 0x555   : > { %v1467_v43 = vadd.f32 %v4817_v27, %v1466_v42  ;;  %v1494_v47 = vmul.f32 0.35355338, %v1464_v39 }
 0x556   : > { %v1497_v45 = vmul.f32 0.35355338, %v1475_v41  ;;  %v7271_v46 = vpack.c.bf16 %v1475_v41, %v1472_v37 }
 0x557   : > { %v1495_v48 = vmul.f32 0.35355338, %v1467_v43  ;;  %v7273_v49 = vpack.c.bf16 %v1467_v43, %v1464_v39 }
 0x558   : > { %v7275_v50 = vpack.c.bf16 %v1497_v45, %v1496_v44  ;;  %1562 = vrot.lane.b32.xlu1 %v7271_v46, %s6430_s26 }
 0x559   : > { %v7278_v51 = vpack.c.bf16 %v1495_v48, %v1494_v47  ;;  %1511 = vrot.lane.b32.xlu0 %v7273_v49, %s6430_s26  ;;  %v5013_v52 = vpop.f32.mrb[4].mxu1 }
 0x55a   : > { %v1488_v53 = vadd.f32 %v5013_v52, %v4817_v27  ;;  %v1479_v54 = vpop.f32.mrb[5].mxu1 }
 0x55b   : > { %v1480_v55 = vadd.f32 %v4817_v27, %v1479_v54  ;;  %v5014_v56 = vpop.f32.mrb[6].mxu1 }
 0x55c   : > { %v1491_v57 = vadd.f32 %v5014_v56, %v4817_v27  ;;  %v1482_v58 = vpop.f32.mrb[7].mxu1  ;;  %v1500_v60 = vmul.f32 0.35355338, %v1488_v53 }
 0x55d   : > { %v1483_v59 = vadd.f32 %v4817_v27, %v1482_v58  ;;  %v1498_v1 = vmul.f32 0.35355338, %v1480_v55 }
 0x55e   : > { %v1501_v61 = vmul.f32 0.35355338, %v1491_v57  ;;  %v7281_v0 = vpack.c.bf16 %v1491_v57, %v1488_v53 }
 0x55f   : > { %v1499_v2 = vmul.f32 0.35355338, %v1483_v59  ;;  %v7283_v3 = vpack.c.bf16 %v1483_v59, %v1480_v55 }
 0x560   : > { %v7285_v4 = vpack.c.bf16 %v1501_v61, %v1500_v60 }
 0x561   : > { %v7287_v5 = vpack.c.bf16 %v1499_v2, %v1498_v1  ;;  %1612 = vrot.lane.b32.xlu1 %v7283_v3, %s6430_s26 }
 0x565   : > { %1662 = vrot.lane.b32.xlu1 %v7281_v0, %s6430_s26  ;;  %s6441_s26 = smov 8  }
 0x5ca   : > { %v1563_v10 = vpop.permute.xlu1 %1562 }
 0x5cb   : > { %v1512_v8 = vpop.permute.xlu0 %1511  ;;  %v1568_v62 = vsel %vm1513_vm5, %v1563_v10, 0 }
 0x5cc   : > { %v1518_v9 = vsel %vm1513_vm5, %v1512_v8, 0 }
 0x5cd   : > { %5016 = vmatpush3.bf16.xpose.msra.mxu1 %v1518_v9 }
 0x5ce   : > { %5021 = vmatprep.subr.bf16.mxu1 %v6428_v26 }
 0x5d3   : > { %v1613_v11 = vpop.permute.xlu1 %1612 }
 0x5d4   : > { %5018 = vmatmul.mubr.msk.bf16.vlgmr.msra.gmra.mrb[8].mxu1 %vm1513_vm5, %v7278_v51  ;;  %v1618_v12 = vsel %vm1513_vm5, %v1613_v11, 0 }
 0x5d5   : > { %5022 = vmatpush3.bf16.xpose.msra.mxu1 %v1568_v62  ;;  %5028 = vmatpush3.bf16.xpose.msra.mxu0 %v1618_v12 }
 0x5d6   : > { %5023 = vmatprep.mubr.msk.bf16.mxu1 %vm6429_vm4, %v6428_v26  ;;  %5033 = vmatprep.subr.bf16.mxu1 %v6428_v26 }
 0x5d7   : > { %5039 = vmatprep.subr.bf16.mxu0 %v6428_v26  ;;  %v1663_v13 = vpop.permute.xlu1 %1662 }
 0x5d8   : > { %v1668_v14 = vsel %vm1513_vm5, %v1663_v13, 0 }
 0x5dc   : > { %5024 = vmatmul.mubr.msk.bf16.vlgmr.msra.gmra.mrb[12].mxu1 %vm1513_vm5, %v7275_v50  ;;  %5030 = vmatmul.mubr.msk.bf16.vlgmr.msra.gmra.mrb[0].mxu0 %vm1513_vm5, %v7287_v5 }
 0x5dd   : > { %5034 = vmatpush3.bf16.xpose.msra.mxu1 %v1668_v14  ;;  %5035 = vmatprep.mubr.msk.bf16.mxu1 %vm6429_vm4, %v6428_v26 }
 0x5de   : > { %5045 = vmatprep.subr.bf16.mxu1 %v6428_v26  ;;  %5041 = vmatprep.mubr.msk.bf16.mxu0 %vm6429_vm4, %v6428_v26 }
 0x5e4   : > { %5036 = vmatmul.mubr.msk.bf16.vlgmr.msra.gmra.mrb[16].mxu1 %vm1513_vm5, %v7285_v4 }
 0x5e5   : > { %5047 = vmatprep.mubr.msk.bf16.mxu1 %vm6429_vm4, %v6428_v26 }
 0x6a7   : > { %v1554_v21 = vpop.f32.mrb[8].mxu1 }
 0x6a8   : > { %v1715_v63 = vsel %vm7322_vm6, %v1554_v21, -1e+30  ;;  %v5019_v23 = vpop.f32.mrb[9].mxu1 }
 0x6a9   : > { %v1557_v24 = vpop.f32.mrb[10].mxu1  ;;  %v1724_v25 = vsel %vm1723_vm7, %v1715_v63, -inf }
 0x6aa   : > { %v1716_v28 = vsel %vm7327_vm8, %v1557_v24, -1e+30  ;;  %1725 = vmax.xlane.f32.xlu0 %v1724_v25  ;;  %v5020_v29 = vpop.f32.mrb[11].mxu1 }
 0x6ab   : > { %v1727_v7 = vsel %vm1723_vm7, %v1716_v28, -inf }
 0x6ac   : > { %1728 = vmax.xlane.f32.xlu1 %v1727_v7 }
 0x6af   : > { %v1604_v16 = vpop.f32.mrb[12].mxu1  ;;  %v1654_v30 = vpop.f32.mrb[0].mxu0 }
 0x6b0   : > { %v1717_v31 = vsel %vm7322_vm6, %v1604_v16, -1e+30  ;;  %v5025_v32 = vpop.f32.mrb[13].mxu1  ;;  %v5031_v33 = vpop.f32.mrb[1].mxu0  ;;  %v1719_v41 = vsel %vm7322_vm6, %v1654_v30, -1e+30 }
 0x6b1   : > { %v1607_v34 = vpop.f32.mrb[14].mxu1  ;;  %v1657_v17 = vpop.f32.mrb[2].mxu0  ;;  %v1730_v35 = vsel %vm1723_vm7, %v1717_v31, -inf  ;;  %v1736_v45 = vsel %vm1723_vm7, %v1719_v41, -inf }
 0x6b2   : > { %v1718_v27 = vsel %vm7327_vm8, %v1607_v34, -1e+30  ;;  %v1720_v36 = vsel %vm7327_vm8, %v1657_v17, -1e+30  ;;  %v5032_v37 = vpop.f32.mrb[3].mxu0  ;;  %1731 = vmax.xlane.f32.xlu0 %v1730_v35  ;;  %v5026_v38 = vpop.f32.mrb[15].mxu1 }
 0x6b3   : > { %v1739_v39 = vsel %vm1723_vm7, %v1720_v36, -inf  ;;  %v1733_v40 = vsel %vm1723_vm7, %v1718_v27, -inf }
 0x6b4   : > { %1740 = vmax.xlane.f32.xlu1 %v1739_v39 }
 0x6b6   : > { %1734 = vmax.xlane.f32.xlu0 %v1733_v40 }
 0x6b7   : > { %v1704_v42 = vpop.f32.mrb[16].mxu1 }
 0x6b8   : > { %v5037_v43 = vpop.f32.mrb[17].mxu1  ;;  %v1721_v47 = vsel %vm7322_vm6, %v1704_v42, -1e+30 }
 0x6b9   : > { %v1707_v44 = vpop.f32.mrb[18].mxu1  ;;  %v1742_v52 = vsel %vm1723_vm7, %v1721_v47, -inf }
 0x6ba   : > { %1737 = vmax.xlane.f32.xlu0 %v1736_v45  ;;  %v5038_v48 = vpop.f32.mrb[19].mxu1  ;;  %v7357_v53 = vsel %vm7327_vm8, %v1707_v44, -1e+30 }
 0x6bb   : > { %v1745_v54 = vsel %vm1723_vm7, %v7357_v53, -inf }
 0x6be   : > { %1743 = vmax.xlane.f32.xlu0 %v1742_v52 }
 0x6c5   : > { %1863 = vrot.lane.b32.xlu1 %v7271_v46, %s6431_s0 }
 0x6c9   : > { %1910 = vrot.lane.b32.xlu1 %v7283_v3, %s6431_s0 }
 0x6d4   : > { %1816 = vrot.lane.b32.xlu0 %v7273_v49, %s6431_s0 }
 0x6ed   : > { %1746 = vmax.xlane.f32.xlu1 %v1745_v54 }
 0x6fe   : > { %1957 = vrot.lane.b32.xlu1 %v7281_v0, %s6431_s0  ;;  %s6442_s0 = smov 16  }
 0x737   : > { %v1726_v55 = vpop.xlane.xlu0 %1725 }
 0x738   : > { %v1748_v56 = vsub.f32 %v1715_v63, %v1726_v55 }
 0x739   : > { %v1729_v57 = vpop.xlane.xlu1 %1728 }
 0x73a   : > { %v1756_v58 = vmul.f32 1.442695, %v1748_v56  ;;  %v1749_v59 = vsub.f32 %v1716_v28, %v1729_v57 }
 0x73c   : > { %5558 = vpow2.f32 %v1756_v58  ;;  %v1758_v60 = vmul.f32 1.442695, %v1749_v59 }
 0x73e   : > { %5560 = vpow2.f32 %v1758_v60 }
 0x73f   : > { %v1732_v61 = vpop.xlane.xlu0 %1731 }
 0x740   : > { %v1750_v1 = vsub.f32 %v1717_v31, %v1732_v61 }
 0x741   : > { %v1741_v2 = vpop.xlane.xlu1 %1740 }
 0x742   : > { %v1760_v8 = vmul.f32 1.442695, %v1750_v1  ;;  %v1753_v9 = vsub.f32 %v1720_v36, %v1741_v2 }
 0x743   : > { %v1735_v10 = vpop.xlane.xlu0 %1734 }
 0x744   : > { %5562 = vpow2.f32 %v1760_v8  ;;  %v1751_v11 = vsub.f32 %v1718_v27, %v1735_v10  ;;  %v1766_v13 = vmul.f32 1.442695, %v1753_v9 }
 0x745   : > { %v1864_v62 = vpop.permute.xlu1 %1863 }
 0x746   : > { %v7362_v12 = vpop.eup %5558  ;;  %v1762_v14 = vmul.f32 1.442695, %v1751_v11  ;;  %5046 = vmatpush3.bf16.msra.mxu1 %v1864_v62 }
 0x747   : > { %v1738_v15 = vpop.xlane.xlu0 %1737  ;;  %v1772_v20 = vsel %vm1723_vm7, %v7362_v12, 0.0  ;;  %5057 = vmatprep.subr.bf16.mxu1 %v6428_v26 }
 0x748   : > { %v5561_v21 = vpop.eup %5560  ;;  %5564 = vpow2.f32 %v1762_v14  ;;  %v1752_v63 = vsub.f32 %v1719_v41, %v1738_v15  ;;  %1773 = vadd.xlane.f32.xlu0 %v1772_v20 }
 0x749   : > { %v1775_v23 = vsel %vm1723_vm7, %v5561_v21, 0.0  ;;  %5566 = vpow2.f32 %v1766_v13  ;;  %v1911_v37 = vpop.permute.xlu1 %1910 }
 0x74a   : > { %v1764_v24 = vmul.f32 1.442695, %v1752_v63  ;;  %1776 = vadd.xlane.f32.xlu1 %v1775_v23 }
 0x74b   : > { %v1744_v25 = vpop.xlane.xlu0 %1743 }
 0x74c   : > { %5568 = vpow2.f32 %v1764_v24  ;;  %v1754_v28 = vsub.f32 %v1721_v47, %v1744_v25 }
 0x74e   : > { %v5563_v29 = vpop.eup %5562  ;;  %v1768_v7 = vmul.f32 1.442695, %v1754_v28 }
 0x74f   : > { %v1817_v16 = vpop.permute.xlu0 %1816  ;;  %v1778_v30 = vsel %vm1723_vm7, %v5563_v29, 0.0 }
 0x750   : > { %5570 = vpow2.f32 %v1768_v7  ;;  %1779 = vadd.xlane.f32.xlu0 %v1778_v30  ;;  %5040 = vmatpush3.bf16.msra.mxu0 %v1817_v16 }
 0x751   : > { %5051 = vmatprep.subr.bf16.mxu0 %v6428_v26 }
 0x752   : > { %v5565_v31 = vpop.eup %5564 }
 0x753   : > { %v1781_v32 = vsel %vm1723_vm7, %v5565_v31, 0.0  ;;  %v5567_v33 = vpop.eup %5566 }
 0x754   : > { %1782 = vadd.xlane.f32.xlu1 %v1781_v32  ;;  %v1787_v35 = vsel %vm1723_vm7, %v5567_v33, 0.0 }
 0x756   : > { %v5569_v34 = vpop.eup %5568 }
 0x757   : > { %v1784_v17 = vsel %vm1723_vm7, %v5569_v34, 0.0 }
 0x758   : > { %1785 = vadd.xlane.f32.xlu0 %v1784_v17  ;;  %1788 = vadd.xlane.f32.xlu1 %v1787_v35 }
 0x75a   : > { %v7373_v27 = vpop.eup %5570 }
 0x75b   : > { %v1790_v36 = vsel %vm1723_vm7, %v7373_v27, 0.0 }
 0x75c   : > { %1791 = vadd.xlane.f32.xlu0 %v1790_v36 }
 0x769   : > { %2059 = vrot.lane.b32.xlu1 %v7271_v46, %s6432_s19 }
 0x772   : > { %2007 = vrot.lane.b32.xlu0 %v7273_v49, %s6432_s19 }
 0x776   : > { %2005 = vrot.lane.b32.xlu0 %v7278_v51, %s6433_s14 }
 0x77a   : > { %2057 = vrot.lane.b32.xlu0 %v7275_v50, %s6433_s14  ;;  %v1747_v38 = vpop.xlane.xlu1 %1746 }
 0x77b   : > { %v1755_v39 = vsub.f32 %v7357_v53, %v1747_v38 }
 0x77d   : > { %v1770_v40 = vmul.f32 1.442695, %v1755_v39 }
 0x77e   : > { %2109 = vrot.lane.b32.xlu0 %v7287_v5, %s6433_s14  ;;  %v1958_v43 = vpop.permute.xlu1 %1957 }
 0x77f   : > { %5572 = vpow2.f32 %v1770_v40 }
 0x789   : > { %v7383_v41 = vpop.eup %5572 }
 0x78a   : > { %v1793_v42 = vsel %vm1723_vm7, %v7383_v41, 0.0 }
 0x78d   : > { %1794 = vadd.xlane.f32.xlu1 %v1793_v42 }
 0x79e   : > { %2111 = vrot.lane.b32.xlu1 %v7283_v3, %s6432_s19 }
 0x7a2   : > { %2163 = vrot.lane.b32.xlu1 %v7281_v0, %s6432_s19  ;;  %s6443_s19 = smov 24  }
 0x7a6   : > { %2161 = vrot.lane.b32.xlu1 %v7285_v4, %s6433_s14 }
 0x7d5   : > { %v1774_v44 = vpop.xlane.xlu0 %1773 }
 0x7d6   : > { %5574 = vrcp.f32 %v1774_v44 }
 0x7d7   : > { %v1777_v45 = vpop.xlane.xlu1 %1776 }
 0x7d8   : > { %5576 = vrcp.f32 %v1777_v45 }
 0x7dd   : > { %v1780_v47 = vpop.xlane.xlu0 %1779 }
 0x7de   : > { %5578 = vrcp.f32 %v1780_v47 }
 0x7e0   : > { %v5575_v48 = vpop.eup %5574 }
 0x7e1   : > { %v1783_v52 = vpop.xlane.xlu1 %1782  ;;  %v1804_v54 = vmul.f32 %v5575_v48, %v7362_v12 }
 0x7e2   : > { %v5577_v53 = vpop.eup %5576  ;;  %5580 = vrcp.f32 %v1783_v52 }
 0x7e3   : > { %v1805_v55 = vmul.f32 %v5577_v53, %v5561_v21 }
 0x7e5   : > { %v1786_v56 = vpop.xlane.xlu0 %1785  ;;  %v1789_v57 = vpop.xlane.xlu1 %1788  ;;  %v1812_v58 = vpack.c.bf16 %v1805_v55, %v1804_v54 }
 0x7e6   : > { %5582 = vrcp.f32 %v1786_v56 }
 0x7e7   : > { %5584 = vrcp.f32 %v1789_v57  ;;  %5042 = vmatmul.mubr.msk.bf16.vlgmr.msra.gmra.mrb[4].mxu0 %vm1723_vm7, %v1812_v58 }
 0x7e8   : > { %5052 = vmatpush3.bf16.msra.mxu0 %v1911_v37  ;;  %5053 = vmatprep.mubr.msk.bf16.mxu0 %vm6429_vm4, %v6428_v26  ;;  %v5579_v59 = vpop.eup %5578 }
 0x7e9   : > { %5063 = vmatprep.subr.bf16.mxu0 %v6428_v26  ;;  %v1806_v61 = vmul.f32 %v5579_v59, %v5563_v29  ;;  %v1792_v2 = vpop.xlane.xlu0 %1791  ;;  %v2060_v20 = vpop.permute.xlu1 %2059 }
 0x7ea   : > { %5586 = vrcp.f32 %v1792_v2 }
 0x7ec   : > { %v5581_v60 = vpop.eup %5580 }
 0x7ed   : > { %v1807_v1 = vmul.f32 %v5581_v60, %v5565_v31  ;;  %v2008_v12 = vpop.permute.xlu0 %2007  ;;  %v2065_v31 = vsel %vm1513_vm5, %v2060_v20, 0 }
 0x7ee   : > { %v2013_v14 = vsel %vm1513_vm5, %v2008_v12, 0 }
 0x7ef   : > { %v1813_v8 = vpack.c.bf16 %v1807_v1, %v1806_v61 }
 0x7f0   : > { %v5583_v9 = vpop.eup %5582 }
 0x7f1   : > { %v5585_v10 = vpop.eup %5584  ;;  %v1808_v11 = vmul.f32 %v5583_v9, %v5569_v34  ;;  %5048 = vmatmul.mubr.msk.bf16.vlgmr.msra.gmra.mrb[20].mxu1 %vm1723_vm7, %v1813_v8  ;;  %v2006_v15 = vpop.permute.xlu0 %2005 }
 0x7f2   : > { %v1809_v62 = vmul.f32 %v5585_v10, %v5567_v33  ;;  %5058 = vmatpush3.bf16.msra.mxu1 %v1958_v43  ;;  %5059 = vmatprep.mubr.msk.bf16.mxu1 %vm6429_vm4, %v6428_v26 }
 0x7f3   : > { %5069 = vmatprep.subr.bf16.mxu1 %v6428_v26 }
 0x7f4   : > { %v1814_v13 = vpack.c.bf16 %v1809_v62, %v1808_v11  ;;  %v5587_v25 = vpop.eup %5586 }
 0x7f5   : > { %v2058_v24 = vpop.permute.xlu0 %2057  ;;  %v1810_v29 = vmul.f32 %v5587_v25, %v7373_v27 }
 0x7f6   : > { %5054 = vmatmul.mubr.msk.bf16.vlgmr.msra.gmra.mrb[8].mxu0 %vm1723_vm7, %v1814_v13 }
 0x7f7   : > { %5064 = vmatpush3.bf16.xpose.msra.mxu0 %v2013_v14  ;;  %5065 = vmatprep.mubr.msk.bf16.mxu0 %vm6429_vm4, %v6428_v26 }
 0x7f8   : > { %5075 = vmatprep.subr.bf16.mxu0 %v6428_v26 }
 0x7f9   : > { %v2110_v7 = vpop.permute.xlu0 %2109 }
 0x7fe   : > { %5066 = vmatmul.mubr.msk.bf16.vlgmr.msra.gmra.mrb[12].mxu0 %vm1513_vm5, %v2006_v15 }
 0x7ff   : > { %5077 = vmatprep.mubr.msk.bf16.mxu0 %vm6429_vm4, %v6428_v26 }
 0x81a   : > { %v1795_v21 = vpop.xlane.xlu1 %1794 }
 0x81b   : > { %5588 = vrcp.f32 %v1795_v21 }
 0x81e   : > { %v2112_v63 = vpop.permute.xlu1 %2111 }
 0x81f   : > { %v2117_v23 = vsel %vm1513_vm5, %v2112_v63, 0 }
 0x820   : > { %5076 = vmatpush3.bf16.xpose.msra.mxu0 %v2117_v23 }
 0x821   : > { %5087 = vmatprep.subr.bf16.mxu0 %v6428_v26 }
 0x822   : > { %v2164_v32 = vpop.permute.xlu1 %2163 }
 0x823   : > { %v2169_v33 = vsel %vm1513_vm5, %v2164_v32, 0 }
 0x825   : > { %v5589_v28 = vpop.eup %5588 }
 0x826   : > { %v1811_v16 = vmul.f32 %v5589_v28, %v7383_v41  ;;  %v2162_v34 = vpop.permute.xlu1 %2161 }
 0x827   : > { %5078 = vmatmul.mubr.msk.bf16.vlgmr.msra.gmra.mrb[16].mxu0 %vm1513_vm5, %v2110_v7 }
 0x828   : > { %v1815_v30 = vpack.c.bf16 %v1811_v16, %v1810_v29  ;;  %5089 = vmatprep.mubr.msk.bf16.mxu0 %vm6429_vm4, %v6428_v26 }
 0x82a   : > { %5060 = vmatmul.mubr.msk.bf16.vlgmr.msra.gmra.mrb[24].mxu1 %vm1723_vm7, %v1815_v30 }
 0x82b   : > { %5070 = vmatpush3.bf16.xpose.msra.mxu1 %v2065_v31  ;;  %5071 = vmatprep.mubr.msk.bf16.mxu1 %vm6429_vm4, %v6428_v26 }
 0x82c   : > { %5081 = vmatprep.subr.bf16.mxu1 %v6428_v26 }
 0x832   : > { %5072 = vmatmul.mubr.msk.bf16.vlgmr.msra.gmra.mrb[28].mxu1 %vm1513_vm5, %v2058_v24 }
 0x833   : > { %5082 = vmatpush3.bf16.xpose.msra.mxu1 %v2169_v33  ;;  %5083 = vmatprep.mubr.msk.bf16.mxu1 %vm6429_vm4, %v6428_v26 }
 0x834   : > { %5093 = vmatprep.subr.bf16.mxu1 %v6428_v26 }
 0x83a   : > { %5084 = vmatmul.mubr.msk.bf16.vlgmr.msra.gmra.mrb[32].mxu1 %vm1513_vm5, %v2162_v34 }
 0x83b   : > { %5095 = vmatprep.mubr.msk.bf16.mxu1 %vm6429_vm4, %v6428_v26 }
 0x8ba   : > { %v7427_v17 = vpop.f32.mrb[4].mxu0 }
 0x8bb   : > { %v5043_v35 = vpop.f32.mrb[5].mxu0 }
 0x8bc   : > { %v7429_v27 = vpop.f32.mrb[6].mxu0 }
 0x8bd   : > { %v5044_v36 = vpop.f32.mrb[7].mxu0 }
 0x8c4   : > { %v7431_v37 = vpop.f32.mrb[20].mxu1 }
 0x8c5   : > { %v5049_v38 = vpop.f32.mrb[21].mxu1 }
 0x8c6   : > { %v7433_v39 = vpop.f32.mrb[22].mxu1 }
 0x8c7   : > { %v5050_v40 = vpop.f32.mrb[23].mxu1 }
 0x8c9   : > { %v7435_v41 = vpop.f32.mrb[8].mxu0 }
 0x8ca   : > { %v5055_v42 = vpop.f32.mrb[9].mxu0 }
 0x8cb   : > { %v7437_v43 = vpop.f32.mrb[10].mxu0 }
 0x8cc   : > { %v5056_v44 = vpop.f32.mrb[11].mxu0 }
 0x8d1   : > { %v2049_v45 = vpop.f32.mrb[12].mxu0 }
 0x8d2   : > { %v2212_v47 = vsel %vm7322_vm6, %v2049_v45, -1e+30  ;;  %v5067_v48 = vpop.f32.mrb[13].mxu0 }
 0x8d3   : > { %v2052_v52 = vpop.f32.mrb[14].mxu0  ;;  %v2220_v53 = vsel %vm1723_vm7, %v2212_v47, -inf }
 0x8d4   : > { %v2213_v54 = vsel %vm7327_vm8, %v2052_v52, -1e+30  ;;  %2221 = vmax.xlane.f32.xlu0 %v2220_v53  ;;  %v5068_v55 = vpop.f32.mrb[15].mxu0 }
 0x8d5   : > { %v2223_v56 = vsel %vm1723_vm7, %v2213_v54, -inf }
 0x8d6   : > { %2224 = vmax.xlane.f32.xlu1 %v2223_v56 }
 0x8fa   : > { %v2153_v57 = vpop.f32.mrb[16].mxu0 }
 0x8fb   : > { %v5079_v58 = vpop.f32.mrb[17].mxu0  ;;  %v2216_v63 = vsel %vm7322_vm6, %v2153_v57, -1e+30 }
 0x8fc   : > { %v2156_v59 = vpop.f32.mrb[18].mxu0  ;;  %v2232_v28 = vsel %vm1723_vm7, %v2216_v63, -inf }
 0x8fd   : > { %v2217_v60 = vsel %vm7327_vm8, %v2156_v59, -1e+30  ;;  %v7447_v61 = vpop.f32.mrb[24].mxu1  ;;  %v5080_v1 = vpop.f32.mrb[19].mxu0 }
 0x8fe   : > { %v5061_v2 = vpop.f32.mrb[25].mxu1  ;;  %v2235_v8 = vsel %vm1723_vm7, %v2217_v60, -inf }
 0x8ff   : > { %2236 = vmax.xlane.f32.xlu1 %v2235_v8  ;;  %v7450_v9 = vpop.f32.mrb[26].mxu1 }
 0x900   : > { %v5062_v10 = vpop.f32.mrb[27].mxu1 }
 0x905   : > { %v2101_v11 = vpop.f32.mrb[28].mxu1 }
 0x906   : > { %v2214_v62 = vsel %vm7322_vm6, %v2101_v11, -1e+30  ;;  %v5073_v12 = vpop.f32.mrb[29].mxu1 }
 0x907   : > { %v2104_v13 = vpop.f32.mrb[30].mxu1  ;;  %v2226_v14 = vsel %vm1723_vm7, %v2214_v62, -inf }
 0x908   : > { %v2215_v15 = vsel %vm7327_vm8, %v2104_v13, -1e+30  ;;  %2227 = vmax.xlane.f32.xlu0 %v2226_v14  ;;  %v5074_v20 = vpop.f32.mrb[31].mxu1 }
 0x909   : > { %v2229_v21 = vsel %vm1723_vm7, %v2215_v15, -inf }
 0x90c   : > { %2230 = vmax.xlane.f32.xlu0 %v2229_v21 }
 0x90d   : > { %v2205_v23 = vpop.f32.mrb[32].mxu1 }
 0x90e   : > { %v5085_v24 = vpop.f32.mrb[33].mxu1  ;;  %v2218_v29 = vsel %vm7322_vm6, %v2205_v23, -1e+30 }
 0x90f   : > { %v2208_v25 = vpop.f32.mrb[34].mxu1  ;;  %v2238_v16 = vsel %vm1723_vm7, %v2218_v29, -inf }
 0x910   : > { %2359 = vrot.lane.b32.xlu1 %v7271_v46, %s6434_s18  ;;  %2233 = vmax.xlane.f32.xlu0 %v2232_v28  ;;  %v5086_v7 = vpop.f32.mrb[35].mxu1  ;;  %v7469_v30 = vsel %vm7327_vm8, %v2208_v25, -1e+30 }
 0x911   : > { %v2241_v31 = vsel %vm1723_vm7, %v7469_v30, -inf }
 0x914   : > { %2406 = vrot.lane.b32.xlu1 %v7283_v3, %s6434_s18  ;;  %2239 = vmax.xlane.f32.xlu0 %v2238_v16 }
 0x92a   : > { %2312 = vrot.lane.b32.xlu0 %v7273_v49, %s6434_s18 }
 0x938   : > { %2242 = vmax.xlane.f32.xlu1 %v2241_v31 }
 0x949   : > { %2453 = vrot.lane.b32.xlu1 %v7281_v0, %s6434_s18 }
 0x961   : > { %v2222_v32 = vpop.xlane.xlu0 %2221 }
 0x962   : > { %v2244_v33 = vsub.f32 %v2212_v47, %v2222_v32 }
 0x963   : > { %v2225_v34 = vpop.xlane.xlu1 %2224 }
 0x964   : > { %v2252_v35 = vmul.f32 1.442695, %v2244_v33  ;;  %v2245_v36 = vsub.f32 %v2213_v54, %v2225_v34 }
 0x966   : > { %5590 = vpow2.f32 %v2252_v35  ;;  %v2254_v38 = vmul.f32 1.442695, %v2245_v36 }
 0x968   : > { %5592 = vpow2.f32 %v2254_v38 }
 0x970   : > { %v7474_v40 = vpop.eup %5590 }
 0x971   : > { %v2268_v42 = vsel %vm1723_vm7, %v7474_v40, 0.0 }
 0x972   : > { %v7478_v44 = vpop.eup %5592  ;;  %2269 = vadd.xlane.f32.xlu0 %v2268_v42 }
 0x973   : > { %v2271_v45 = vsel %vm1723_vm7, %v7478_v44, 0.0 }
 0x974   : > { %2272 = vadd.xlane.f32.xlu1 %v2271_v45 }
 0x98c   : > { %v2237_v48 = vpop.xlane.xlu1 %2236 }
 0x98d   : > { %v2249_v54 = vsub.f32 %v2217_v60, %v2237_v48 }
 0x98f   : > { %v2262_v58 = vmul.f32 1.442695, %v2249_v54 }
 0x990   : > { %v2360_v47 = vpop.permute.xlu1 %2359 }
 0x991   : > { %5094 = vmatpush3.bf16.msra.mxu1 %v2360_v47 }
 0x992   : > { %5105 = vmatprep.subr.bf16.mxu1 %v6428_v26 }
 0x994   : > { %v2407_v28 = vpop.permute.xlu1 %2406 }
 0x995   : > { %v2228_v52 = vpop.xlane.xlu0 %2227 }
 0x996   : > { %v2246_v53 = vsub.f32 %v2214_v62, %v2228_v52 }
 0x998   : > { %v2256_v55 = vmul.f32 1.442695, %v2246_v53 }
 0x999   : > { %v2231_v56 = vpop.xlane.xlu0 %2230 }
 0x99a   : > { %5594 = vpow2.f32 %v2256_v55  ;;  %v2247_v57 = vsub.f32 %v2215_v15, %v2231_v56 }
 0x99c   : > { %v2258_v59 = vmul.f32 1.442695, %v2247_v57 }
 0x99d   : > { %v2234_v1 = vpop.xlane.xlu0 %2233 }
 0x99e   : > { %5596 = vpow2.f32 %v2258_v59  ;;  %v2248_v2 = vsub.f32 %v2216_v63, %v2234_v1 }
 0x99f   : > { %5598 = vpow2.f32 %v2262_v58 }
 0x9a0   : > { %v2260_v8 = vmul.f32 1.442695, %v2248_v2 }
 0x9a1   : > { %v2240_v10 = vpop.xlane.xlu0 %2239 }
 0x9a2   : > { %5600 = vpow2.f32 %v2260_v8  ;;  %v2250_v11 = vsub.f32 %v2218_v29, %v2240_v10 }
 0x9a4   : > { %v5595_v12 = vpop.eup %5594  ;;  %v2264_v13 = vmul.f32 1.442695, %v2250_v11 }
 0x9a5   : > { %v2313_v14 = vpop.permute.xlu0 %2312  ;;  %v2274_v62 = vsel %vm1723_vm7, %v5595_v12, 0.0 }
 0x9a6   : > { %5602 = vpow2.f32 %v2264_v13  ;;  %2275 = vadd.xlane.f32.xlu0 %v2274_v62  ;;  %5088 = vmatpush3.bf16.msra.mxu0 %v2313_v14 }
 0x9a7   : > { %5099 = vmatprep.subr.bf16.mxu0 %v6428_v26 }
 0x9a8   : > { %v5597_v60 = vpop.eup %5596 }
 0x9a9   : > { %v2277_v15 = vsel %vm1723_vm7, %v5597_v60, 0.0  ;;  %v5599_v20 = vpop.eup %5598 }
 0x9aa   : > { %2278 = vadd.xlane.f32.xlu1 %v2277_v15  ;;  %v2283_v23 = vsel %vm1723_vm7, %v5599_v20, 0.0 }
 0x9ac   : > { %v5601_v21 = vpop.eup %5600 }
 0x9ad   : > { %v2280_v63 = vsel %vm1723_vm7, %v5601_v21, 0.0 }
 0x9ae   : > { %2281 = vadd.xlane.f32.xlu0 %v2280_v63  ;;  %2284 = vadd.xlane.f32.xlu1 %v2283_v23 }
 0x9b0   : > { %v7488_v24 = vpop.eup %5602 }
 0x9b1   : > { %v2286_v25 = vsel %vm1723_vm7, %v7488_v24, 0.0 }
 0x9b2   : > { %2287 = vadd.xlane.f32.xlu0 %v2286_v25 }
 0x9bf   : > { %2553 = vrot.lane.b32.xlu1 %v7271_v46, %s6435_s10 }
 0x9c5   : > { %v2243_v29 = vpop.xlane.xlu1 %2242 }
 0x9c6   : > { %v2251_v7 = vsub.f32 %v7469_v30, %v2243_v29 }
 0x9c8   : > { %2502 = vrot.lane.b32.xlu0 %v7273_v49, %s6435_s10  ;;  %v2266_v16 = vmul.f32 1.442695, %v2251_v7 }
 0x9c9   : > { %v2454_v33 = vpop.permute.xlu1 %2453 }
 0x9ca   : > { %5604 = vpow2.f32 %v2266_v16 }
 0x9cc   : > { %2500 = vrot.lane.b32.xlu0 %v7278_v51, %s6436_s4 }
 0x9d0   : > { %2551 = vrot.lane.b32.xlu0 %v7275_v50, %s6436_s4 }
 0x9d4   : > { %2602 = vrot.lane.b32.xlu0 %v7287_v5, %s6436_s4  ;;  %v7498_v31 = vpop.eup %5604 }
 0x9d5   : > { %v2289_v32 = vsel %vm1723_vm7, %v7498_v31, 0.0 }
 0x9e3   : > { %2290 = vadd.xlane.f32.xlu1 %v2289_v32 }
 0x9f4   : > { %2604 = vrot.lane.b32.xlu1 %v7283_v3, %s6435_s10 }
 0x9f8   : > { %2655 = vrot.lane.b32.xlu1 %v7281_v0, %s6435_s10 }
 0x9fc   : > { %2653 = vrot.lane.b32.xlu1 %v7285_v4, %s6436_s4 }
 0x9ff   : > { %v2270_v30 = vpop.xlane.xlu0 %2269 }
 0xa00   : > { %5606 = vrcp.f32 %v2270_v30 }
 0xa01   : > { %v2273_v34 = vpop.xlane.xlu1 %2272 }
 0xa02   : > { %5608 = vrcp.f32 %v2273_v34 }
 0xa0a   : > { %v5607_v35 = vpop.eup %5606 }
 0xa0b   : > { %v2300_v38 = vmul.f32 %v5607_v35, %v7474_v40 }
 0xa0c   : > { %v5609_v36 = vpop.eup %5608 }
 0xa0d   : > { %v2301_v42 = vmul.f32 %v5609_v36, %v7478_v44 }
 0xa0f   : > { %v2308_v45 = vpack.c.bf16 %v2301_v42, %v2300_v38 }
 0xa11   : > { %5090 = vmatmul.mubr.msk.bf16.vlgmr.msra.gmra.mrb[20].mxu0 %vm1723_vm7, %v2308_v45 }
 0xa12   : > { %5100 = vmatpush3.bf16.msra.mxu0 %v2407_v28  ;;  %5101 = vmatprep.mubr.msk.bf16.mxu0 %vm6429_vm4, %v6428_v26 }
 0xa13   : > { %5111 = vmatprep.subr.bf16.mxu0 %v6428_v26 }
 0xa33   : > { %v2276_v48 = vpop.xlane.xlu0 %2275 }
 0xa34   : > { %5610 = vrcp.f32 %v2276_v48 }
 0xa37   : > { %v2279_v47 = vpop.xlane.xlu1 %2278 }
 0xa38   : > { %5612 = vrcp.f32 %v2279_v47 }
 0xa3b   : > { %v2282_v52 = vpop.xlane.xlu0 %2281  ;;  %v2285_v53 = vpop.xlane.xlu1 %2284 }
 0xa3c   : > { %5614 = vrcp.f32 %v2282_v52 }
 0xa3d   : > { %5616 = vrcp.f32 %v2285_v53 }
 0xa3e   : > { %v5611_v40 = vpop.eup %5610 }
 0xa3f   : > { %v2302_v44 = vmul.f32 %v5611_v40, %v5595_v12  ;;  %v2288_v56 = vpop.xlane.xlu0 %2287  ;;  %v2554_v13 = vpop.permute.xlu1 %2553 }
 0xa40   : > { %5618 = vrcp.f32 %v2288_v56  ;;  %v2559_v29 = vsel %vm1513_vm5, %v2554_v13, 0 }
 0xa42   : > { %v5613_v54 = vpop.eup %5612 }
 0xa43   : > { %v2303_v55 = vmul.f32 %v5613_v54, %v5597_v60  ;;  %v2503_v8 = vpop.permute.xlu0 %2502 }
 0xa44   : > { %v2508_v11 = vsel %vm1513_vm5, %v2503_v8, 0 }
 0xa45   : > { %v2309_v57 = vpack.c.bf16 %v2303_v55, %v2302_v44 }
 0xa46   : > { %v5615_v58 = vpop.eup %5614 }
 0xa47   : > { %v5617_v59 = vpop.eup %5616  ;;  %v2304_v1 = vmul.f32 %v5615_v58, %v5601_v21  ;;  %5096 = vmatmul.mubr.msk.bf16.vlgmr.msra.gmra.mrb[36].mxu1 %vm1723_vm7, %v2309_v57  ;;  %v2501_v12 = vpop.permute.xlu0 %2500 }
 0xa48   : > { %v2305_v2 = vmul.f32 %v5617_v59, %v5599_v20  ;;  %5106 = vmatpush3.bf16.msra.mxu1 %v2454_v33  ;;  %5107 = vmatprep.mubr.msk.bf16.mxu1 %vm6429_vm4, %v6428_v26 }
 0xa49   : > { %5117 = vmatprep.subr.bf16.mxu1 %v6428_v26 }
 0xa4a   : > { %v2310_v10 = vpack.c.bf16 %v2305_v2, %v2304_v1  ;;  %v5619_v20 = vpop.eup %5618 }
 0xa4b   : > { %v2552_v15 = vpop.permute.xlu0 %2551  ;;  %v2306_v63 = vmul.f32 %v5619_v20, %v7488_v24 }
 0xa4c   : > { %5102 = vmatmul.mubr.msk.bf16.vlgmr.msra.gmra.mrb[24].mxu0 %vm1723_vm7, %v2310_v10 }
 0xa4d   : > { %5112 = vmatpush3.bf16.xpose.msra.mxu0 %v2508_v11  ;;  %5113 = vmatprep.mubr.msk.bf16.mxu0 %vm6429_vm4, %v6428_v26 }
 0xa4e   : > { %5123 = vmatprep.subr.bf16.mxu0 %v6428_v26 }
 0xa4f   : > { %v2603_v23 = vpop.permute.xlu0 %2602 }
 0xa54   : > { %5114 = vmatmul.mubr.msk.bf16.vlgmr.msra.gmra.mrb[28].mxu0 %vm1513_vm5, %v2501_v12 }
 0xa55   : > { %5125 = vmatprep.mubr.msk.bf16.mxu0 %vm6429_vm4, %v6428_v26 }
 0xa70   : > { %v2291_v14 = vpop.xlane.xlu1 %2290 }
 0xa71   : > { %5620 = vrcp.f32 %v2291_v14 }
 0xa74   : > { %v2605_v62 = vpop.permute.xlu1 %2604 }
 0xa75   : > { %v2610_v60 = vsel %vm1513_vm5, %v2605_v62, 0 }
 0xa76   : > { %5124 = vmatpush3.bf16.xpose.msra.mxu0 %v2610_v60 }
 0xa77   : > { %5135 = vmatprep.subr.bf16.mxu0 %v6428_v26 }
 0xa78   : > { %v2656_v24 = vpop.permute.xlu1 %2655 }
 0xa79   : > { %v2661_v7 = vsel %vm1513_vm5, %v2656_v24, 0 }
 0xa7b   : > { %v5621_v21 = vpop.eup %5620 }
 0xa7c   : > { %v2307_v25 = vmul.f32 %v5621_v21, %v7498_v31  ;;  %v2654_v16 = vpop.permute.xlu1 %2653 }
 0xa7d   : > { %5126 = vmatmul.mubr.msk.bf16.vlgmr.msra.gmra.mrb[32].mxu0 %vm1513_vm5, %v2603_v23 }
 0xa7e   : > { %v2311_v28 = vpack.c.bf16 %v2307_v25, %v2306_v63  ;;  %5137 = vmatprep.mubr.msk.bf16.mxu0 %vm6429_vm4, %v6428_v26 }
 0xa80   : > { %5108 = vmatmul.mubr.msk.bf16.vlgmr.msra.gmra.mrb[40].mxu1 %vm1723_vm7, %v2311_v28 }
 0xa81   : > { %5118 = vmatpush3.bf16.xpose.msra.mxu1 %v2559_v29  ;;  %5119 = vmatprep.mubr.msk.bf16.mxu1 %vm6429_vm4, %v6428_v26 }
 0xa82   : > { %5129 = vmatprep.subr.bf16.mxu1 %v6428_v26 }
 0xa88   : > { %5120 = vmatmul.mubr.msk.bf16.vlgmr.msra.gmra.mrb[44].mxu1 %vm1513_vm5, %v2552_v15 }
 0xa89   : > { %5130 = vmatpush3.bf16.xpose.msra.mxu1 %v2661_v7  ;;  %5131 = vmatprep.mubr.msk.bf16.mxu1 %vm6429_vm4, %v6428_v26 }
 0xa8a   : > { %5141 = vmatprep.subr.bf16.mxu1 %v6428_v26 }
 0xa90   : > { %5132 = vmatmul.mubr.msk.bf16.vlgmr.msra.gmra.mrb[48].mxu1 %vm1513_vm5, %v2654_v16 }
 0xa91   : > { %5143 = vmatprep.mubr.msk.bf16.mxu1 %vm6429_vm4, %v6428_v26 }
 0xae4   : > { %v7543_v31 = vpop.f32.mrb[20].mxu0 }
 0xae5   : > { %v5091_v32 = vpop.f32.mrb[21].mxu0 }
 0xae6   : > { %v7545_v33 = vpop.f32.mrb[22].mxu0 }
 0xae7   : > { %v5468_v30 = vpack.i.bf16 %v7545_v33, %v7543_v31  ;;  %v5092_v34 = vpop.f32.mrb[23].mxu0 }
 0xb1a   : > { %v7549_v35 = vpop.f32.mrb[36].mxu1 }
 0xb1b   : > { %v5097_v36 = vpop.f32.mrb[37].mxu1 }
 0xb1c   : > { %v7551_v38 = vpop.f32.mrb[38].mxu1 }
 0xb1d   : > { %v5473_v42 = vpack.i.bf16 %v7551_v38, %v7549_v35  ;;  %v5098_v45 = vpop.f32.mrb[39].mxu1 }
 0xb1f   : > { %v7555_v48 = vpop.f32.mrb[24].mxu0 }
 0xb20   : > { %v5103_v47 = vpop.f32.mrb[25].mxu0 }
 0xb21   : > { %v7557_v52 = vpop.f32.mrb[26].mxu0 }
 0xb22   : > { %v5488_v53 = vpack.i.bf16 %v7557_v52, %v7555_v48  ;;  %v5104_v40 = vpop.f32.mrb[27].mxu0 }
 0xb27   : > { %v2544_v54 = vpop.f32.mrb[28].mxu0 }
 0xb28   : > { %v2704_v44 = vsel %vm7322_vm6, %v2544_v54, -1e+30  ;;  %v5115_v55 = vpop.f32.mrb[29].mxu0 }
 0xb29   : > { %v2547_v56 = vpop.f32.mrb[30].mxu0  ;;  %v2712_v57 = vsel %vm1723_vm7, %v2704_v44, -inf }
 0xb2a   : > { %v2705_v58 = vsel %vm7327_vm8, %v2547_v56, -1e+30  ;;  %2713 = vmax.xlane.f32.xlu0 %v2712_v57  ;;  %v5116_v59 = vpop.f32.mrb[31].mxu0 }
 0xb2b   : > { %v2715_v1 = vsel %vm1723_vm7, %v2705_v58, -inf }
 0xb2c   : > { %2716 = vmax.xlane.f32.xlu1 %v2715_v1 }
 0xb50   : > { %v2646_v2 = vpop.f32.mrb[32].mxu0 }
 0xb51   : > { %v5127_v8 = vpop.f32.mrb[33].mxu0  ;;  %v2708_v16 = vsel %vm7322_vm6, %v2646_v2, -1e+30 }
 0xb52   : > { %v2649_v10 = vpop.f32.mrb[34].mxu0  ;;  %v2724_v45 = vsel %vm1723_vm7, %v2708_v16, -inf }
 0xb53   : > { %v2709_v11 = vsel %vm7327_vm8, %v2649_v10, -1e+30  ;;  %v7569_v12 = vpop.f32.mrb[40].mxu1  ;;  %v5128_v13 = vpop.f32.mrb[35].mxu0 }
 0xb54   : > { %v5109_v14 = vpop.f32.mrb[41].mxu1  ;;  %v2727_v62 = vsel %vm1723_vm7, %v2709_v11, -inf }
 0xb55   : > { %2728 = vmax.xlane.f32.xlu1 %v2727_v62  ;;  %v7572_v60 = vpop.f32.mrb[42].mxu1 }
 0xb56   : > { %v5493_v15 = vpack.i.bf16 %v7572_v60, %v7569_v12  ;;  %v5110_v20 = vpop.f32.mrb[43].mxu1 }
 0xb5b   : > { %v2595_v21 = vpop.f32.mrb[44].mxu1 }
 0xb5c   : > { %v2706_v63 = vsel %vm7322_vm6, %v2595_v21, -1e+30  ;;  %v5121_v23 = vpop.f32.mrb[45].mxu1 }
 0xb5d   : > { %v2598_v25 = vpop.f32.mrb[46].mxu1  ;;  %v2718_v28 = vsel %vm1723_vm7, %v2706_v63, -inf }
 0xb5e   : > { %v2707_v29 = vsel %vm7327_vm8, %v2598_v25, -1e+30  ;;  %2719 = vmax.xlane.f32.xlu0 %v2718_v28  ;;  %v5122_v24 = vpop.f32.mrb[47].mxu1 }
 0xb5f   : > { %v2721_v7 = vsel %vm1723_vm7, %v2707_v29, -inf }
 0xb62   : > { %2722 = vmax.xlane.f32.xlu0 %v2721_v7 }
 0xb63   : > { %v2697_v32 = vpop.f32.mrb[48].mxu1 }
 0xb64   : > { %v5133_v34 = vpop.f32.mrb[49].mxu1  ;;  %v2710_v47 = vsel %vm7322_vm6, %v2697_v32, -1e+30 }
 0xb65   : > { %v2700_v36 = vpop.f32.mrb[50].mxu1  ;;  %v2730_v54 = vsel %vm1723_vm7, %v2710_v47, -inf }
 0xb66   : > { %2851 = vrot.lane.b32.xlu1 %v7271_v46, %s6437_s6  ;;  %2725 = vmax.xlane.f32.xlu0 %v2724_v45  ;;  %v5134_v40 = vpop.f32.mrb[51].mxu1  ;;  %v7593_v55 = vsel %vm7327_vm8, %v2700_v36, -1e+30 }
 0xb67   : > { %v2733_v56 = vsel %vm1723_vm7, %v7593_v55, -inf }
 0xb6a   : > { %2898 = vrot.lane.b32.xlu1 %v7283_v3, %s6437_s6  ;;  %2731 = vmax.xlane.f32.xlu0 %v2730_v54 }
 0xb80   : > { %2804 = vrot.lane.b32.xlu0 %v7273_v49, %s6437_s6 }
 0xb8e   : > { %2734 = vmax.xlane.f32.xlu1 %v2733_v56 }
 0xb9f   : > { %2945 = vrot.lane.b32.xlu1 %v7281_v0, %s6437_s6 }
 0xbb7   : > { %v2714_v57 = vpop.xlane.xlu0 %2713 }
 0xbb8   : > { %v2736_v59 = vsub.f32 %v2704_v44, %v2714_v57 }
 0xbb9   : > { %v2717_v1 = vpop.xlane.xlu1 %2716 }
 0xbba   : > { %v2744_v2 = vmul.f32 1.442695, %v2736_v59  ;;  %v2737_v8 = vsub.f32 %v2705_v58, %v2717_v1 }
 0xbbc   : > { %5622 = vpow2.f32 %v2744_v2  ;;  %v2746_v10 = vmul.f32 1.442695, %v2737_v8 }
 0xbbe   : > { %5624 = vpow2.f32 %v2746_v10 }
 0xbc6   : > { %v7598_v13 = vpop.eup %5622 }
 0xbc7   : > { %v2760_v14 = vsel %vm1723_vm7, %v7598_v13, 0.0 }
 0xbc8   : > { %v7602_v62 = vpop.eup %5624  ;;  %2761 = vadd.xlane.f32.xlu0 %v2760_v14 }
 0xbc9   : > { %v2763_v20 = vsel %vm1723_vm7, %v7602_v62, 0.0 }
 0xbca   : > { %2764 = vadd.xlane.f32.xlu1 %v2763_v20 }
 0xbe2   : > { %v2729_v21 = vpop.xlane.xlu1 %2728 }
 0xbe3   : > { %v2741_v25 = vsub.f32 %v2709_v11, %v2729_v21 }
 0xbe5   : > { %v2754_v32 = vmul.f32 1.442695, %v2741_v25 }
 0xbe6   : > { %v2852_v44 = vpop.permute.xlu1 %2851 }
 0xbe7   : > { %5142 = vmatpush3.bf16.msra.mxu1 %v2852_v44 }
 0xbe8   : > { %5153 = vmatprep.subr.bf16.mxu1 %v6428_v26 }
 0xbea   : > { %v2899_v20 = vpop.permute.xlu1 %2898 }
 0xbeb   : > { %v2720_v58 = vpop.xlane.xlu0 %2719 }
 0xbec   : > { %v2738_v23 = vsub.f32 %v2706_v63, %v2720_v58 }
 0xbee   : > { %v2748_v28 = vmul.f32 1.442695, %v2738_v23 }
 0xbef   : > { %v2723_v24 = vpop.xlane.xlu0 %2722 }
 0xbf0   : > { %5626 = vpow2.f32 %v2748_v28  ;;  %v2739_v7 = vsub.f32 %v2707_v29, %v2723_v24 }
 0xbf2   : > { %v2750_v34 = vmul.f32 1.442695, %v2739_v7 }
 0xbf3   : > { %v2726_v36 = vpop.xlane.xlu0 %2725 }
 0xbf4   : > { %5628 = vpow2.f32 %v2750_v34  ;;  %v2740_v45 = vsub.f32 %v2708_v16, %v2726_v36 }
 0xbf5   : > { %5630 = vpow2.f32 %v2754_v32 }
 0xbf6   : > { %v2752_v40 = vmul.f32 1.442695, %v2740_v45 }
 0xbf7   : > { %v2732_v54 = vpop.xlane.xlu0 %2731 }
 0xbf8   : > { %5632 = vpow2.f32 %v2752_v40  ;;  %v2742_v56 = vsub.f32 %v2710_v47, %v2732_v54 }
 0xbfa   : > { %v5627_v57 = vpop.eup %5626  ;;  %v2756_v59 = vmul.f32 1.442695, %v2742_v56 }
 0xbfb   : > { %v2805_v1 = vpop.permute.xlu0 %2804  ;;  %v2766_v63 = vsel %vm1723_vm7, %v5627_v57, 0.0 }
 0xbfc   : > { %5634 = vpow2.f32 %v2756_v59  ;;  %2767 = vadd.xlane.f32.xlu0 %v2766_v63  ;;  %5136 = vmatpush3.bf16.msra.mxu0 %v2805_v1 }
 0xbfd   : > { %5147 = vmatprep.subr.bf16.mxu0 %v6428_v26 }
 0xbfe   : > { %v5629_v11 = vpop.eup %5628 }
 0xbff   : > { %v2769_v29 = vsel %vm1723_vm7, %v5629_v11, 0.0  ;;  %v5631_v2 = vpop.eup %5630 }
 0xc00   : > { %2770 = vadd.xlane.f32.xlu1 %v2769_v29  ;;  %v2775_v47 = vsel %vm1723_vm7, %v5631_v2, 0.0 }
 0xc02   : > { %v5633_v16 = vpop.eup %5632 }
 0xc03   : > { %v2772_v8 = vsel %vm1723_vm7, %v5633_v16, 0.0 }
 0xc04   : > { %2773 = vadd.xlane.f32.xlu0 %v2772_v8  ;;  %2776 = vadd.xlane.f32.xlu1 %v2775_v47 }
 0xc06   : > { %v7612_v10 = vpop.eup %5634 }
 0xc07   : > { %v2778_v14 = vsel %vm1723_vm7, %v7612_v10, 0.0 }
 0xc08   : > { %2779 = vadd.xlane.f32.xlu0 %v2778_v14 }
 0xc15   : > { %3045 = vrot.lane.b32.xlu1 %v7271_v46, %s6438_s7 }
 0xc1b   : > { %v2735_v21 = vpop.xlane.xlu1 %2734 }
 0xc1c   : > { %v2743_v44 = vsub.f32 %v7593_v55, %v2735_v21 }
 0xc1e   : > { %2994 = vrot.lane.b32.xlu0 %v7273_v49, %s6438_s7  ;;  %v2758_v58 = vmul.f32 1.442695, %v2743_v44 }
 0xc20   : > { %5636 = vpow2.f32 %v2758_v58 }
 0xc22   : > { %2992 = vrot.lane.b32.xlu0 %v7278_v51, %s6439_s9  ;;  %v2946_v51 = vpop.permute.xlu1 %2945 }
 0xc26   : > { %3043 = vrot.lane.b32.xlu0 %v7275_v50, %s6439_s9 }
 0xc2a   : > { %3094 = vrot.lane.b32.xlu0 %v7287_v5, %s6439_s9  ;;  %v7622_v23 = vpop.eup %5636 }
 0xc2b   : > { %v2781_v25 = vsel %vm1723_vm7, %v7622_v23, 0.0 }
 0xc39   : > { %2782 = vadd.xlane.f32.xlu1 %v2781_v25 }
 0xc4a   : > { %3096 = vrot.lane.b32.xlu1 %v7283_v3, %s6438_s7 }
 0xc4e   : > { %3147 = vrot.lane.b32.xlu1 %v7281_v0, %s6438_s7 }
 0xc52   : > { %3145 = vrot.lane.b32.xlu1 %v7285_v4, %s6439_s9 }
 0xc55   : > { %v2762_v55 = vpop.xlane.xlu0 %2761 }
 0xc56   : > { %5638 = vrcp.f32 %v2762_v55 }
 0xc57   : > { %v2765_v50 = vpop.xlane.xlu1 %2764 }
 0xc58   : > { %5640 = vrcp.f32 %v2765_v50 }
 0xc60   : > { %v5639_v28 = vpop.eup %5638 }
 0xc61   : > { %v2792_v24 = vmul.f32 %v5639_v28, %v7598_v13 }
 0xc62   : > { %v5641_v5 = vpop.eup %5640 }
 0xc63   : > { %v2793_v7 = vmul.f32 %v5641_v5, %v7602_v62 }
 0xc65   : > { %v2800_v32 = vpack.c.bf16 %v2793_v7, %v2792_v24 }
 0xc67   : > { %5138 = vmatmul.mubr.msk.bf16.vlgmr.msra.gmra.mrb[36].mxu0 %vm1723_vm7, %v2800_v32 }
 0xc68   : > { %5148 = vmatpush3.bf16.msra.mxu0 %v2899_v20  ;;  %5149 = vmatprep.mubr.msk.bf16.mxu0 %vm6429_vm4, %v6428_v26 }
 0xc69   : > { %5159 = vmatprep.subr.bf16.mxu0 %v6428_v26 }
 0xc89   : > { %v2768_v4 = vpop.xlane.xlu0 %2767 }
 0xc8a   : > { %5642 = vrcp.f32 %v2768_v4 }
 0xc8d   : > { %v2771_v34 = vpop.xlane.xlu1 %2770 }
 0xc8e   : > { %5644 = vrcp.f32 %v2771_v34 }
 0xc91   : > { %v2774_v36 = vpop.xlane.xlu0 %2773  ;;  %v2777_v45 = vpop.xlane.xlu1 %2776 }
 0xc92   : > { %5646 = vrcp.f32 %v2774_v36 }
 0xc93   : > { %5648 = vrcp.f32 %v2777_v45 }
 0xc94   : > { %v5643_v13 = vpop.eup %5642 }
 0xc95   : > { %v2794_v62 = vmul.f32 %v5643_v13, %v5627_v57  ;;  %v2780_v56 = vpop.xlane.xlu0 %2779 }
 0xc96   : > { %5650 = vrcp.f32 %v2780_v56 }
 0xc98   : > { %v5645_v40 = vpop.eup %5644 }
 0xc99   : > { %v2795_v54 = vmul.f32 %v5645_v40, %v5629_v11  ;;  %v2995_v47 = vpop.permute.xlu0 %2994  ;;  %v3046_v11 = vpop.permute.xlu1 %3045 }
 0xc9a   : > { %v3000_v20 = vsel %vm1513_vm5, %v2995_v47, 0  ;;  %v3051_v5 = vsel %vm1513_vm5, %v3046_v11, 0 }
 0xc9b   : > { %v2801_v59 = vpack.c.bf16 %v2795_v54, %v2794_v62 }
 0xc9c   : > { %v5647_v1 = vpop.eup %5646 }
 0xc9d   : > { %v5649_v63 = vpop.eup %5648  ;;  %v2796_v29 = vmul.f32 %v5647_v1, %v5633_v16  ;;  %5144 = vmatmul.mubr.msk.bf16.vlgmr.msra.gmra.mrb[52].mxu1 %vm1723_vm7, %v2801_v59  ;;  %v2993_v57 = vpop.permute.xlu0 %2992 }
 0xc9e   : > { %v2797_v8 = vmul.f32 %v5649_v63, %v5631_v2  ;;  %5154 = vmatpush3.bf16.msra.mxu1 %v2946_v51  ;;  %5155 = vmatprep.mubr.msk.bf16.mxu1 %vm6429_vm4, %v6428_v26 }
 0xc9f   : > { %5165 = vmatprep.subr.bf16.mxu1 %v6428_v26 }
 0xca0   : > { %v2802_v14 = vpack.c.bf16 %v2797_v8, %v2796_v29  ;;  %v5651_v58 = vpop.eup %5650 }
 0xca1   : > { %v3044_v44 = vpop.permute.xlu0 %3043  ;;  %v2798_v51 = vmul.f32 %v5651_v58, %v7612_v10 }
 0xca2   : > { %5150 = vmatmul.mubr.msk.bf16.vlgmr.msra.gmra.mrb[40].mxu0 %vm1723_vm7, %v2802_v14 }
 0xca3   : > { %5160 = vmatpush3.bf16.xpose.msra.mxu0 %v3000_v20  ;;  %5161 = vmatprep.mubr.msk.bf16.mxu0 %vm6429_vm4, %v6428_v26 }
 0xca4   : > { %5171 = vmatprep.subr.bf16.mxu0 %v6428_v26 }
 0xca5   : > { %v3095_v55 = vpop.permute.xlu0 %3094 }
 0xcaa   : > { %5162 = vmatmul.mubr.msk.bf16.vlgmr.msra.gmra.mrb[44].mxu0 %vm1513_vm5, %v2993_v57 }
 0xcab   : > { %5173 = vmatprep.mubr.msk.bf16.mxu0 %vm6429_vm4, %v6428_v26 }
 0xcc6   : > { %v2783_v2 = vpop.xlane.xlu1 %2782 }
 0xcc7   : > { %5652 = vrcp.f32 %v2783_v2 }
 0xcca   : > { %v3097_v16 = vpop.permute.xlu1 %3096 }
 0xccb   : > { %v3102_v21 = vsel %vm1513_vm5, %v3097_v16, 0 }
 0xccc   : > { %5172 = vmatpush3.bf16.xpose.msra.mxu0 %v3102_v21 }
 0xccd   : > { %5183 = vmatprep.subr.bf16.mxu0 %v6428_v26 }
 0xcce   : > { %v3148_v10 = vpop.permute.xlu1 %3147 }
 0xccf   : > { %v3153_v24 = vsel %vm1513_vm5, %v3148_v10, 0 }
 0xcd1   : > { %v5653_v25 = vpop.eup %5652 }
 0xcd2   : > { %v2799_v50 = vmul.f32 %v5653_v25, %v7622_v23  ;;  %v3146_v23 = vpop.permute.xlu1 %3145 }
 0xcd3   : > { %5174 = vmatmul.mubr.msk.bf16.vlgmr.msra.gmra.mrb[48].mxu0 %vm1513_vm5, %v3095_v55 }
 0xcd4   : > { %v2803_v28 = vpack.c.bf16 %v2799_v50, %v2798_v51  ;;  %5185 = vmatprep.mubr.msk.bf16.mxu0 %vm6429_vm4, %v6428_v26 }
 0xcd6   : > { %5156 = vmatmul.mubr.msk.bf16.vlgmr.msra.gmra.mrb[56].mxu1 %vm1723_vm7, %v2803_v28 }
 0xcd7   : > { %5166 = vmatpush3.bf16.xpose.msra.mxu1 %v3051_v5  ;;  %5167 = vmatprep.mubr.msk.bf16.mxu1 %vm6429_vm4, %v6428_v26 }
 0xcd8   : > { %5177 = vmatprep.subr.bf16.mxu1 %v6428_v26 }
 0xcde   : > { %5168 = vmatmul.mubr.msk.bf16.vlgmr.msra.gmra.mrb[60].mxu1 %vm1513_vm5, %v3044_v44 }
 0xcdf   : > { %5178 = vmatpush3.bf16.xpose.msra.mxu1 %v3153_v24  ;;  %5179 = vmatprep.mubr.msk.bf16.mxu1 %vm6429_vm4, %v6428_v26 }
 0xce0   : > { %5189 = vmatprep.subr.bf16.mxu1 %v6428_v26 }
 0xce6   : > { %5180 = vmatmul.mubr.msk.bf16.vlgmr.msra.gmra.mrb[64].mxu1 %vm1513_vm5, %v3146_v23 }
 0xce7   : > { %5191 = vmatprep.mubr.msk.bf16.mxu1 %vm6429_vm4, %v6428_v26 }
 0xd3a   : > { %v7667_v7 = vpop.f32.mrb[36].mxu0 }
 0xd3b   : > { %v5139_v32 = vpop.f32.mrb[37].mxu0 }
 0xd3c   : > { %v7669_v4 = vpop.f32.mrb[38].mxu0 }
 0xd3d   : > { %v5478_v34 = vpack.i.bf16 %v7669_v4, %v7667_v7  ;;  %v5140_v36 = vpop.f32.mrb[39].mxu0 }
 0xd70   : > { %v7673_v45 = vpop.f32.mrb[52].mxu1 }
 0xd71   : > { %v5145_v13 = vpop.f32.mrb[53].mxu1 }
 0xd72   : > { %v7675_v40 = vpop.f32.mrb[54].mxu1 }
 0xd73   : > { %v5483_v62 = vpack.i.bf16 %v7675_v40, %v7673_v45  ;;  %v5146_v54 = vpop.f32.mrb[55].mxu1 }
 0xd75   : > { %v7679_v56 = vpop.f32.mrb[40].mxu0 }
 0xd76   : > { %v5151_v59 = vpop.f32.mrb[41].mxu0 }
 0xd77   : > { %v7681_v1 = vpop.f32.mrb[42].mxu0 }
 0xd78   : > { %v5503_v63 = vpack.i.bf16 %v7681_v1, %v7679_v56  ;;  %v5152_v29 = vpop.f32.mrb[43].mxu0 }
 0xd7d   : > { %v3036_v8 = vpop.f32.mrb[44].mxu0 }
 0xd7e   : > { %v3196_v47 = vsel %vm7322_vm6, %v3036_v8, -1e+30  ;;  %v5163_v14 = vpop.f32.mrb[45].mxu0 }
 0xd7f   : > { %v3204_v20 = vsel %vm1723_vm7, %v3196_v47, -inf  ;;  %v3039_v57 = vpop.f32.mrb[46].mxu0 }
 0xd80   : > { %v3197_v11 = vsel %vm7327_vm8, %v3039_v57, -1e+30  ;;  %3205 = vmax.xlane.f32.xlu0 %v3204_v20  ;;  %v5164_v2 = vpop.f32.mrb[47].mxu0 }
 0xd81   : > { %v3207_v16 = vsel %vm1723_vm7, %v3197_v11, -inf }
 0xd82   : > { %3208 = vmax.xlane.f32.xlu1 %v3207_v16 }
 0xda6   : > { %v3138_v21 = vpop.f32.mrb[48].mxu0 }
 0xda7   : > { %v5175_v44 = vpop.f32.mrb[49].mxu0  ;;  %v3200_v14 = vsel %vm7322_vm6, %v3138_v21, -1e+30 }
 0xda8   : > { %v3141_v58 = vpop.f32.mrb[50].mxu0  ;;  %v3216_v2 = vsel %vm1723_vm7, %v3200_v14, -inf }
 0xda9   : > { %v3201_v25 = vsel %vm7327_vm8, %v3141_v58, -1e+30  ;;  %v7693_v51 = vpop.f32.mrb[56].mxu1  ;;  %v5176_v55 = vpop.f32.mrb[51].mxu0 }
 0xdaa   : > { %v3219_v50 = vsel %vm1723_vm7, %v3201_v25, -inf  ;;  %v5157_v28 = vpop.f32.mrb[57].mxu1 }
 0xdab   : > { %3220 = vmax.xlane.f32.xlu1 %v3219_v50  ;;  %v7696_v5 = vpop.f32.mrb[58].mxu1 }
 0xdac   : > { %v5513_v10 = vpack.i.bf16 %v7696_v5, %v7693_v51  ;;  %v5158_v24 = vpop.f32.mrb[59].mxu1 }
 0xdb1   : > { %v3087_v23 = vpop.f32.mrb[60].mxu1 }
 0xdb2   : > { %v3198_v32 = vsel %vm7322_vm6, %v3087_v23, -1e+30  ;;  %v5169_v36 = vpop.f32.mrb[61].mxu1 }
 0xdb3   : > { %v3210_v13 = vsel %vm1723_vm7, %v3198_v32, -inf  ;;  %v3090_v54 = vpop.f32.mrb[62].mxu1 }
 0xdb4   : > { %v3199_v59 = vsel %vm7327_vm8, %v3090_v54, -1e+30  ;;  %3211 = vmax.xlane.f32.xlu0 %v3210_v13  ;;  %v5170_v29 = vpop.f32.mrb[63].mxu1 }
 0xdb5   : > { %v3213_v8 = vsel %vm1723_vm7, %v3199_v59, -inf }
 0xdb8   : > { %3214 = vmax.xlane.f32.xlu0 %v3213_v8 }
 0xdb9   : > { %v3189_v20 = vpop.f32.mrb[64].mxu1 }
 0xdba   : > { %v5181_v57 = vpop.f32.mrb[65].mxu1  ;;  %v3202_v44 = vsel %vm7322_vm6, %v3189_v20, -1e+30 }
 0xdbb   : > { %v3192_v16 = vpop.f32.mrb[66].mxu1  ;;  %v3222_v21 = vsel %vm1723_vm7, %v3202_v44, -inf }
 0xdbc   : > { %v7713_v58 = vsel %vm7327_vm8, %v3192_v16, -1e+30  ;;  %3217 = vmax.xlane.f32.xlu0 %v3216_v2  ;;  %v5182_v55 = vpop.f32.mrb[67].mxu1 }
 0xdbd   : > { %v3225_v50 = vsel %vm1723_vm7, %v7713_v58, -inf }
 0xdbe   : > { %3226 = vmax.xlane.f32.xlu1 %v3225_v50 }
 0xdc0   : > { %3223 = vmax.xlane.f32.xlu0 %v3222_v21 }
 0xe0d   : > { %v3206_v28 = vpop.xlane.xlu0 %3205 }
 0xe0e   : > { %v3228_v24 = vsub.f32 %v3196_v47, %v3206_v28 }
 0xe0f   : > { %v3209_v23 = vpop.xlane.xlu1 %3208 }
 0xe10   : > { %v3236_v36 = vmul.f32 1.442695, %v3228_v24  ;;  %v3229_v13 = vsub.f32 %v3197_v11, %v3209_v23 }
 0xe12   : > { %5654 = vpow2.f32 %v3236_v36  ;;  %v3238_v6 = vmul.f32 1.442695, %v3229_v13 }
 0xe14   : > { %5656 = vpow2.f32 %v3238_v6 }
 0xe1c   : > { %v7718_v22 = vpop.eup %5654 }
 0xe1d   : > { %v3252_v54 = vsel %vm1723_vm7, %v7718_v22, 0.0 }
 0xe1e   : > { %v7722_v29 = vpop.eup %5656  ;;  %3253 = vadd.xlane.f32.xlu0 %v3252_v54 }
 0xe1f   : > { %v3255_v8 = vsel %vm1723_vm7, %v7722_v29, 0.0 }
 0xe20   : > { %3256 = vadd.xlane.f32.xlu1 %v3255_v8 }
 0xe38   : > { %v3221_v20 = vpop.xlane.xlu1 %3220 }
 0xe39   : > { %v3233_v2 = vsub.f32 %v3201_v25, %v3221_v20 }
 0xe3b   : > { %v3246_v50 = vmul.f32 1.442695, %v3233_v2 }
 0xe41   : > { %v3212_v47 = vpop.xlane.xlu0 %3211 }
 0xe42   : > { %v3230_v57 = vsub.f32 %v3198_v32, %v3212_v47 }
 0xe44   : > { %v3240_v11 = vmul.f32 1.442695, %v3230_v57 }
 0xe45   : > { %v3215_v16 = vpop.xlane.xlu0 %3214 }
 0xe46   : > { %5658 = vpow2.f32 %v3240_v11  ;;  %v3231_v55 = vsub.f32 %v3199_v59, %v3215_v16 }
 0xe48   : > { %v3242_v21 = vmul.f32 1.442695, %v3231_v55 }
 0xe49   : > { %v3218_v28 = vpop.xlane.xlu0 %3217 }
 0xe4a   : > { %5660 = vpow2.f32 %v3242_v21  ;;  %v3232_v24 = vsub.f32 %v3200_v14, %v3218_v28 }
 0xe4b   : > { %5662 = vpow2.f32 %v3246_v50  ;;  %v3227_v2 = vpop.xlane.xlu1 %3226 }
 0xe4c   : > { %v3244_v23 = vmul.f32 1.442695, %v3232_v24  ;;  %v3235_v11 = vsub.f32 %v7713_v58, %v3227_v2 }
 0xe4d   : > { %v3224_v36 = vpop.xlane.xlu0 %3223 }
 0xe4e   : > { %5664 = vpow2.f32 %v3244_v23  ;;  %v3234_v13 = vsub.f32 %v3202_v44, %v3224_v36 }
 0xe50   : > { %v5659_v6 = vpop.eup %5658  ;;  %v3248_v54 = vmul.f32 1.442695, %v3234_v13 }
 0xe51   : > { %v3258_v8 = vsel %vm1723_vm7, %v5659_v6, 0.0 }
 0xe52   : > { %5666 = vpow2.f32 %v3248_v54  ;;  %3259 = vadd.xlane.f32.xlu0 %v3258_v8  ;;  %v5530_v54 = vld [vmem:[%s943_s30] sm:$0xff]  }
 0xe54   : > { %v5661_v25 = vpop.eup %5660 }
 0xe55   : > { %v3261_v32 = vsel %vm1723_vm7, %v5661_v25, 0.0  ;;  %v7728_v59 = vpop.eup %5662 }
 0xe56   : > { %3262 = vadd.xlane.f32.xlu1 %v3261_v32  ;;  %v3267_v44 = vsel %vm1723_vm7, %v7728_v59, 0.0 }
 0xe58   : > { %v7730_v20 = vpop.eup %5664 }
 0xe59   : > { %v3264_v14 = vsel %vm1723_vm7, %v7730_v20, 0.0 }
 0xe5a   : > { %3265 = vadd.xlane.f32.xlu0 %v3264_v14  ;;  %3268 = vadd.xlane.f32.xlu1 %v3267_v44 }
 0xe5c   : > { %v7736_v47 = vpop.eup %5666 }
 0xe5d   : > { %v3270_v57 = vsel %vm1723_vm7, %v7736_v47, 0.0 }
 0xe5e   : > { %3271 = vadd.xlane.f32.xlu0 %v3270_v57 }
 0xe6b   : > { %3343 = vrot.lane.b32.xlu1 %v7271_v46, %s6440_s24  ;;  %v3250_v46 = vmul.f32 1.442695, %v3235_v11 }
 0xe6d   : > { %5668 = vpow2.f32 %v3250_v46 }
 0xe6f   : > { %3390 = vrot.lane.b32.xlu1 %v7283_v3, %s6440_s24 }
 0xe74   : > { %3296 = vrot.lane.b32.xlu0 %v7273_v49, %s6440_s24 }
 0xe77   : > { %v5669_v49 = vpop.eup %5668 }
 0xe78   : > { %5469 = vrot.lane.b32.xlu0 %v5468_v30, %s6441_s26  ;;  %v3273_v3 = vsel %vm1723_vm7, %v5669_v49, 0.0 }
 0xe7c   : > { %5479 = vrot.lane.b32.xlu0 %v5478_v34, %s6442_s0 }
 0xe80   : > { %5489 = vrot.lane.b32.xlu0 %v5488_v53, %s6441_s26 }
 0xe93   : > { %3274 = vadd.xlane.f32.xlu1 %v3273_v3 }
 0xea4   : > { %3437 = vrot.lane.b32.xlu1 %v7281_v0, %s6440_s24 }
 0xea8   : > { %5474 = vrot.lane.b32.xlu1 %v5473_v42, %s6441_s26 }
 0xeab   : > { %v3254_v31 = vpop.xlane.xlu0 %3253 }
 0xeac   : > { %5484 = vrot.lane.b32.xlu1 %v5483_v62, %s6442_s0 }
 0xead   : > { %v3257_v33 = vpop.xlane.xlu1 %3256 }
 0xeae   : > { %5670 = vrcp.f32 %v3257_v33 }
 0xeaf   : > { %5672 = vrcp.f32 %v3254_v31 }
 0xeb0   : > { %5494 = vrot.lane.b32.xlu1 %v5493_v15, %s6441_s26 }
 0xeb8   : > { %v5671_v38 = vpop.eup %5670 }
 0xeb9   : > { %v5673_v42 = vpop.eup %5672  ;;  %v3285_v12 = vmul.f32 %v5671_v38, %v7722_v29 }
 0xeba   : > { %v3284_v15 = vmul.f32 %v5673_v42, %v7718_v22 }
 0xebc   : > { %v3292_v40 = vpack.c.bf16 %v3285_v12, %v3284_v15 }
 0xedf   : > { %v3260_v30 = vpop.xlane.xlu0 %3259 }
 0xee0   : > { %5674 = vrcp.f32 %v3260_v30 }
 0xee3   : > { %v3263_v0 = vpop.xlane.xlu1 %3262 }
 0xee4   : > { %5676 = vrcp.f32 %v3263_v0 }
 0xee7   : > { %v3266_v48 = vpop.xlane.xlu0 %3265  ;;  %v3269_v35 = vpop.xlane.xlu1 %3268 }
 0xee8   : > { %5678 = vrcp.f32 %v3266_v48 }
 0xee9   : > { %5680 = vrcp.f32 %v3269_v35 }
 0xeea   : > { %v5675_v7 = vpop.eup %5674 }
 0xeeb   : > { %v3272_v52 = vpop.xlane.xlu0 %3271  ;;  %v3344_v53 = vpop.permute.xlu1 %3343  ;;  %v3286_v4 = vmul.f32 %v5675_v7, %v5659_v6 }
 0xeec   : > { %5190 = vmatpush3.bf16.msra.mxu1 %v3344_v53  ;;  %5682 = vrcp.f32 %v3272_v52 }
 0xeed   : > { %5201 = vmatprep.subr.bf16.mxu1 %v6428_v26 }
 0xeee   : > { %v5677_v60 = vpop.eup %5676 }
 0xeef   : > { %v3287_v34 = vmul.f32 %v5677_v60, %v5661_v25  ;;  %v3297_v45 = vpop.permute.xlu0 %3296  ;;  %v3391_v55 = vpop.permute.xlu1 %3390 }
 0xef0   : > { %5184 = vmatpush3.bf16.msra.mxu0 %v3297_v45 }
 0xef1   : > { %5195 = vmatprep.subr.bf16.mxu0 %v6428_v26  ;;  %v3293_v62 = vpack.c.bf16 %v3287_v34, %v3286_v4 }
 0xef2   : > { %v5679_v58 = vpop.eup %5678 }
 0xef3   : > { %v5681_v16 = vpop.eup %5680  ;;  %5186 = vmatmul.mubr.msk.bf16.vlgmr.msra.gmra.mrb[52].mxu0 %vm1723_vm7, %v3292_v40  ;;  %5192 = vmatmul.mubr.msk.bf16.vlgmr.msra.gmra.mrb[68].mxu1 %vm1723_vm7, %v3293_v62  ;;  %v3288_v22 = vmul.f32 %v5679_v58, %v7730_v20  ;;  %v5470_v38 = vpop.permute.xlu0 %5469 }
 0xef4   : > { %5196 = vmatpush3.bf16.msra.mxu0 %v3391_v55  ;;  %5197 = vmatprep.mubr.msk.bf16.mxu0 %vm6429_vm4, %v6428_v26  ;;  %v3289_v29 = vmul.f32 %v5681_v16, %v7728_v59  ;;  %v5471_v52 = vunpack.i.l.bf16 %v5470_v38 }
 0xef5   : > { %5203 = vmatprep.mubr.msk.bf16.mxu1 %vm6429_vm4, %v6428_v26  ;;  %5207 = vmatprep.subr.bf16.mxu0 %v5530_v54  ;;  %v5531_v26 = vld [vmem:[%s943_s30 + $0x8] sm:$0xff]  }
 0xef6   : > { %v3294_v50 = vpack.c.bf16 %v3289_v29, %v3288_v22  ;;  %v5683_v24 = vpop.eup %5682  ;;  %v3580_v34 = vsel %vm1513_vm5, %v7427_v17, %v5471_v52 }
 0xef7   : > { %v3290_v36 = vmul.f32 %v5683_v24, %v7736_v47  ;;  %v5480_v56 = vpop.permute.xlu0 %5479 }
 0xef8   : > { %v5481_v12 = vunpack.i.l.bf16 %v5480_v56 }
 0xefb   : > { %5198 = vmatmul.mubr.msk.bf16.vlgmr.msra.gmra.mrb[56].mxu0 %vm1723_vm7, %v3294_v50  ;;  %v5490_v53 = vpop.permute.xlu0 %5489  ;;  %v3588_v50 = vsel %vm1723_vm7, %v3580_v34, %v5481_v12  ;;  %v5720_v34 = vld [vmem:[#allocation2 + $0x8] sm:$0xff] }
 0xefc   : > { %5208 = vmatpush3.bf16.msra.mxu0 %v5530_v54  ;;  %v5491_v54 = vunpack.i.l.bf16 %v5490_v53 }
 0xefd   : > { %5209 = vmatprep.subr.bf16.mxu0 %v5531_v26 }
 0xf00   : > { %5210 = vmatpush3.bf16.msra.mxu0 %v5531_v26 }
 0xf20   : > { %v3275_v21 = vpop.xlane.xlu1 %3274 }
 0xf21   : > { %5684 = vrcp.f32 %v3275_v21 }
 0xf24   : > { %v3438_v28 = vpop.permute.xlu1 %3437 }
 0xf25   : > { %5202 = vmatpush3.bf16.msra.mxu1 %v3438_v28 }
 0xf28   : > { %v5475_v42 = vpop.permute.xlu1 %5474 }
 0xf29   : > { %v5477_v7 = vunpack.i.h.bf16 %v5475_v42  ;;  %v5476_v51 = vunpack.i.l.bf16 %v5475_v42 }
 0xf2b   : > { %v5685_v23 = vpop.eup %5684  ;;  %v3583_v45 = vsel %vm1513_vm5, %v7433_v39, %v5477_v7  ;;  %v3582_v40 = vsel %vm1513_vm5, %v7431_v37, %v5476_v51 }
 0xf2c   : > { %v3291_v13 = vmul.f32 %v5685_v23, %v5669_v49  ;;  %v5485_v1 = vpop.permute.xlu1 %5484 }
 0xf2d   : > { %v5487_v60 = vunpack.i.h.bf16 %v5485_v1  ;;  %v5486_v15 = vunpack.i.l.bf16 %v5485_v1 }
 0xf2e   : > { %v3295_v6 = vpack.c.bf16 %v3291_v13, %v3290_v36 }
 0xf2f   : > { %v3590_v21 = vsel %vm1723_vm7, %v3582_v40, %v5486_v15  ;;  %v3591_v17 = vsel %vm1723_vm7, %v3583_v45, %v5487_v60  ;;  %v5719_v60 = vld [vmem:[#allocation2 + $0x10] sm:$0xff] }
 0xf30   : > { %5204 = vmatmul.mubr.msk.bf16.vlgmr.msra.gmra.mrb[72].mxu1 %vm1723_vm7, %v3295_v6  ;;  %v5495_v5 = vpop.permute.xlu1 %5494  ;;  %v5492_v6 = vunpack.i.h.bf16 %v5490_v53 }
 0xfc6   : > { %v3336_v8 = vpop.f32.mrb[52].mxu0  ;;  %v3383_v25 = vpop.f32.mrb[68].mxu1 }
 0xfc7   : > { %v5187_v32 = vpop.f32.mrb[53].mxu0  ;;  %v5193_v59 = vpop.f32.mrb[69].mxu1 }
 0xfc8   : > { %v3339_v20 = vpop.f32.mrb[54].mxu0  ;;  %v3386_v14 = vpop.f32.mrb[70].mxu1  ;;  %v3585_v32 = vsel %vm1513_vm5, %v7437_v43, %v5492_v6  ;;  %v3584_v59 = vsel %vm1513_vm5, %v7435_v41, %v5491_v54  ;;  %v5496_v43 = vunpack.i.l.bf16 %v5495_v5  ;;  %v5724_v6 = vld [vmem:[#allocation2 + $0x28] sm:$0xff] }
 0xfc9   : > { %v5498_v44 = vpack.i.bf16 %v3339_v20, %v3336_v8  ;;  %v5508_v47 = vpack.i.bf16 %v3386_v14, %v3383_v25  ;;  %v5188_v57 = vpop.f32.mrb[55].mxu0  ;;  %v5194_v2 = vpop.f32.mrb[71].mxu1 }
 0xfcb   : > { %5499 = vrot.lane.b32.xlu0 %v5498_v44, %s6443_s19  ;;  %5509 = vrot.lane.b32.xlu1 %v5508_v47, %s6443_s19 }
 0xfce   : > { %v3430_v11 = vpop.f32.mrb[56].mxu0 }
 0xfcf   : > { %5504 = vrot.lane.b32.xlu0 %v5503_v63, %s6442_s0  ;;  %v5199_v46 = vpop.f32.mrb[57].mxu0  ;;  %5514 = vrot.lane.b32.xlu1 %v5513_v10, %s6442_s0  ;;  %v5472_v63 = vunpack.i.h.bf16 %v5470_v38  ;;  %v5482_v10 = vunpack.i.h.bf16 %v5480_v56 }
 0xfd0   : > { %v3433_v49 = vpop.f32.mrb[58].mxu0 }
 0xfd1   : > { %v5518_v3 = vpack.i.bf16 %v3433_v49, %v3430_v11  ;;  %v5200_v31 = vpop.f32.mrb[59].mxu0  ;;  %v3581_v4 = vsel %vm1513_vm5, %v7429_v27, %v5472_v63  ;;  %v5497_v49 = vunpack.i.h.bf16 %v5495_v5  ;;  %v4856_v63 = vld [vmem:[%s951_s8] ss:$0 sm:$0xff] }
 0xfd2   : > { %v3589_v27 = vsel %vm1723_vm7, %v3581_v4, %v5482_v10  ;;  %v5718_v5 = vld [vmem:[#allocation2] sm:$0xff] }
 0xfd3   : > { %5519 = vrot.lane.b32.xlu0 %v5518_v3, %s6443_s19 }
0x1003   : > { %v3477_v33 = vpop.f32.mrb[72].mxu1 }
0x1004   : > { %v5205_v30 = vpop.f32.mrb[73].mxu1 }
0x1005   : > { %v3480_v0 = vpop.f32.mrb[74].mxu1  ;;  %v3586_v30 = vsel %vm1513_vm5, %v7447_v61, %v5496_v43 }
0x1006   : > { %v5523_v48 = vpack.i.bf16 %v3480_v0, %v3477_v33  ;;  %v5206_v35 = vpop.f32.mrb[75].mxu1  ;;  %v3587_v33 = vsel %vm1513_vm5, %v7450_v9, %v5497_v49 }
0x1008   : > { %5524 = vrot.lane.b32.xlu1 %v5523_v48, %s6443_s19 }
0x103d   : > { %v5500_v62 = vpop.permute.xlu0 %5499  ;;  %v5510_v58 = vpop.permute.xlu1 %5509 }
0x103e   : > { %v5502_v16 = vunpack.i.h.bf16 %v5500_v62  ;;  %v5501_v55 = vunpack.i.l.bf16 %v5500_v62  ;;  %v5512_v22 = vunpack.i.h.bf16 %v5510_v58  ;;  %v5511_v29 = vunpack.i.l.bf16 %v5510_v58  ;;  %v5721_v58 = vld [vmem:[#allocation2 + $0x18] sm:$0xff] }
0x1040   : > { %v3598_v39 = vsel %vm3596_vm9, %v3589_v27, %v5502_v16  ;;  %v3597_v28 = vsel %vm3596_vm9, %v3588_v50, %v5501_v55  ;;  %v3600_v37 = vsel %vm3596_vm9, %v3591_v17, %v5512_v22  ;;  %v3599_v24 = vsel %vm3596_vm9, %v3590_v21, %v5511_v29 }
0x1041   : > { %v3605_v23 = vpack.c.bf16 %v3598_v39, %v3597_v28  ;;  %v3606_v36 = vpack.c.bf16 %v3600_v37, %v3599_v24  ;;  %v5505_v13 = vpop.permute.xlu0 %5504  ;;  %v5515_v46 = vpop.permute.xlu1 %5514  ;;  %v5722_v37 = vld [vmem:[#allocation2 + $0x20] sm:$0xff] }
0x1042   : > { %v5507_v26 = vunpack.i.h.bf16 %v5505_v13  ;;  %v5506_v8 = vunpack.i.l.bf16 %v5505_v13  ;;  %v5517_v3 = vunpack.i.h.bf16 %v5515_v46  ;;  %v5516_v31 = vunpack.i.l.bf16 %v5515_v46 }
0x1043   : > { %5211 = vmatprep.mubr.msk.bf16.mxu0 %vm1256_vm3, %v3605_v23 }
0x1044   : > { %5212 = vmatmul.mubr.msk.bf16.vlgmr.msra.gmra.mrb[60].mxu0 %vm1256_vm3, %v3606_v36  ;;  %v3593_v44 = vsel %vm1723_vm7, %v3585_v32, %v5507_v26  ;;  %v3592_v47 = vsel %vm1723_vm7, %v3584_v59, %v5506_v8  ;;  %v3595_v35 = vsel %vm1723_vm7, %v3587_v33, %v5517_v3  ;;  %v3594_v38 = vsel %vm1723_vm7, %v3586_v30, %v5516_v31  ;;  %v5723_v36 = vld [vmem:[#allocation2 + $0x30] sm:$0xff]  ;;  %v5725_v8 = vld [vmem:[#allocation2 + $0x38] sm:$0xff] }
0x1045   : > { %v5520_v25 = vpop.permute.xlu0 %5519 }
0x1046   : > { %v5522_v20 = vunpack.i.h.bf16 %v5520_v25  ;;  %v5521_v14 = vunpack.i.l.bf16 %v5520_v25 }
0x1048   : > { %v3602_v57 = vsel %vm3596_vm9, %v3593_v44, %v5522_v20  ;;  %v3601_v2 = vsel %vm3596_vm9, %v3592_v47, %v5521_v14 }
0x1049   : > { %v3607_v11 = vpack.c.bf16 %v3602_v57, %v3601_v2 }
0x104b   : > { %5215 = vmatprep.mubr.msk.bf16.mxu0 %vm1256_vm3, %v3607_v11 }
0x107a   : > { %v5525_v41 = vpop.permute.xlu1 %5524 }
0x107b   : > { %v5527_v0 = vunpack.i.h.bf16 %v5525_v41  ;;  %v5526_v48 = vunpack.i.l.bf16 %v5525_v41 }
0x107d   : > { %v3604_v42 = vsel %vm3596_vm9, %v3595_v35, %v5527_v0  ;;  %v3603_v56 = vsel %vm3596_vm9, %v3594_v38, %v5526_v48 }
0x107e   : > { %v3608_v1 = vpack.c.bf16 %v3604_v42, %v3603_v56 }
0x1080   : > { %5216 = vmatmul.mubr.msk.bf16.gmra.mrb[64].mxu0 %vm1256_vm3, %v3608_v1  ;;  %v5532_v1 = vld [vmem:[%s976_s28] sm:$0xff]  }
0x1081   : > { %5219 = vmatprep.subr.bf16.mxu1 %v5532_v1 }
0x1082   : > { %5220 = vmatpush3.bf16.msra.mxu1 %v5532_v1 }
0x1117   : > { %v5213_v52 = vpop.f32.mrb[60].mxu0 }
0x1118   : > { %v3678_v9 = vpop.f32.mrb[61].mxu0  ;;  %v3687_v53 = vadd.f32 %v5213_v52, %v4856_v63 }
0x1119   : > { %v3679_v7 = vadd.f32 %v4856_v63, %v3678_v9  ;;  %v5214_v61 = vpop.f32.mrb[62].mxu0 }
0x111a   : > { %v3681_v51 = vpop.f32.mrb[63].mxu0  ;;  %v7833_v15 = vadd.f32 %v5719_v60, %v3687_v53  ;;  %v3690_v4 = vadd.f32 %v5214_v61, %v4856_v63 }
0x111b   : > { %v7831_v10 = vadd.f32 %v5718_v5, %v3679_v7  ;;  %v3682_v12 = vadd.f32 %v4856_v63, %v3681_v51 }
0x111c   : > { %v7841_v16 = vadd.f32 %v5721_v58, %v3690_v4  ;;  %v3725_v55 = vsel %vm1256_vm3, %v7833_v15, 0.0 }
0x111d   : > { %v7835_v45 = vadd.f32 %v5720_v34, %v3682_v12  ;;  %v3719_v40 = vsel %vm1256_vm3, %v7831_v10, 0.0 }
0x111e   : > { %3720 = vadd.xlane.f32.xlu0 %v3719_v40  ;;  %v3728_v22 = vsel %vm1256_vm3, %v7841_v16, 0.0 }
0x111f   : > { %v3722_v62 = vsel %vm1256_vm3, %v7835_v45, 0.0 }
0x1120   : > { %3723 = vadd.xlane.f32.xlu1 %v3722_v62 }
0x1122   : > { %3726 = vadd.xlane.f32.xlu0 %v3725_v55 }
0x1126   : > { %3729 = vadd.xlane.f32.xlu0 %v3728_v22 }
0x1153   : > { %v5217_v29 = vpop.f32.mrb[64].mxu0 }
0x1154   : > { %v3703_v50 = vadd.f32 %v5217_v29, %v4856_v63  ;;  %v3694_v27 = vpop.f32.mrb[65].mxu0 }
0x1155   : > { %v3695_v21 = vadd.f32 %v4856_v63, %v3694_v27  ;;  %v5218_v17 = vpop.f32.mrb[66].mxu0 }
0x1156   : > { %v3706_v39 = vadd.f32 %v5218_v17, %v4856_v63  ;;  %v3697_v28 = vpop.f32.mrb[67].mxu0  ;;  %v7849_v13 = vadd.f32 %v5723_v36, %v3703_v50 }
0x1157   : > { %v7847_v24 = vadd.f32 %v5722_v37, %v3695_v21  ;;  %v3698_v23 = vadd.f32 %v4856_v63, %v3697_v28  ;;  %v5533_v63 = vld [vmem:[%s976_s28 + $0x8] sm:$0xff]  }
0x1158   : > { %v7855_v25 = vadd.f32 %v5725_v8, %v3706_v39  ;;  %v3737_v59 = vsel %vm1256_vm3, %v7849_v13, 0.0  ;;  %5221 = vmatprep.subr.bf16.mxu1 %v5533_v63 }
0x1159   : > { %v7851_v54 = vadd.f32 %v5724_v6, %v3698_v23  ;;  %v3731_v26 = vsel %vm1256_vm3, %v7847_v24, 0.0  ;;  %5222 = vmatpush3.bf16.msra.mxu1 %v5533_v63 }
0x115a   : > { %3732 = vadd.xlane.f32.xlu0 %v3731_v26  ;;  %v3740_v20 = vsel %vm1256_vm3, %v7855_v25, 0.0 }
0x115b   : > { %v3734_v32 = vsel %vm1256_vm3, %v7851_v54, 0.0 }
0x115c   : > { %3735 = vadd.xlane.f32.xlu1 %v3734_v32 }
0x115e   : > { %3738 = vadd.xlane.f32.xlu0 %v3737_v59 }
0x1160   : > { %3741 = vadd.xlane.f32.xlu1 %v3740_v20 }
0x11ab   : > { %v3721_v14 = vpop.xlane.xlu0 %3720 }
0x11ac   : > { %v3743_v44 = vmul.f32 0.03125, %v3721_v14 }
0x11ad   : > { %v3724_v47 = vpop.xlane.xlu1 %3723 }
0x11ae   : > { %v7864_v57 = vsub.f32 %v7831_v10, %v3743_v44  ;;  %v3744_v2 = vmul.f32 0.03125, %v3724_v47  ;;  %v4863_v44 = vld [vmem:[%s959_s2] ss:$0 sm:$0xff] }
0x11af   : > { %v3727_v11 = vpop.xlane.xlu0 %3726 }
0x11b0   : > { %v7867_v46 = vsub.f32 %v7835_v45, %v3744_v2  ;;  %v3745_v49 = vmul.f32 0.03125, %v3727_v11  ;;  %v3759_v43 = vmul.f32 %v7864_v57, %v7864_v57 }
0x11b2   : > { %v7872_v3 = vsub.f32 %v7833_v15, %v3745_v49  ;;  %v3767_v31 = vsel %vm1256_vm3, %v3759_v43, 0.0  ;;  %v3760_v41 = vmul.f32 %v7867_v46, %v7867_v46 }
0x11b3   : > { %v3730_v33 = vpop.xlane.xlu0 %3729  ;;  %3768 = vadd.xlane.f32.xlu0 %v3767_v31  ;;  %v4864_v31 = vld [vmem:[%s967_s23] ss:$0 sm:$0xff] }
0x11b4   : > { %v3746_v30 = vmul.f32 0.03125, %v3730_v33  ;;  %v3770_v0 = vsel %vm1256_vm3, %v3760_v41, 0.0  ;;  %v3761_v48 = vmul.f32 %v7872_v3, %v7872_v3 }
0x11b5   : > { %3771 = vadd.xlane.f32.xlu1 %v3770_v0 }
0x11b6   : > { %v7881_v35 = vsub.f32 %v7841_v16, %v3746_v30  ;;  %v3773_v38 = vsel %vm1256_vm3, %v3761_v48, 0.0 }
0x11b7   : > { %3774 = vadd.xlane.f32.xlu0 %v3773_v38 }
0x11b8   : > { %v3762_v42 = vmul.f32 %v7881_v35, %v7881_v35 }
0x11ba   : > { %v3776_v56 = vsel %vm1256_vm3, %v3762_v42, 0.0 }
0x11bb   : > { %3777 = vadd.xlane.f32.xlu1 %v3776_v56 }
0x11e7   : > { %v3733_v52 = vpop.xlane.xlu0 %3732 }
0x11e8   : > { %v3747_v9 = vmul.f32 0.03125, %v3733_v52 }
0x11e9   : > { %v3736_v53 = vpop.xlane.xlu1 %3735 }
0x11ea   : > { %v7892_v7 = vsub.f32 %v7847_v24, %v3747_v9  ;;  %v3748_v61 = vmul.f32 0.03125, %v3736_v53 }
0x11eb   : > { %v3739_v51 = vpop.xlane.xlu0 %3738 }
0x11ec   : > { %v7895_v5 = vsub.f32 %v7851_v54, %v3748_v61  ;;  %v3749_v12 = vmul.f32 0.03125, %v3739_v51  ;;  %v3763_v60 = vmul.f32 %v7892_v7, %v7892_v7 }
0x11ed   : > { %v3742_v4 = vpop.xlane.xlu1 %3741 }
0x11ee   : > { %v7900_v34 = vsub.f32 %v7849_v13, %v3749_v12  ;;  %v3750_v40 = vmul.f32 0.03125, %v3742_v4  ;;  %v3779_v62 = vsel %vm1256_vm3, %v3763_v60, 0.0  ;;  %v3764_v58 = vmul.f32 %v7895_v5, %v7895_v5 }
0x11ef   : > { %3780 = vadd.xlane.f32.xlu0 %v3779_v62 }
0x11f0   : > { %v7906_v55 = vsub.f32 %v7855_v25, %v3750_v40  ;;  %v3782_v22 = vsel %vm1256_vm3, %v3764_v58, 0.0  ;;  %v3765_v29 = vmul.f32 %v7900_v34, %v7900_v34 }
0x11f1   : > { %3783 = vadd.xlane.f32.xlu1 %v3782_v22 }
0x11f2   : > { %v3785_v50 = vsel %vm1256_vm3, %v3765_v29, 0.0  ;;  %v3766_v27 = vmul.f32 %v7906_v55, %v7906_v55 }
0x11f3   : > { %3786 = vadd.xlane.f32.xlu0 %v3785_v50 }
0x11f4   : > { %v3788_v21 = vsel %vm1256_vm3, %v3766_v27, 0.0 }
0x11f5   : > { %3789 = vadd.xlane.f32.xlu1 %v3788_v21 }
0x1240   : > { %v3769_v17 = vpop.xlane.xlu0 %3768 }
0x1241   : > { %v3791_v39 = vmul.f32 0.03125, %v3769_v17 }
0x1242   : > { %v3772_v28 = vpop.xlane.xlu1 %3771 }
0x1243   : > { %v3799_v37 = vadd.f32 1e-05, %v3791_v39  ;;  %v3792_v23 = vmul.f32 0.03125, %v3772_v28 }
0x1244   : > { %v3775_v36 = vpop.xlane.xlu0 %3774 }
0x1245   : > { %5686 = vrsqrt.f32 %v3799_v37  ;;  %v3800_v6 = vadd.f32 1e-05, %v3792_v23  ;;  %v3793_v26 = vmul.f32 0.03125, %v3775_v36 }
0x1247   : > { %5688 = vrsqrt.f32 %v3800_v6  ;;  %v3801_v8 = vadd.f32 1e-05, %v3793_v26 }
0x1248   : > { %v3778_v32 = vpop.xlane.xlu1 %3777 }
0x1249   : > { %5690 = vrsqrt.f32 %v3801_v8  ;;  %v3794_v59 = vmul.f32 0.03125, %v3778_v32 }
0x124b   : > { %v3802_v20 = vadd.f32 1e-05, %v3794_v59  ;;  %v5536_v59 = vld [vmem:[%s7167_s25 + $0x10] sm:$0xff]  }
0x124d   : > { %5692 = vrsqrt.f32 %v3802_v20  ;;  %v5537_v20 = vld [vmem:[%s7167_s25 + $0x18] sm:$0xff]  }
0x124f   : > { %v5687_v14 = vpop.eup %5686 }
0x1250   : > { %v3815_v47 = vmul.f32 %v5687_v14, %v7864_v57  ;;  %v5538_v14 = vld [vmem:[%s7167_s25 + $0x20] sm:$0xff]  }
0x1251   : > { %v5689_v2 = vpop.eup %5688 }
0x1252   : > { %v3816_v11 = vmul.f32 %v5689_v2, %v7867_v46  ;;  %v3829_v49 = vmul.f32 %v4863_v44, %v3815_v47  ;;  %v5540_v47 = vld [vmem:[%s7167_s25 + $0x30] sm:$0xff]   ;;  %v5541_v2 = vld [vmem:[%s7167_s25 + $0x38] sm:$0xff]  }
0x1253   : > { %v5691_v43 = vpop.eup %5690 }
0x1254   : > { %v3817_v41 = vmul.f32 %v5691_v43, %v7872_v3  ;;  %v3830_v33 = vmul.f32 %v4863_v44, %v3816_v11  ;;  %v3843_v30 = vadd.f32 %v4864_v31, %v3829_v49  ;;  %v4865_v11 = vld [vmem:[%s984_s1] ss:$0 sm:$0xff] }
0x1256   : > { %v3844_v0 = vadd.f32 %v4864_v31, %v3830_v33  ;;  %v3831_v38 = vmul.f32 %v4863_v44, %v3817_v41 }
0x1257   : > { %v5693_v48 = vpop.eup %5692 }
0x1258   : > { %v3818_v42 = vmul.f32 %v5693_v48, %v7881_v35  ;;  %v3851_v56 = vpack.c.bf16 %v3844_v0, %v3843_v30  ;;  %v3845_v57 = vadd.f32 %v4864_v31, %v3831_v38 }
0x125a   : > { %v3832_v1 = vmul.f32 %v4863_v44, %v3818_v42  ;;  %5223 = vmatprep.mubr.msk.bf16.mxu1 %vm1256_vm3, %v3851_v56 }
0x125c   : > { %v3846_v63 = vadd.f32 %v4864_v31, %v3832_v1 }
0x125e   : > { %v3852_v46 = vpack.c.bf16 %v3846_v63, %v3845_v57 }
0x1260   : > { %5224 = vmatmul.mubr.msk.bf16.vlgmr.msra.gmra.mrb[76].mxu1 %vm1256_vm3, %v3852_v46 }
0x127c   : > { %v3781_v52 = vpop.xlane.xlu0 %3780 }
0x127d   : > { %v3795_v9 = vmul.f32 0.03125, %v3781_v52 }
0x127e   : > { %v3784_v53 = vpop.xlane.xlu1 %3783 }
0x127f   : > { %v3803_v3 = vadd.f32 1e-05, %v3795_v9  ;;  %v3796_v61 = vmul.f32 0.03125, %v3784_v53 }
0x1280   : > { %v3787_v51 = vpop.xlane.xlu0 %3786 }
0x1281   : > { %5694 = vrsqrt.f32 %v3803_v3  ;;  %v3804_v12 = vadd.f32 1e-05, %v3796_v61  ;;  %v3797_v60 = vmul.f32 0.03125, %v3787_v51 }
0x1282   : > { %v3790_v4 = vpop.xlane.xlu1 %3789 }
0x1283   : > { %5696 = vrsqrt.f32 %v3804_v12  ;;  %v3805_v35 = vadd.f32 1e-05, %v3797_v60  ;;  %v3798_v40 = vmul.f32 0.03125, %v3790_v4 }
0x1285   : > { %5698 = vrsqrt.f32 %v3805_v35  ;;  %v3806_v62 = vadd.f32 1e-05, %v3798_v40 }
0x1287   : > { %5700 = vrsqrt.f32 %v3806_v62 }
0x128b   : > { %v5695_v58 = vpop.eup %5694 }
0x128c   : > { %v3819_v22 = vmul.f32 %v5695_v58, %v7892_v7 }
0x128d   : > { %v5697_v29 = vpop.eup %5696 }
0x128e   : > { %v3820_v50 = vmul.f32 %v5697_v29, %v7895_v5  ;;  %v3833_v27 = vmul.f32 %v4863_v44, %v3819_v22 }
0x128f   : > { %v5699_v21 = vpop.eup %5698 }
0x1290   : > { %v3821_v17 = vmul.f32 %v5699_v21, %v7900_v34  ;;  %v3834_v39 = vmul.f32 %v4863_v44, %v3820_v50  ;;  %v3847_v23 = vadd.f32 %v4864_v31, %v3833_v27  ;;  %v5534_v34 = vld [vmem:[%s7167_s25] sm:$0xff]  }
0x1291   : > { %v5701_v28 = vpop.eup %5700  ;;  %5231 = vmatprep.subr.bf16.mxu0 %v5534_v34 }
0x1292   : > { %v3822_v37 = vmul.f32 %v5701_v28, %v7906_v55  ;;  %v3848_v36 = vadd.f32 %v4864_v31, %v3834_v39  ;;  %v3835_v6 = vmul.f32 %v4863_v44, %v3821_v17  ;;  %5232 = vmatpush3.bf16.msra.mxu0 %v5534_v34  ;;  %v5535_v55 = vld [vmem:[%s7167_s25 + $0x8] sm:$0xff]  }
0x1293   : > { %5233 = vmatprep.subr.bf16.mxu0 %v5535_v55 }
0x1294   : > { %v3853_v26 = vpack.c.bf16 %v3848_v36, %v3847_v23  ;;  %v3836_v7 = vmul.f32 %v4863_v44, %v3822_v37  ;;  %v3849_v8 = vadd.f32 %v4864_v31, %v3835_v6  ;;  %v5539_v44 = vld [vmem:[%s7167_s25 + $0x28] sm:$0xff]  }
0x1296   : > { %5227 = vmatprep.mubr.msk.bf16.mxu1 %vm1256_vm3, %v3853_v26  ;;  %v3850_v5 = vadd.f32 %v4864_v31, %v3836_v7  ;;  %5234 = vmatpush3.bf16.msra.mxu0 %v5535_v55 }
0x1297   : > { %5235 = vmatprep.subr.bf16.mxu0 %v5536_v59 }
0x1298   : > { %v3854_v32 = vpack.c.bf16 %v3850_v5, %v3849_v8 }
0x129a   : > { %5228 = vmatmul.mubr.msk.bf16.gmra.mrb[80].mxu1 %vm1256_vm3, %v3854_v32  ;;  %5236 = vmatpush3.bf16.msra.mxu0 %v5536_v59 }
0x129b   : > { %5237 = vmatprep.subr.bf16.mxu0 %v5537_v20 }
0x129e   : > { %5238 = vmatpush3.bf16.msra.mxu0 %v5537_v20 }
0x129f   : > { %5239 = vmatprep.subr.bf16.mxu0 %v5538_v14 }
0x12a2   : > { %5240 = vmatpush3.bf16.msra.mxu0 %v5538_v14 }
0x12a3   : > { %5241 = vmatprep.subr.bf16.mxu0 %v5539_v44 }
0x12a6   : > { %5242 = vmatpush3.bf16.msra.mxu0 %v5539_v44 }
0x12a7   : > { %5243 = vmatprep.subr.bf16.mxu0 %v5540_v47 }
0x12aa   : > { %5244 = vmatpush3.bf16.msra.mxu0 %v5540_v47 }
0x12ab   : > { %5245 = vmatprep.subr.bf16.mxu0 %v5541_v2 }
0x12ae   : > { %5246 = vmatpush3.bf16.msra.mxu0 %v5541_v2 }
0x1333   : > { %v5225_v49 = vpop.f32.mrb[76].mxu1 }
0x1334   : > { %v3933_v43 = vadd.f32 %v5225_v49, %v4865_v11  ;;  %v3924_v31 = vpop.f32.mrb[77].mxu1 }
0x1335   : > { %v3925_v41 = vadd.f32 %v4865_v11, %v3924_v31  ;;  %v5226_v33 = vpop.f32.mrb[78].mxu1 }
0x1336   : > { %v3965_v30 = vmul.f32 0.044715, %v3933_v43  ;;  %v3936_v0 = vadd.f32 %v5226_v33, %v4865_v11  ;;  %v3927_v48 = vpop.f32.mrb[79].mxu1  ;;  %v3957_v39 = vmul.f32 0.5, %v3933_v43 }
0x1337   : > { %v3963_v38 = vmul.f32 0.044715, %v3925_v41  ;;  %v3928_v42 = vadd.f32 %v4865_v11, %v3927_v48  ;;  %v3955_v23 = vmul.f32 0.5, %v3925_v41 }
0x1338   : > { %v3973_v56 = vmul.f32 %v3965_v30, %v3933_v43  ;;  %v3966_v1 = vmul.f32 0.044715, %v3936_v0  ;;  %v3958_v28 = vmul.f32 0.5, %v3936_v0 }
0x1339   : > { %v3971_v57 = vmul.f32 %v3963_v38, %v3925_v41  ;;  %v3964_v63 = vmul.f32 0.044715, %v3928_v42  ;;  %v3956_v36 = vmul.f32 0.5, %v3928_v42 }
0x133a   : > { %v3981_v46 = vmul.f32 %v3973_v56, %v3933_v43  ;;  %v3974_v52 = vmul.f32 %v3966_v1, %v3936_v0 }
0x133b   : > { %v3979_v9 = vmul.f32 %v3971_v57, %v3925_v41  ;;  %v3972_v53 = vmul.f32 %v3964_v63, %v3928_v42 }
0x133c   : > { %v3989_v3 = vadd.f32 %v3981_v46, %v3933_v43  ;;  %v3982_v61 = vmul.f32 %v3974_v52, %v3936_v0 }
0x133d   : > { %v3980_v51 = vmul.f32 %v3972_v53, %v3928_v42  ;;  %v3987_v12 = vadd.f32 %v3979_v9, %v3925_v41 }
0x133e   : > { %v3997_v60 = vmul.f32 0.7978846, %v3989_v3  ;;  %v3990_v4 = vadd.f32 %v3982_v61, %v3936_v0 }
0x133f   : > { %v3988_v35 = vadd.f32 %v3980_v51, %v3928_v42  ;;  %v3995_v40 = vmul.f32 0.7978846, %v3987_v12 }
0x1340   : > { %5702 = vtanh.f32 %v3997_v60  ;;  %v3998_v62 = vmul.f32 0.7978846, %v3990_v4 }
0x1341   : > { %v3996_v58 = vmul.f32 0.7978846, %v3988_v35  ;;  %5704 = vtanh.f32 %v3995_v40 }
0x1342   : > { %5706 = vtanh.f32 %v3998_v62 }
0x1343   : > { %5708 = vtanh.f32 %v3996_v58 }
0x134a   : > { %v5703_v22 = vpop.eup %5702 }
0x134b   : > { %v5705_v29 = vpop.eup %5704  ;;  %v4013_v50 = vadd.f32 1.0, %v5703_v22 }
0x134c   : > { %v5707_v27 = vpop.eup %5706  ;;  %v4011_v21 = vadd.f32 1.0, %v5705_v29 }
0x134d   : > { %v5709_v17 = vpop.eup %5708  ;;  %v4014_v37 = vadd.f32 1.0, %v5707_v27  ;;  %v4021_v26 = vmul.f32 %v4013_v50, %v3957_v39 }
0x134e   : > { %v4012_v6 = vadd.f32 1.0, %v5709_v17  ;;  %v4019_v8 = vmul.f32 %v4011_v21, %v3955_v23 }
0x134f   : > { %v4022_v7 = vmul.f32 %v4014_v37, %v3958_v28 }
0x1350   : > { %v4020_v5 = vmul.f32 %v4012_v6, %v3956_v36  ;;  %v4872_v36 = vld [vmem:[%s1001_s20] ss:$0 sm:$0xff] }
0x1351   : > { %v4028_v32 = vpack.c.bf16 %v4022_v7, %v4021_v26 }
0x1352   : > { %v4027_v34 = vpack.c.bf16 %v4020_v5, %v4019_v8 }
0x1354   : > { %5247 = vmatprep.mubr.bf16.mxu0 %v4027_v34 }
0x1355   : > { %5248 = vmatmul.mubr.bf16.vlgmr.msra.gmra.mrb[68].mxu0 %v4028_v32 }
0x136d   : > { %v5229_v55 = vpop.f32.mrb[80].mxu1 }
0x136e   : > { %v3949_v59 = vadd.f32 %v5229_v55, %v4865_v11  ;;  %v3940_v20 = vpop.f32.mrb[81].mxu1 }
0x136f   : > { %v3941_v14 = vadd.f32 %v4865_v11, %v3940_v20  ;;  %v5230_v44 = vpop.f32.mrb[82].mxu1 }
0x1370   : > { %v3969_v47 = vmul.f32 0.044715, %v3949_v59  ;;  %v3952_v2 = vadd.f32 %v5230_v44, %v4865_v11  ;;  %v3943_v49 = vpop.f32.mrb[83].mxu1  ;;  %v3961_v62 = vmul.f32 0.5, %v3949_v59 }
0x1371   : > { %v3967_v43 = vmul.f32 0.044715, %v3941_v14  ;;  %v3944_v31 = vadd.f32 %v4865_v11, %v3943_v49  ;;  %v3959_v29 = vmul.f32 0.5, %v3941_v14 }
0x1372   : > { %v3977_v41 = vmul.f32 %v3969_v47, %v3949_v59  ;;  %v3970_v33 = vmul.f32 0.044715, %v3952_v2  ;;  %v3962_v58 = vmul.f32 0.5, %v3952_v2 }
0x1373   : > { %v3975_v30 = vmul.f32 %v3967_v43, %v3941_v14  ;;  %v3968_v0 = vmul.f32 0.044715, %v3944_v31  ;;  %v3960_v50 = vmul.f32 0.5, %v3944_v31 }
0x1374   : > { %v3985_v48 = vmul.f32 %v3977_v41, %v3949_v59  ;;  %v3978_v38 = vmul.f32 %v3970_v33, %v3952_v2 }
0x1375   : > { %v3983_v42 = vmul.f32 %v3975_v30, %v3941_v14  ;;  %v3976_v56 = vmul.f32 %v3968_v0, %v3944_v31 }
0x1376   : > { %v3986_v1 = vmul.f32 %v3978_v38, %v3952_v2  ;;  %v3993_v57 = vadd.f32 %v3985_v48, %v3949_v59 }
0x1377   : > { %v3984_v63 = vmul.f32 %v3976_v56, %v3944_v31  ;;  %v3991_v46 = vadd.f32 %v3983_v42, %v3941_v14 }
0x1378   : > { %v3994_v52 = vadd.f32 %v3986_v1, %v3952_v2  ;;  %v4001_v9 = vmul.f32 0.7978846, %v3993_v57 }
0x1379   : > { %v3992_v53 = vadd.f32 %v3984_v63, %v3944_v31  ;;  %v3999_v3 = vmul.f32 0.7978846, %v3991_v46 }
0x137a   : > { %v4002_v61 = vmul.f32 0.7978846, %v3994_v52  ;;  %5710 = vtanh.f32 %v4001_v9 }
0x137b   : > { %v4000_v51 = vmul.f32 0.7978846, %v3992_v53  ;;  %5712 = vtanh.f32 %v3999_v3 }
0x137c   : > { %5714 = vtanh.f32 %v4002_v61 }
0x137d   : > { %5716 = vtanh.f32 %v4000_v51 }
0x1384   : > { %v5711_v11 = vpop.eup %5710 }
0x1385   : > { %v5713_v12 = vpop.eup %5712  ;;  %v4017_v60 = vadd.f32 1.0, %v5711_v11 }
0x1386   : > { %v5715_v4 = vpop.eup %5714  ;;  %v4015_v35 = vadd.f32 1.0, %v5713_v12 }
0x1387   : > { %v5717_v40 = vpop.eup %5716  ;;  %v4018_v22 = vadd.f32 1.0, %v5715_v4  ;;  %v4025_v21 = vmul.f32 %v4017_v60, %v3961_v62 }
0x1388   : > { %v4016_v27 = vadd.f32 1.0, %v5717_v40  ;;  %v4023_v39 = vmul.f32 %v4015_v35, %v3959_v29 }
0x1389   : > { %v4026_v17 = vmul.f32 %v4018_v22, %v3962_v58 }
0x138a   : > { %v4024_v28 = vmul.f32 %v4016_v27, %v3960_v50 }
0x138b   : > { %v4030_v37 = vpack.c.bf16 %v4026_v17, %v4025_v21 }
0x138c   : > { %v4029_v23 = vpack.c.bf16 %v4024_v28, %v4023_v39 }
0x138e   : > { %5251 = vmatprep.mubr.bf16.mxu0 %v4029_v23 }
0x138f   : > { %5252 = vmatmul.mubr.bf16.gmra.mrb[72].mxu0 %v4030_v37 }
0x1428   : > { %v5249_v6 = vpop.f32.mrb[68].mxu0 }
0x1429   : > { %v4145_v26 = vadd.f32 %v5249_v6, %v4872_v36  ;;  %v4136_v7 = vpop.f32.mrb[69].mxu0 }
0x142a   : > { %v4137_v8 = vadd.f32 %v4872_v36, %v4136_v7  ;;  %v5250_v5 = vpop.f32.mrb[70].mxu0 }
0x142b   : > { %v4169_v32 = vadd.f32 %v4145_v26, %v7833_v15  ;;  %v4148_v34 = vadd.f32 %v5250_v5, %v4872_v36  ;;  %v4139_v55 = vpop.f32.mrb[71].mxu0 }
0x142c   : > { %v4167_v59 = vadd.f32 %v4137_v8, %v7831_v10  ;;  %v4140_v20 = vadd.f32 %v4872_v36, %v4139_v55 }
0x142d   : > { %4177 = vst.msk [vmem:[#allocation2 + $0x10] sm:$0xff] %vm1256_vm3, %v4169_v32  ;;  %v4170_v14 = vadd.f32 %v4148_v34, %v7841_v16 }
0x142e   : > { %4175 = vst.msk [vmem:[#allocation2] sm:$0xff] %vm1256_vm3, %v4167_v59  ;;  %v4168_v44 = vadd.f32 %v4140_v20, %v7835_v45 }
0x142f   : > { %4178 = vst.msk [vmem:[#allocation2 + $0x18] sm:$0xff] %vm1256_vm3, %v4170_v14 }
0x1430   : > { %4176 = vst.msk [vmem:[#allocation2 + $0x8] sm:$0xff] %vm1256_vm3, %v4168_v44  ;;  %v4192_v0 = vsel (!%p4881_p8), %vm1256_vm3, %v4168_v44, 0.0 }
0x1462   : > { %v5253_v47 = vpop.f32.mrb[72].mxu0 }
0x1463   : > { %v4161_v2 = vadd.f32 %v5253_v47, %v4872_v36  ;;  %v4152_v15 = vpop.f32.mrb[73].mxu0 }
0x1464   : > { %v4153_v49 = vadd.f32 %v4872_v36, %v4152_v15  ;;  %v5254_v43 = vpop.f32.mrb[74].mxu0  ;;  %4186 = sbr.rel (%p4881_p8) target bundleno = 5709 (0x164d), region = 184 }
0x1465   : > { %v7952_v10 = vadd.f32 %v4161_v2, %v7849_v13  ;;  %v4164_v31 = vadd.f32 %v5254_v43, %v4872_v36  ;;  %v4155_v41 = vpop.f32.mrb[75].mxu0  ;;  %v4189_v13 = vsel (!%p4881_p8), %vm1256_vm3, %v4167_v59, 0.0 }
0x1466   : > { %v4171_v16 = vadd.f32 %v4153_v49, %v7847_v24  ;;  %v4156_v33 = vadd.f32 %v4872_v36, %v4155_v41  ;;  %v4195_v24 = vsel (!%p4881_p8), %vm1256_vm3, %v4169_v32, 0.0  ;;  %4190 = vadd.xlane.f32.xlu0 (!%p4881_p8), %v4189_v13 }
0x1467   : > { %4181 = vst.msk [vmem:[#allocation2 + $0x30] sm:$0xff] %vm1256_vm3, %v7952_v10  ;;  %v4174_v45 = vadd.f32 %v4164_v31, %v7855_v25  ;;  %4196 = vadd.xlane.f32.xlu1 (!%p4881_p8), %v4195_v24  ;;  %v4198_v25 = vsel (!%p4881_p8), %vm1256_vm3, %v4170_v14, 0.0  ;;  %v4207_v38 = vsel (!%p4881_p8), %vm1256_vm3, %v7952_v10, 0.0 }
0x1468   : > { %4179 = vst.msk [vmem:[#allocation2 + $0x20] sm:$0xff] %vm1256_vm3, %v4171_v16  ;;  %v4172_v30 = vadd.f32 %v4156_v33, %v7851_v54  ;;  %v4201_v54 = vsel (!%p4881_p8), %vm1256_vm3, %v4171_v16, 0.0 }
0x1469   : > { %4182 = vst.msk [vmem:[#allocation2 + $0x38] sm:$0xff] %vm1256_vm3, %v4174_v45  ;;  %v4210_v42 = vsel (!%p4881_p8), %vm1256_vm3, %v4174_v45, 0.0 }
0x146a   : > { %4180 = vst.msk [vmem:[#allocation2 + $0x28] sm:$0xff] %vm1256_vm3, %v4172_v30  ;;  %4193 = vadd.xlane.f32.xlu0 (!%p4881_p8), %v4192_v0  ;;  %v4204_v48 = vsel (!%p4881_p8), %vm1256_vm3, %v4172_v30, 0.0 }
0x146b   : > { %4199 = vadd.xlane.f32.xlu1 %v4198_v25 }
0x146e   : > { %4202 = vadd.xlane.f32.xlu0 %v4201_v54 }
0x146f   : > { %4205 = vadd.xlane.f32.xlu1 %v4204_v48 }
0x1472   : > { %4208 = vadd.xlane.f32.xlu0 %v4207_v38 }
0x1473   : > { %4211 = vadd.xlane.f32.xlu1 %v4210_v42 }
0x14f3   : > { %v4191_v56 = vpop.xlane.xlu0 %4190 }
0x14f4   : > { %v4197_v1 = vpop.xlane.xlu1 %4196  ;;  %v4213_v57 = vmul.f32 0.03125, %v4191_v56 }
0x14f5   : > { %v4215_v63 = vmul.f32 0.03125, %v4197_v1  ;;  %v4882_v1 = vld [vmem:[#allocation24] ss:$0 sm:$0xff] }
0x14f6   : > { %v7972_v46 = vsub.f32 %v4167_v59, %v4213_v57 }
0x14f7   : > { %v7974_v52 = vsub.f32 %v4169_v32, %v4215_v63  ;;  %v4194_v9 = vpop.xlane.xlu0 %4193 }
0x14f8   : > { %v4200_v53 = vpop.xlane.xlu1 %4199  ;;  %v4214_v3 = vmul.f32 0.03125, %v4194_v9  ;;  %v4229_v51 = vmul.f32 %v7972_v46, %v7972_v46 }
0x14f9   : > { %v4216_v61 = vmul.f32 0.03125, %v4200_v53  ;;  %v4231_v11 = vmul.f32 %v7974_v52, %v7974_v52  ;;  %v4883_v53 = vld [vmem:[#allocation25] ss:$0 sm:$0xff] }
0x14fa   : > { %v7980_v12 = vsub.f32 %v4168_v44, %v4214_v3  ;;  %v4237_v4 = vsel %vm1256_vm3, %v4229_v51, 0.0 }
0x14fb   : > { %v7982_v60 = vsub.f32 %v4170_v14, %v4216_v61  ;;  %4238 = vadd.xlane.f32.xlu0 %v4237_v4  ;;  %v4203_v35 = vpop.xlane.xlu0 %4202  ;;  %v4243_v62 = vsel %vm1256_vm3, %v4231_v11, 0.0  ;;  %v6444_v14 = vmov 0   ;;  %v4884_v11 = vld [vmem:[#allocation26] ss:$0 sm:$0xff] }
0x14fc   : > { %v4206_v40 = vpop.xlane.xlu1 %4205  ;;  %v4217_v58 = vmul.f32 0.03125, %v4203_v35  ;;  %v4230_v29 = vmul.f32 %v7980_v12, %v7980_v12  ;;  %5726 = vset.pattern.permute.xlu0 %v6444_v14 }
0x14fd   : > { %v4218_v22 = vmul.f32 0.03125, %v4206_v40  ;;  %v4232_v50 = vmul.f32 %v7982_v60, %v7982_v60 }
0x14fe   : > { %v7990_v27 = vsub.f32 %v4171_v16, %v4217_v58  ;;  %v4240_v17 = vsel %vm1256_vm3, %v4230_v29, 0.0 }
0x14ff   : > { %v7992_v21 = vsub.f32 %v4172_v30, %v4218_v22  ;;  %4244 = vadd.xlane.f32.xlu0 %v4243_v62  ;;  %4241 = vadd.xlane.f32.xlu1 %v4240_v17  ;;  %v4209_v39 = vpop.xlane.xlu0 %4208  ;;  %v4246_v37 = vsel %vm1256_vm3, %v4232_v50, 0.0 }
0x1500   : > { %v4212_v28 = vpop.xlane.xlu1 %4211  ;;  %v4219_v23 = vmul.f32 0.03125, %v4209_v39  ;;  %v4233_v6 = vmul.f32 %v7990_v27, %v7990_v27 }
0x1501   : > { %v4220_v36 = vmul.f32 0.03125, %v4212_v28  ;;  %v4234_v26 = vmul.f32 %v7992_v21, %v7992_v21 }
0x1502   : > { %v8001_v7 = vsub.f32 %v7952_v10, %v4219_v23  ;;  %v4249_v5 = vsel %vm1256_vm3, %v4233_v6, 0.0 }
0x1503   : > { %v8003_v8 = vsub.f32 %v4174_v45, %v4220_v36  ;;  %4247 = vadd.xlane.f32.xlu1 %v4246_v37  ;;  %4250 = vadd.xlane.f32.xlu0 %v4249_v5  ;;  %v4252_v32 = vsel %vm1256_vm3, %v4234_v26, 0.0 }
0x1504   : > { %v4235_v34 = vmul.f32 %v8001_v7, %v8001_v7 }
0x1505   : > { %v4236_v55 = vmul.f32 %v8003_v8, %v8003_v8 }
0x1506   : > { %v4255_v59 = vsel %vm1256_vm3, %v4235_v34, 0.0 }
0x1507   : > { %4253 = vadd.xlane.f32.xlu1 %v4252_v32  ;;  %4256 = vadd.xlane.f32.xlu0 %v4255_v59  ;;  %v4258_v20 = vsel %vm1256_vm3, %v4236_v55, 0.0 }
0x150b   : > { %4259 = vadd.xlane.f32.xlu1 %v4258_v20 }
0x1588   : > { %v4239_v44 = vpop.xlane.xlu0 %4238 }
0x1589   : > { %v4261_v47 = vmul.f32 0.03125, %v4239_v44 }
0x158b   : > { %v4269_v2 = vadd.f32 1e-05, %v4261_v47 }
0x158c   : > { %v4242_v15 = vpop.xlane.xlu1 %4241  ;;  %v4245_v49 = vpop.xlane.xlu0 %4244 }
0x158d   : > { %5727 = vrsqrt.f32 %v4269_v2  ;;  %v4262_v43 = vmul.f32 0.03125, %v4242_v15  ;;  %v4263_v10 = vmul.f32 0.03125, %v4245_v49 }
0x158f   : > { %v4270_v31 = vadd.f32 1e-05, %v4262_v43  ;;  %v4271_v41 = vadd.f32 1e-05, %v4263_v10 }
0x1590   : > { %v4248_v16 = vpop.xlane.xlu1 %4247  ;;  %v4251_v33 = vpop.xlane.xlu0 %4250 }
0x1591   : > { %5729 = vrsqrt.f32 %v4270_v31  ;;  %v4264_v45 = vmul.f32 0.03125, %v4248_v16  ;;  %v4265_v30 = vmul.f32 0.03125, %v4251_v33 }
0x1592   : > { %5731 = vrsqrt.f32 %v4271_v41 }
0x1593   : > { %v4272_v13 = vadd.f32 1e-05, %v4264_v45  ;;  %v4273_v24 = vadd.f32 1e-05, %v4265_v30 }
0x1594   : > { %v4254_v0 = vpop.xlane.xlu1 %4253  ;;  %v4257_v25 = vpop.xlane.xlu0 %4256 }
0x1595   : > { %5733 = vrsqrt.f32 %v4272_v13  ;;  %v4266_v54 = vmul.f32 0.03125, %v4254_v0  ;;  %v4267_v48 = vmul.f32 0.03125, %v4257_v25 }
0x1596   : > { %5735 = vrsqrt.f32 %v4273_v24 }
0x1597   : > { %v5728_v38 = vpop.eup %5727  ;;  %v4274_v42 = vadd.f32 1e-05, %v4266_v54  ;;  %v4275_v56 = vadd.f32 1e-05, %v4267_v48 }
0x1598   : > { %v4260_v57 = vpop.xlane.xlu1 %4259  ;;  %v4285_v63 = vmul.f32 %v5728_v38, %v7972_v46 }
0x1599   : > { %5737 = vrsqrt.f32 %v4274_v42  ;;  %v4268_v9 = vmul.f32 0.03125, %v4260_v57  ;;  %v4390_v42 = vadd.s32 4294967288, %v7317_v19 }
0x159a   : > { %5739 = vrsqrt.f32 %v4275_v56  ;;  %v4299_v3 = vmul.f32 %v4882_v1, %v4285_v63 }
0x159b   : > { %v5730_v61 = vpop.eup %5729  ;;  %v4276_v51 = vadd.f32 1e-05, %v4268_v9  ;;  %v4393_v57 = vsub.s32 %v4390_v42, %v7315_v18 }
0x159c   : > { %v5732_v4 = vpop.eup %5731  ;;  %v4313_v35 = vadd.f32 %v4883_v53, %v4299_v3  ;;  %v4286_v40 = vmul.f32 %v5730_v61, %v7980_v12 }
0x159d   : > { %5741 = vrsqrt.f32 %v4276_v51  ;;  %v4287_v62 = vmul.f32 %v5732_v4, %v7974_v52 }
0x159e   : > { %v4328_v58 = vmul.f32 %v4884_v11, %v4313_v35  ;;  %v4300_v22 = vmul.f32 %v4882_v1, %v4286_v40 }
0x159f   : > { %v5734_v29 = vpop.eup %5733  ;;  %v4301_v50 = vmul.f32 %v4882_v1, %v4287_v62 }
0x15a0   : > { %v5736_v46 = vpop.eup %5735  ;;  %v4336_v17 = vsel %vm1256_vm3, %v4328_v58, 0.0  ;;  %v4314_v39 = vadd.f32 %v4883_v53, %v4300_v22  ;;  %v4288_v28 = vmul.f32 %v5734_v29, %v7982_v60 }
0x15a1   : > { %4337 = vadd.xlane.f32.xlu0 %v4336_v17  ;;  %v4315_v37 = vadd.f32 %v4883_v53, %v4301_v50  ;;  %v4289_v23 = vmul.f32 %v5736_v46, %v7990_v27 }
0x15a2   : > { %v4329_v36 = vmul.f32 %v4884_v11, %v4314_v39  ;;  %v4302_v6 = vmul.f32 %v4882_v1, %v4288_v28 }
0x15a3   : > { %v5738_v12 = vpop.eup %5737  ;;  %v4330_v26 = vmul.f32 %v4884_v11, %v4315_v37  ;;  %v4303_v5 = vmul.f32 %v4882_v1, %v4289_v23 }
0x15a4   : > { %v5740_v52 = vpop.eup %5739  ;;  %v4339_v32 = vsel %vm1256_vm3, %v4329_v36, 0.0  ;;  %v4316_v34 = vadd.f32 %v4883_v53, %v4302_v6  ;;  %v4290_v55 = vmul.f32 %v5738_v12, %v7992_v21 }
0x15a5   : > { %4340 = vadd.xlane.f32.xlu1 %v4339_v32  ;;  %v4342_v59 = vsel %vm1256_vm3, %v4330_v26, 0.0  ;;  %v4317_v20 = vadd.f32 %v4883_v53, %v4303_v5  ;;  %v4291_v60 = vmul.f32 %v5740_v52, %v8001_v7 }
0x15a6   : > { %4343 = vadd.xlane.f32.xlu0 %v4342_v59  ;;  %v4331_v14 = vmul.f32 %v4884_v11, %v4316_v34  ;;  %v4304_v27 = vmul.f32 %v4882_v1, %v4290_v55 }
0x15a7   : > { %v5742_v44 = vpop.eup %5741  ;;  %v4332_v47 = vmul.f32 %v4884_v11, %v4317_v20  ;;  %v4305_v2 = vmul.f32 %v4882_v1, %v4291_v60 }
0x15a8   : > { %v4345_v15 = vsel %vm1256_vm3, %v4331_v14, 0.0  ;;  %v4318_v49 = vadd.f32 %v4883_v53, %v4304_v27  ;;  %v4292_v43 = vmul.f32 %v5742_v44, %v8003_v8  ;;  %v4885_v8 = vld [vmem:[#allocation3] ss:$0 sm:$0xff] }
0x15a9   : > { %4346 = vadd.xlane.f32.xlu1 %v4345_v15  ;;  %v4348_v21 = vsel %vm1256_vm3, %v4332_v47, 0.0  ;;  %v4319_v10 = vadd.f32 %v4883_v53, %v4305_v2 }
0x15aa   : > { %4349 = vadd.xlane.f32.xlu0 %v4348_v21  ;;  %v4333_v31 = vmul.f32 %v4884_v11, %v4318_v49  ;;  %v4306_v41 = vmul.f32 %v4882_v1, %v4292_v43  ;;  %v4388_v1 = vsub.s32 %v7317_v19, %v7315_v18 }
0x15ab   : > { %v4334_v16 = vmul.f32 %v4884_v11, %v4319_v10 }
0x15ac   : > { %v4351_v7 = vsel %vm1256_vm3, %v4333_v31, 0.0  ;;  %v4320_v33 = vadd.f32 %v4883_v53, %v4306_v41 }
0x15ad   : > { %4352 = vadd.xlane.f32.xlu1 %v4351_v7  ;;  %v4354_v45 = vsel %vm1256_vm3, %v4334_v16, 0.0 }
0x15ae   : > { %4355 = vadd.xlane.f32.xlu0 %v4354_v45  ;;  %v4335_v30 = vmul.f32 %v4884_v11, %v4320_v33 }
0x15b0   : > { %v4357_v13 = vsel %vm1256_vm3, %v4335_v30, 0.0 }
0x15b1   : > { %4358 = vadd.xlane.f32.xlu1 %v4357_v13 }
0x15c4   : > { %4367 = vperm.xlu0 %5726, %v4885_v8  }
0x162e   : > { %v4338_v24 = vpop.xlane.xlu0 %4337 }
0x1632   : > { %v4341_v0 = vpop.xlane.xlu1 %4340 }
0x1633   : > { %v4344_v25 = vpop.xlane.xlu0 %4343 }
0x1636   : > { %v4347_v54 = vpop.xlane.xlu1 %4346 }
0x1637   : > { %v4350_v48 = vpop.xlane.xlu0 %4349 }
0x163a   : > { %v4353_v38 = vpop.xlane.xlu1 %4352 }
0x163b   : > { %v4356_v56 = vpop.xlane.xlu0 %4355 }
0x163e   : > { %v4359_v9 = vpop.xlane.xlu1 %4358 }
0x1643   : > { %v4368_v63 = vpop.permute.xlu0 %4367 }
0x1644   : > { %v4370_v53 = vadd.f32 %v4368_v63, %v4338_v24  ;;  %v4371_v3 = vadd.f32 %v4368_v63, %v4341_v0  ;;  %v4372_v61 = vadd.f32 %v4368_v63, %v4344_v25  ;;  %v4373_v51 = vadd.f32 %v4368_v63, %v4347_v54 }
0x1645   : > { %v4374_v11 = vadd.f32 %v4368_v63, %v4350_v48  ;;  %v4375_v4 = vadd.f32 %v4368_v63, %v4353_v38  ;;  %v4376_v35 = vadd.f32 %v4368_v63, %v4356_v56  ;;  %v4377_v40 = vadd.f32 %v4368_v63, %v4359_v9 }
0x1646   : > { %v4389_v62 = vrot.slane %v4370_v53, %v4388_v1  ;;  %v4394_v58 = vrot.slane %v4371_v3, %v4393_v57  ;;  %v4400_v22 = vrot.slane %v4372_v61, %v4388_v1  ;;  %v4404_v29 = vrot.slane %v4373_v51, %v4393_v57 }
0x1647   : > { %v4409_v19 = vrot.slane %v4374_v11, %v4388_v1  ;;  %v4413_v50 = vrot.slane %v4375_v4, %v4393_v57  ;;  %v4418_v18 = vrot.slane %v4376_v35, %v4388_v1  ;;  %v4422_v46 = vrot.slane %v4377_v40, %v4393_v57 }
0x1648   : > { %v4396_v17 = vsel %vm4395_vm10, %v4394_v58, %v4389_v62  ;;  %v4405_v39 = vsel %vm4395_vm10, %v4404_v29, %v4400_v22 }
0x1649   : > { %v4414_v28 = vsel %vm4395_vm10, %v4413_v50, %v4409_v19  ;;  %v4425_v37 = vsel %vm4424_vm11, %v4405_v39, %v4396_v17  ;;  %v4423_v23 = vsel %vm4395_vm10, %v4422_v46, %v4418_v18 }
0x164a   : > { %v4427_v36 = vsel %vm4426_vm12, %v4414_v28, %v4425_v37 }
0x164b   : > { %v4429_v6 = vsel %vm4428_vm13, %v4423_v23, %v4427_v36 }
0x164c   : > { %4432 = vst.msk [vmem:[#allocation28] sm:$0xf] %vm4431_vm14, %v4429_v6 }
0x164d PF: > { %s8242_s11 = sld [smem:[#allocation41_spill]]  ;;  %s6445_s30 = smov [#allocation28]  }
0x164e   : > { %s4442_s8 = sshll.u32 %s6445_s30, 4  ;;  %s4443_s8 = int_to_ptr.vmem [resolvable:$true] %s4442_s8 }
0x164f   : > { %s6299_s2 = scalar_lea.vmem %s4443_s8, 64  ;;  %p6306_p0 = scmp.lt.s32.totalorder %s4443_s8, %s4443_s8 }
0x1650   : > { %p6300_p3 = scmp.ne.s32.totalorder %s4443_s8, %s6299_s2  ;;  %p6307_p2 = scmp.lt.s32.totalorder %s6299_s2, %s6299_s2 }
0x1652   : > { %p6308_p5 = por %p6307_p2, %p6306_p0 }
0x1653   : > { %p5389_p1 = scmp.eq.s32.totalorder %s8242_s11, 1 }
0x1655   : > { %p6301_p10 = pnand %p6300_p3, %p5389_p1 }
0x1657   : > { %p6302_p11 = pneg %p6301_p10 }
0x1659   : > { %p6309_p7 = pnand %p6308_p5, %p6302_p11 }
0x165b   : > { %6312 = shalt.err (!%p6309_p7)
}
0x165c   : > { %s8243_s1 = sld [smem:[#allocation63_spill]] }
0x1662   : > { %s6313_s25 = scalar_lea.hbm %s8243_s1, 64 }
0x1663   : > { %p6314_p4 = scmp.ne.s32.totalorder %s8243_s1, %s6313_s25  ;;  %p6319_p13 = scmp.lt.u32.totalorder %s6313_s25, %s8243_s1 }
0x1665   : > { %p6315_p12 = pnand %p6314_p4, %p5389_p1 }
0x1667   : > { %p6316_p6 = pneg %p6315_p12 }
0x1669   : > { %p6321_p9 = pnand %p6319_p13, %p6316_p6 }
0x166b   : > { %6324 = shalt.err (!%p6321_p9)
}
0x166c   : > { %5312 = dma.vmem_to_hbm [thread:$0]  (%p5389_p1), %s4443_s8, 64, %s8243_s1, [#allocation6]  }
0x166d   : > { %6378 = dma.done.wait (%p5389_p1), [#allocation6], 64  }
0x166e   : > { %6380 = vsyncadd (%p5389_p1), [#allocation6], 4294967232 }
0x166f PF: > { %s8244_s7 = sld [smem:[#allocation40_spill]]  ;;  %s8245_s23 = sld [smem:[#allocation37_spill]] }
0x1670   : > { %s8246_s24 = sld [smem:[#allocation38_spill]]  ;;  %s8247_s2 = sld [smem:[#allocation45_spill]] }
0x1671   : > { %s8248_s9 = sld [smem:[#allocation44_spill]]  ;;  %s8249_s25 = smov %s6399_s3 }
0x1675   : > { %s37_s26 = sadd.s32 1, %s8244_s7  }
0x1676   : > { %p34_p8 = scmp.ge.s32.totalorder %s37_s26, 4  }
0x1677   : > { %s8250_s3 = smov %s8248_s9 }
0x1678   :  { %36 = sbr.rel (!%p34_p8) target bundleno = 26 (0x1a), region = 295 }
0x167f   :  { %4455 = vsyncpa [#allocation5], 1 }
0x1680   :  { %4457 = vsyncpa [#allocation5 + $0x1], 1 }
0x1681   :  { %4458 = vsyncpa [#allocation8], 1 }
0x1682   :  { %4459 = vsyncpa [#allocation11], 1 }
0x1683   :  { %4460 = vsyncpa [#allocation27], 1 }
0x1684   :  { %4461 = vsyncpa [#allocation6], 1 }
0x1685   :  { %4463 = vsyncpa [#allocation6 + $0x1], 1 }

</bundles_post_ra>
